<compile_context>
chip_gen: v5e
topology: v5e:2x2
jax: 0.10.0
libtpu: 0.0.40
codegen_flags: <defaults>
</compile_context>

<pallas_src>
import numpy as np
import jax
import jax.numpy as jnp
from jax import lax
from jax.experimental import pallas as pl
from jax.experimental.pallas import tpu as pltpu


# --------------------------------------------------------------------------
# Helpers
# --------------------------------------------------------------------------
def _const_spec(a):
    """Whole-array BlockSpec for weights; single VMEM buffer (index is fixed)."""
    nd = a.ndim
    idx = lambda i, _nd=nd: (0,) * _nd
    try:
        return pl.BlockSpec(a.shape, idx, pipeline_mode=pl.Buffered(1))
    except TypeError:  # older jax without pipeline_mode: fall back to default
        return pl.BlockSpec(a.shape, idx)


def _vmem_limit(nbytes_estimate):
    # generous headroom, floored at the default scoped limit, capped well under
    # physical VMEM.
    return int(min(max(2 * nbytes_estimate + (8 << 20), 32 << 20), 96 << 20))


# --------------------------------------------------------------------------
# Bidirectional LSTM layer kernel (both directions in one chunked sweep)
# --------------------------------------------------------------------------
def _make_bilstm_layer_kernel(N, TC, H, din_slabs):
    nslab = len(din_slabs)
    G = 4 * H  # gates [i, f, g, o] along the lane axis
    # NOTE: at real sizes keep H a multiple of 128 so the gate slices below are
    # 128-lane aligned static views (toy H=32 here).

    def kernel(*refs):
        k = 0
        xf = refs[k:k + nslab]; k += nslab          # fwd chunk slabs (TC, N, d) bf16
        xb = refs[k:k + nslab]; k += nslab          # bwd chunk slabs (TC, N, d) bf16
        wih_f = refs[k:k + nslab]; k += nslab       # (d, 4H) bf16
        wih_b = refs[k:k + nslab]; k += nslab
        whh_f_ref, whh_b_ref, bias_f_ref, bias_b_ref = refs[k:k + 4]; k += 4
        out_f_ref, out_b_ref = refs[k:k + 2]; k += 2        # (TC, N, H) bf16
        hf, cf, hb, cb, xg_f_s, xg_b_s = refs[k:k + 6]      # VMEM scratch

        step = pl.program_id(0)

        @pl.when(step == 0)
        def _():
            hf[...] = jnp.zeros_like(hf)
            cf[...] = jnp.zeros_like(cf)
            hb[...] = jnp.zeros_like(hb)
            cb[...] = jnp.zeros_like(cb)

        # Chunk-wide input projection: lane-dense (TC*N, d) x (d, 4H) bf16 MXU
        # matmuls with f32 accumulation, staged time-major into VMEM scratch so
        # the serial loop reads one contiguous (N, 4H) slab per timestep.
        xg_f = jnp.dot(xf[0][...].reshape(TC * N, din_slabs[0]), wih_f[0][...],
                       preferred_element_type=jnp.float32)
        xg_b = jnp.dot(xb[0][...].reshape(TC * N, din_slabs[0]), wih_b[0][...],
                       preferred_element_type=jnp.float32)
        for s in range(1, nslab):
            d = din_slabs[s]
            xg_f = xg_f + jnp.dot(xf[s][...].reshape(TC * N, d), wih_f[s][...],
                                  preferred_element_type=jnp.float32)
            xg_b = xg_b + jnp.dot(xb[s][...].reshape(TC * N, d), wih_b[s][...],
                                  preferred_element_type=jnp.float32)
        xg_f_s[...] = xg_f.reshape(TC, N, G)
        xg_b_s[...] = xg_b.reshape(TC, N, G)

        whhf = whh_f_ref[...]        # bf16 (H, 4H)
        whhb = whh_b_ref[...]
        bias_f = bias_f_ref[...]     # f32 (1, 4H)
        bias_b = bias_b_ref[...]

        def cell(g, c_prev):
            # element-wise cell math in f32 (EUP/VPU path on all generations)
            i_g = jax.nn.sigmoid(g[:, 0:H])
            f_g = jax.nn.sigmoid(g[:, H:2 * H])
            g_g = jnp.tanh(g[:, 2 * H:3 * H])
            o_g = jax.nn.sigmoid(g[:, 3 * H:4 * H])
            c_new = f_g * c_prev + i_g * g_g
            h_new = o_g * jnp.tanh(c_new)
            return h_new, c_new

        def body(tt, carry):
            # forward direction: local time tt of chunk i
            g = (xg_f_s[tt] + bias_f
                 + jnp.dot(hf[...].astype(jnp.bfloat16), whhf,
                           preferred_element_type=jnp.float32))
            h_new, c_new = cell(g, cf[...])
            hf[...] = h_new
            cf[...] = c_new
            out_f_ref[tt] = h_new.astype(out_f_ref.dtype)   # contiguous (N, H) store

            # backward direction: local time TC-1-tt of chunk nc-1-i
            tb = TC - 1 - tt
            gb = (xg_b_s[tb] + bias_b
                  + jnp.dot(hb[...].astype(jnp.bfloat16), whhb,
                            preferred_element_type=jnp.float32))
            hb_new, cb_new = cell(gb, cb[...])
            hb[...] = hb_new
            cb[...] = cb_new
            out_b_ref[tb] = hb_new.astype(out_b_ref.dtype)
            return carry

        lax.fori_loop(0, TC, body, 0, unroll=True)

    return kernel


def bilstm_layer(x_slabs, wih_f_slabs, wih_b_slabs, whh_f, whh_b,
                 bias_f, bias_b, *, H, TC):
    """One bidirectional LSTM layer.

    x_slabs: list of time-major (T, N, Din_s) bf16 activations whose feature
    concat is the layer input ([x] for layer 0, [h_fwd, h_bwd] deeper).
    Returns (h_fwd, h_bwd), each (T, N, H) bf16.
    """
    T, N, _ = x_slabs[0].shape
    assert T % TC == 0, "sequence length must be a multiple of the time chunk"
    nc = T // TC
    din = tuple(int(s.shape[-1]) for s in x_slabs)
    G = 4 * H

    in_specs = (
        [pl.BlockSpec((TC, N, d), lambda i: (i, 0, 0)) for d in din]              # fwd chunk i
        + [pl.BlockSpec((TC, N, d), lambda i: (nc - 1 - i, 0, 0)) for d in din]   # bwd chunk nc-1-i
        + [_const_spec(w) for w in wih_f_slabs]
        + [_const_spec(w) for w in wih_b_slabs]
        + [_const_spec(whh_f), _const_spec(whh_b),
           _const_spec(bias_f), _const_spec(bias_b)]
    )
    args = (list(x_slabs) + list(x_slabs) + list(wih_f_slabs)
            + list(wih_b_slabs) + [whh_f, whh_b, bias_f, bias_b])

    out_shape = (jax.ShapeDtypeStruct((T, N, H), jnp.bfloat16),
                 jax.ShapeDtypeStruct((T, N, H), jnp.bfloat16))
    out_specs = (pl.BlockSpec((TC, N, H), lambda i: (i, 0, 0)),
                 pl.BlockSpec((TC, N, H), lambda i: (nc - 1 - i, 0, 0)))

    # scoped-VMEM budget: single-buffered bf16 weights + double-buffered
    # activation chunks + f32 scratch.
    sdin = sum(din)
    est = (2 * 2 * TC * N * sdin * 2          # input chunks (fwd+bwd, 2 buffers)
           + 2 * 2 * TC * N * H * 2           # output chunks
           + 2 * (sdin * G + H * G) * 2       # weights (bf16, single buffer)
           + 2 * G * 4                        # biases (f32)
           + 4 * N * H * 4 + 2 * TC * N * G * 4)   # h/c + xg scratch

    kernel = _make_bilstm_layer_kernel(N, TC, H, din)

    hf, hb = pl.pallas_call(
        kernel,
        out_shape=out_shape,
        grid_spec=pltpu.PrefetchScalarGridSpec(
            num_scalar_prefetch=0,
            grid=(nc,),
            in_specs=in_specs,
            out_specs=out_specs,
            scratch_shapes=[pltpu.VMEM((N, H), jnp.float32)] * 4
                           + [pltpu.VMEM((TC, N, G), jnp.float32)] * 2),
        compiler_params=pltpu.CompilerParams(
            dimension_semantics=("arbitrary",),         # true time recurrence
            vmem_limit_bytes=_vmem_limit(est)),
    )(*args)
    return hf, hb


# --------------------------------------------------------------------------
# Final Linear kernel (consumes the fwd/bwd slabs directly; lane-dense output)
# --------------------------------------------------------------------------
def _linear_kernel(hf_ref, hb_ref, w1f_ref, w1b_ref, b1_ref, out_ref):
    TL, N, H = hf_ref.shape
    P = out_ref.shape[-1]
    y = (jnp.dot(hf_ref[...].reshape(TL * N, H), w1f_ref[...],
                 preferred_element_type=jnp.float32)
         + jnp.dot(hb_ref[...].reshape(TL * N, H), w1b_ref[...],
                   preferred_element_type=jnp.float32)
         + b1_ref[...])
    out_ref[...] = y.reshape(TL, N, P)


def linear_out(hf, hb, w1, b1, *, outs):
    """w1: (2H, outs), b1: (1, outs).  hf/hb are time-major (T, N, H) bf16."""
    T, N, H = hf.shape
    P = ((outs + 127) // 128) * 128   # lane-dense padded output width
    w1f = jnp.zeros((H, P), jnp.bfloat16).at[:, :outs].set(w1[:H].astype(jnp.bfloat16))
    w1b = jnp.zeros((H, P), jnp.bfloat16).at[:, :outs].set(w1[H:].astype(jnp.bfloat16))
    b1p = jnp.zeros((1, P), jnp.float32).at[:, :outs].set(b1)

    TL = T                            # purely parallel & mem-bound: one big block
    nb = T // TL
    est = (2 * 2 * TL * N * H * 2 + 2 * H * P * 2 + P * 4 + 2 * TL * N * P * 4)

    y_tm = pl.pallas_call(
        _linear_kernel,
        out_shape=jax.ShapeDtypeStruct((T, N, P), jnp.float32),
        grid_spec=pltpu.PrefetchScalarGridSpec(
            num_scalar_prefetch=0,
            grid=(nb,),
            in_specs=[pl.BlockSpec((TL, N, H), lambda i: (i, 0, 0)),
                      pl.BlockSpec((TL, N, H), lambda i: (i, 0, 0)),
                      _const_spec(w1f), _const_spec(w1b), _const_spec(b1p)],
            out_specs=pl.BlockSpec((TL, N, P), lambda i: (i, 0, 0))),
        compiler_params=pltpu.CompilerParams(
            dimension_semantics=("parallel",),
            vmem_limit_bytes=_vmem_limit(est)),
    )(hf, hb, w1f, w1b, b1p)
    # back to batch-first and drop the lane padding (tiny epilogue).
    return jnp.transpose(y_tm, (1, 0, 2))[:, :, :outs]


# --------------------------------------------------------------------------
# Full model forward (eval mode: dropout = identity)
# --------------------------------------------------------------------------
def digital_voicing_forward(x, params, *, H, TC):
    """x: (N, T, ins) float32, batch_first like the PyTorch module."""
    # TODO(synk): training-mode dropout not implemented (eval -> identity).
    x_tm = jnp.transpose(x, (1, 0, 2)).astype(jnp.bfloat16)   # time-major bf16
    slabs = [x_tm]
    for layer in params['layers']:
        off = 0
        wf_slabs, wb_slabs = [], []
        for s in slabs:
            d = s.shape[-1]
            wf_slabs.append(layer['wih_f'][off:off + d].astype(jnp.bfloat16))
            wb_slabs.append(layer['wih_b'][off:off + d].astype(jnp.bfloat16))
            off += d
        hf, hb = bilstm_layer(slabs, wf_slabs, wb_slabs,
                              layer['whh_f'].astype(jnp.bfloat16),
                              layer['whh_b'].astype(jnp.bfloat16),
                              layer['bias_f'], layer['bias_b'],
                              H=H, TC=TC)
        slabs = [hf, hb]
    return linear_out(slabs[0], slabs[1], params['w1'], params['b1'],
                      outs=int(params['w1'].shape[-1]))


# --------------------------------------------------------------------------
# Pure-JAX f32 reference mirroring the PyTorch forward (eval mode)
# --------------------------------------------------------------------------
def reference_forward(x, params, *, H):
    def run_dir(xin, wih, whh, bias, reverse):
        N = xin.shape[0]
        xg = jnp.einsum('ntd,dg->ntg', xin, wih) + bias   # (N, T, 4H)
        if reverse:
            xg = xg[:, ::-1, :]

        def step(carry, g_t):
            h, c = carry
            g = g_t + h @ whh
            i = jax.nn.sigmoid(g[:, 0:H])
            f = jax.nn.sigmoid(g[:, H:2 * H])
            gg = jnp.tanh(g[:, 2 * H:3 * H])
            o = jax.nn.sigmoid(g[:, 3 * H:4 * H])
            c = f * c + i * gg
            h = o * jnp.tanh(c)
            return (h, c), h

        init = (jnp.zeros((N, H), jnp.float32), jnp.zeros((N, H), jnp.float32))
        _, hs = jax.lax.scan(step, init, jnp.swapaxes(xg, 0, 1))
        hs = jnp.swapaxes(hs, 0, 1)
        if reverse:
            hs = hs[:, ::-1, :]
        return hs

    cur = x  # dropout is identity in eval mode
    for layer in params['layers']:
        hf = run_dir(cur, layer['wih_f'], layer['whh_f'], layer['bias_f'], False)
        hb = run_dir(cur, layer['wih_b'], layer['whh_b'], layer['bias_b'], True)
        cur = jnp.concatenate([hf, hb], axis=-1)
    return jnp.einsum('ntd,do->nto', cur, params['w1']) + params['b1']


# --------------------------------------------------------------------------
# Parameters (kernel-friendly layout: W_ih -> (Din, 4H), W_hh -> (H, 4H),
# bias = b_ih + b_hh -> (1, 4H); gate order [i, f, g, o] like PyTorch)
# --------------------------------------------------------------------------
def make_params(key, ins, H, n_layers, outs):
    def n(k, shape, scale=0.1):
        return scale * jax.random.normal(k, shape, jnp.float32)

    keys = jax.random.split(key, n_layers * 6 + 2)
    layers = []
    din = ins
    ki = 0
    for _ in range(n_layers):
        layers.append({
            'wih_f': n(keys[ki + 0], (din, 4 * H)),
            'whh_f': n(keys[ki + 1], (H, 4 * H)),
            'bias_f': n(keys[ki + 2], (1, 4 * H)),
            'wih_b': n(keys[ki + 3], (din, 4 * H)),
            'whh_b': n(keys[ki + 4], (H, 4 * H)),
            'bias_b': n(keys[ki + 5], (1, 4 * H)),
        })
        ki += 6
        din = 2 * H
    w1 = n(keys[ki], (2 * H, outs))
    b1 = n(keys[ki + 1], (1, outs))
    return {'layers': layers, 'w1': w1, 'b1': b1}


if __name__ == "__main__":
    key = jax.random.PRNGKey(0)
    kx, kp = jax.random.split(key)

    # DigitalVoicingModel(ins=8, model_size=32, n_layers=2, dropout=0.2, outs=16)
    N, T, INS, H, NLAYERS, OUTS = 2, 16, 8, 32, 2, 16
    TC = 8   # time-chunk length (any divisor of T; enlarge freely on v6e)

    x = jax.random.normal(kx, (N, T, INS), jnp.float32)   # (batch, seq, features)
    params = make_params(kp, INS, H, NLAYERS, OUTS)

    out = digital_voicing_forward(x, params, H=H, TC=TC)
    out = jax.block_until_ready(out)

    ref = jax.block_until_ready(reference_forward(x, params, H=H))
    assert out.shape == (N, T, OUTS)
    # bf16 MXU operands vs. f32 reference -> loosened tolerance
    assert np.allclose(np.asarray(out), np.asarray(ref), rtol=2e-2, atol=2e-2), \
        f"max abs err {np.max(np.abs(np.asarray(out) - np.asarray(ref)))}"

    print("KERNEL_OK")
</pallas_src>

<mosaic_0001>
module attributes {stable_mosaic.version = 11 : i64} {
  func.func @kernel(%arg0: i32, %arg1: memref<8x2x8xbf16, #tpu.memory_space<vmem>>, %arg2: memref<8x2x8xbf16, #tpu.memory_space<vmem>>, %arg3: memref<8x128xbf16, #tpu.memory_space<vmem>>, %arg4: memref<8x128xbf16, #tpu.memory_space<vmem>>, %arg5: memref<32x128xbf16, #tpu.memory_space<vmem>>, %arg6: memref<32x128xbf16, #tpu.memory_space<vmem>>, %arg7: memref<1x128xf32, #tpu.memory_space<vmem>>, %arg8: memref<1x128xf32, #tpu.memory_space<vmem>>, %arg9: memref<8x2x32xbf16, #tpu.memory_space<vmem>>, %arg10: memref<8x2x32xbf16, #tpu.memory_space<vmem>>, %arg11: memref<2x32xf32, #tpu.memory_space<vmem>>, %arg12: memref<2x32xf32, #tpu.memory_space<vmem>>, %arg13: memref<2x32xf32, #tpu.memory_space<vmem>>, %arg14: memref<2x32xf32, #tpu.memory_space<vmem>>, %arg15: memref<8x2x128xf32, #tpu.memory_space<vmem>>, %arg16: memref<8x2x128xf32, #tpu.memory_space<vmem>>) attributes {dimension_semantics = [#tpu.dimension_semantics<arbitrary>], iteration_bounds = array<i64: 2>, scalar_prefetch = 0 : i64, scratch_operands = 6 : i64, tpu.core_type = #tpu.core_type<tc>, window_params = [{transform_indices = @transform_0, window_bounds = array<i64: 8, 2, 8>}, {transform_indices = @transform_1, window_bounds = array<i64: 8, 2, 8>}, {pipeline_mode = #tpu.pipeline_mode<synchronous>, transform_indices = @transform_2, window_bounds = array<i64: 8, 128>}, {pipeline_mode = #tpu.pipeline_mode<synchronous>, transform_indices = @transform_3, window_bounds = array<i64: 8, 128>}, {pipeline_mode = #tpu.pipeline_mode<synchronous>, transform_indices = @transform_4, window_bounds = array<i64: 32, 128>}, {pipeline_mode = #tpu.pipeline_mode<synchronous>, transform_indices = @transform_5, window_bounds = array<i64: 32, 128>}, {pipeline_mode = #tpu.pipeline_mode<synchronous>, transform_indices = @transform_6, window_bounds = array<i64: 1, 128>}, {pipeline_mode = #tpu.pipeline_mode<synchronous>, transform_indices = @transform_7, window_bounds = array<i64: 1, 128>}, {transform_indices = @transform_8, window_bounds = array<i64: 8, 2, 32>}, {transform_indices = @transform_9, window_bounds = array<i64: 8, 2, 32>}]} {
    %c0_i32 = arith.constant 0 : i32
    %0 = arith.cmpi eq, %arg0, %c0_i32 : i32
    %1 = arith.extui %0 : i1 to i32
    %c0_i32_0 = arith.constant 0 : i32
    %2 = arith.cmpi ne, %1, %c0_i32_0 : i32
    scf.if %2 {
      %cst_290 = arith.constant 0.000000e+00 : f32
      %699 = vector.broadcast %cst_290 : f32 to vector<2x32xf32>
      %c0_291 = arith.constant 0 : index
      %c0_292 = arith.constant 0 : index
      %700 = vector.load %arg11[%c0_291, %c0_292] : memref<2x32xf32, #tpu.memory_space<vmem>>, vector<2x32xf32>
      tpu.vector_store %arg11[%c0_291, %c0_292], %699 {strides = array<i32>} : memref<2x32xf32, #tpu.memory_space<vmem>>, vector<2x32xf32>,
      %cst_293 = arith.constant 0.000000e+00 : f32
      %701 = vector.broadcast %cst_293 : f32 to vector<2x32xf32>
      %c0_294 = arith.constant 0 : index
      %c0_295 = arith.constant 0 : index
      %702 = vector.load %arg12[%c0_294, %c0_295] : memref<2x32xf32, #tpu.memory_space<vmem>>, vector<2x32xf32>
      tpu.vector_store %arg12[%c0_294, %c0_295], %701 {strides = array<i32>} : memref<2x32xf32, #tpu.memory_space<vmem>>, vector<2x32xf32>,
      %cst_296 = arith.constant 0.000000e+00 : f32
      %703 = vector.broadcast %cst_296 : f32 to vector<2x32xf32>
      %c0_297 = arith.constant 0 : index
      %c0_298 = arith.constant 0 : index
      %704 = vector.load %arg13[%c0_297, %c0_298] : memref<2x32xf32, #tpu.memory_space<vmem>>, vector<2x32xf32>
      tpu.vector_store %arg13[%c0_297, %c0_298], %703 {strides = array<i32>} : memref<2x32xf32, #tpu.memory_space<vmem>>, vector<2x32xf32>,
      %cst_299 = arith.constant 0.000000e+00 : f32
      %705 = vector.broadcast %cst_299 : f32 to vector<2x32xf32>
      %c0_300 = arith.constant 0 : index
      %c0_301 = arith.constant 0 : index
      %706 = vector.load %arg14[%c0_300, %c0_301] : memref<2x32xf32, #tpu.memory_space<vmem>>, vector<2x32xf32>
      tpu.vector_store %arg14[%c0_300, %c0_301], %705 {strides = array<i32>} : memref<2x32xf32, #tpu.memory_space<vmem>>, vector<2x32xf32>,
    } else {
    }
    %c0 = arith.constant 0 : index
    %c0_1 = arith.constant 0 : index
    %c0_2 = arith.constant 0 : index
    %3 = vector.load %arg1[%c0, %c0_1, %c0_2] : memref<8x2x8xbf16, #tpu.memory_space<vmem>>, vector<8x2x8xbf16>
    %4 = vector.shape_cast %3 : vector<8x2x8xbf16> to vector<16x8xbf16>
    %c0_3 = arith.constant 0 : index
    %c0_4 = arith.constant 0 : index
    %5 = vector.load %arg3[%c0_3, %c0_4] : memref<8x128xbf16, #tpu.memory_space<vmem>>, vector<8x128xbf16>
    %cst = arith.constant dense<0.000000e+00> : vector<16x128xf32>
    %6 = tpu.matmul %4, %5, %cst {dimension_numbers = #tpu.dot_dimension_numbers<[1], [0], [0], [1], [0, 0, 1, 1], [], []>} : vector<16x8xbf16>, vector<8x128xbf16>, vector<16x128xf32> -> vector<16x128xf32>
    %c0_5 = arith.constant 0 : index
    %c0_6 = arith.constant 0 : index
    %c0_7 = arith.constant 0 : index
    %7 = vector.load %arg2[%c0_5, %c0_6, %c0_7] : memref<8x2x8xbf16, #tpu.memory_space<vmem>>, vector<8x2x8xbf16>
    %8 = vector.shape_cast %7 : vector<8x2x8xbf16> to vector<16x8xbf16>
    %c0_8 = arith.constant 0 : index
    %c0_9 = arith.constant 0 : index
    %9 = vector.load %arg4[%c0_8, %c0_9] : memref<8x128xbf16, #tpu.memory_space<vmem>>, vector<8x128xbf16>
    %cst_10 = arith.constant dense<0.000000e+00> : vector<16x128xf32>
    %10 = tpu.matmul %8, %9, %cst_10 {dimension_numbers = #tpu.dot_dimension_numbers<[1], [0], [0], [1], [0, 0, 1, 1], [], []>} : vector<16x8xbf16>, vector<8x128xbf16>, vector<16x128xf32> -> vector<16x128xf32>
    %11 = vector.shape_cast %6 : vector<16x128xf32> to vector<8x2x128xf32>
    %c0_11 = arith.constant 0 : index
    %c0_12 = arith.constant 0 : index
    %c0_13 = arith.constant 0 : index
    %12 = vector.load %arg15[%c0_11, %c0_12, %c0_13] : memref<8x2x128xf32, #tpu.memory_space<vmem>>, vector<8x2x128xf32>
    tpu.vector_store %arg15[%c0_11, %c0_12, %c0_13], %11 {strides = array<i32>} : memref<8x2x128xf32, #tpu.memory_space<vmem>>, vector<8x2x128xf32>,
    %13 = vector.shape_cast %10 : vector<16x128xf32> to vector<8x2x128xf32>
    %c0_14 = arith.constant 0 : index
    %c0_15 = arith.constant 0 : index
    %c0_16 = arith.constant 0 : index
    %14 = vector.load %arg16[%c0_14, %c0_15, %c0_16] : memref<8x2x128xf32, #tpu.memory_space<vmem>>, vector<8x2x128xf32>
    tpu.vector_store %arg16[%c0_14, %c0_15, %c0_16], %13 {strides = array<i32>} : memref<8x2x128xf32, #tpu.memory_space<vmem>>, vector<8x2x128xf32>,
    %c0_17 = arith.constant 0 : index
    %c0_18 = arith.constant 0 : index
    %15 = vector.load %arg5[%c0_17, %c0_18] : memref<32x128xbf16, #tpu.memory_space<vmem>>, vector<32x128xbf16>
    %c0_19 = arith.constant 0 : index
    %c0_20 = arith.constant 0 : index
    %16 = vector.load %arg6[%c0_19, %c0_20] : memref<32x128xbf16, #tpu.memory_space<vmem>>, vector<32x128xbf16>
    %c0_21 = arith.constant 0 : index
    %c0_22 = arith.constant 0 : index
    %17 = vector.load %arg7[%c0_21, %c0_22] : memref<1x128xf32, #tpu.memory_space<vmem>>, vector<1x128xf32>
    %c0_23 = arith.constant 0 : index
    %c0_24 = arith.constant 0 : index
    %18 = vector.load %arg8[%c0_23, %c0_24] : memref<1x128xf32, #tpu.memory_space<vmem>>, vector<1x128xf32>
    %c0_i32_25 = arith.constant 0 : i32
    %19 = arith.index_cast %c0_i32_25 : i32 to index
    %c0_26 = arith.constant 0 : index
    %c0_27 = arith.constant 0 : index
    %20 = vector.load %arg15[%19, %c0_26, %c0_27] : memref<8x2x128xf32, #tpu.memory_space<vmem>>, vector<1x2x128xf32>
    %21 = vector.shape_cast %20 : vector<1x2x128xf32> to vector<2x128xf32>
    %22 = vector.broadcast %17 : vector<1x128xf32> to vector<2x128xf32>
    %23 = arith.addf %21, %22 : vector<2x128xf32>
    %c0_28 = arith.constant 0 : index
    %c0_29 = arith.constant 0 : index
    %24 = vector.load %arg11[%c0_28, %c0_29] : memref<2x32xf32, #tpu.memory_space<vmem>>, vector<2x32xf32>
    %25 = arith.truncf %24 : vector<2x32xf32> to vector<2x32xbf16>
    %cst_30 = arith.constant dense<0.000000e+00> : vector<2x128xf32>
    %26 = tpu.matmul %25, %15, %cst_30 {dimension_numbers = #tpu.dot_dimension_numbers<[1], [0], [0], [1], [0, 0, 1, 1], [], []>} : vector<2x32xbf16>, vector<32x128xbf16>, vector<2x128xf32> -> vector<2x128xf32>
    %27 = arith.addf %23, %26 : vector<2x128xf32>
    %c0_31 = arith.constant 0 : index
    %c0_32 = arith.constant 0 : index
    %28 = vector.load %arg12[%c0_31, %c0_32] : memref<2x32xf32, #tpu.memory_space<vmem>>, vector<2x32xf32>
    %29 = vector.extract_strided_slice %27 {offsets = [0, 0], sizes = [2, 32], strides = [1, 1]} : vector<2x128xf32> to vector<2x32xf32>
    %30 = arith.negf %29 : vector<2x32xf32>
    %31 = math.exp %30 : vector<2x32xf32>
    %cst_33 = arith.constant 1.000000e+00 : f32
    %32 = vector.broadcast %cst_33 : f32 to vector<2x32xf32>
    %33 = arith.addf %32, %31 : vector<2x32xf32>
    %34 = arith.divf %32, %33 : vector<2x32xf32>
    %35 = vector.extract_strided_slice %27 {offsets = [0, 32], sizes = [2, 32], strides = [1, 1]} : vector<2x128xf32> to vector<2x32xf32>
    %36 = arith.negf %35 : vector<2x32xf32>
    %37 = math.exp %36 : vector<2x32xf32>
    %cst_34 = arith.constant 1.000000e+00 : f32
    %38 = vector.broadcast %cst_34 : f32 to vector<2x32xf32>
    %39 = arith.addf %38, %37 : vector<2x32xf32>
    %40 = arith.divf %38, %39 : vector<2x32xf32>
    %41 = vector.extract_strided_slice %27 {offsets = [0, 64], sizes = [2, 32], strides = [1, 1]} : vector<2x128xf32> to vector<2x32xf32>
    %42 = math.tanh %41 : vector<2x32xf32>
    %43 = vector.extract_strided_slice %27 {offsets = [0, 96], sizes = [2, 32], strides = [1, 1]} : vector<2x128xf32> to vector<2x32xf32>
    %44 = arith.negf %43 : vector<2x32xf32>
    %45 = math.exp %44 : vector<2x32xf32>
    %cst_35 = arith.constant 1.000000e+00 : f32
    %46 = vector.broadcast %cst_35 : f32 to vector<2x32xf32>
    %47 = arith.addf %46, %45 : vector<2x32xf32>
    %48 = arith.divf %46, %47 : vector<2x32xf32>
    %49 = arith.mulf %40, %28 : vector<2x32xf32>
    %50 = arith.mulf %34, %42 : vector<2x32xf32>
    %51 = arith.addf %49, %50 : vector<2x32xf32>
    %52 = math.tanh %51 : vector<2x32xf32>
    %53 = arith.mulf %48, %52 : vector<2x32xf32>
    %c0_36 = arith.constant 0 : index
    %c0_37 = arith.constant 0 : index
    %54 = vector.load %arg11[%c0_36, %c0_37] : memref<2x32xf32, #tpu.memory_space<vmem>>, vector<2x32xf32>
    tpu.vector_store %arg11[%c0_36, %c0_37], %53 {strides = array<i32>} : memref<2x32xf32, #tpu.memory_space<vmem>>, vector<2x32xf32>,
    %c0_38 = arith.constant 0 : index
    %c0_39 = arith.constant 0 : index
    %55 = vector.load %arg12[%c0_38, %c0_39] : memref<2x32xf32, #tpu.memory_space<vmem>>, vector<2x32xf32>
    tpu.vector_store %arg12[%c0_38, %c0_39], %51 {strides = array<i32>} : memref<2x32xf32, #tpu.memory_space<vmem>>, vector<2x32xf32>,
    %56 = arith.truncf %53 : vector<2x32xf32> to vector<2x32xbf16>
    %57 = arith.index_cast %c0_i32_25 : i32 to index
    %c0_40 = arith.constant 0 : index
    %c0_41 = arith.constant 0 : index
    %58 = vector.load %arg9[%57, %c0_40, %c0_41] : memref<8x2x32xbf16, #tpu.memory_space<vmem>>, vector<1x2x32xbf16>
    %59 = vector.shape_cast %58 : vector<1x2x32xbf16> to vector<2x32xbf16>
    %60 = vector.shape_cast %56 : vector<2x32xbf16> to vector<1x2x32xbf16>
    tpu.vector_store %arg9[%57, %c0_40, %c0_41], %60 {strides = array<i32>} : memref<8x2x32xbf16, #tpu.memory_space<vmem>>, vector<1x2x32xbf16>,
    %c7_i32 = arith.constant 7 : i32
    %61 = arith.subi %c7_i32, %c0_i32_25 : i32
    %62 = arith.index_cast %61 : i32 to index
    %c0_42 = arith.constant 0 : index
    %c0_43 = arith.constant 0 : index
    %63 = vector.load %arg16[%62, %c0_42, %c0_43] : memref<8x2x128xf32, #tpu.memory_space<vmem>>, vector<1x2x128xf32>
    %64 = vector.shape_cast %63 : vector<1x2x128xf32> to vector<2x128xf32>
    %65 = vector.broadcast %18 : vector<1x128xf32> to vector<2x128xf32>
    %66 = arith.addf %64, %65 : vector<2x128xf32>
    %c0_44 = arith.constant 0 : index
    %c0_45 = arith.constant 0 : index
    %67 = vector.load %arg13[%c0_44, %c0_45] : memref<2x32xf32, #tpu.memory_space<vmem>>, vector<2x32xf32>
    %68 = arith.truncf %67 : vector<2x32xf32> to vector<2x32xbf16>
    %cst_46 = arith.constant dense<0.000000e+00> : vector<2x128xf32>
    %69 = tpu.matmul %68, %16, %cst_46 {dimension_numbers = #tpu.dot_dimension_numbers<[1], [0], [0], [1], [0, 0, 1, 1], [], []>} : vector<2x32xbf16>, vector<32x128xbf16>, vector<2x128xf32> -> vector<2x128xf32>
    %70 = arith.addf %66, %69 : vector<2x128xf32>
    %c0_47 = arith.constant 0 : index
    %c0_48 = arith.constant 0 : index
    %71 = vector.load %arg14[%c0_47, %c0_48] : memref<2x32xf32, #tpu.memory_space<vmem>>, vector<2x32xf32>
    %72 = vector.extract_strided_slice %70 {offsets = [0, 0], sizes = [2, 32], strides = [1, 1]} : vector<2x128xf32> to vector<2x32xf32>
    %73 = arith.negf %72 : vector<2x32xf32>
    %74 = math.exp %73 : vector<2x32xf32>
    %cst_49 = arith.constant 1.000000e+00 : f32
    %75 = vector.broadcast %cst_49 : f32 to vector<2x32xf32>
    %76 = arith.addf %75, %74 : vector<2x32xf32>
    %77 = arith.divf %75, %76 : vector<2x32xf32>
    %78 = vector.extract_strided_slice %70 {offsets = [0, 32], sizes = [2, 32], strides = [1, 1]} : vector<2x128xf32> to vector<2x32xf32>
    %79 = arith.negf %78 : vector<2x32xf32>
    %80 = math.exp %79 : vector<2x32xf32>
    %cst_50 = arith.constant 1.000000e+00 : f32
    %81 = vector.broadcast %cst_50 : f32 to vector<2x32xf32>
    %82 = arith.addf %81, %80 : vector<2x32xf32>
    %83 = arith.divf %81, %82 : vector<2x32xf32>
    %84 = vector.extract_strided_slice %70 {offsets = [0, 64], sizes = [2, 32], strides = [1, 1]} : vector<2x128xf32> to vector<2x32xf32>
    %85 = math.tanh %84 : vector<2x32xf32>
    %86 = vector.extract_strided_slice %70 {offsets = [0, 96], sizes = [2, 32], strides = [1, 1]} : vector<2x128xf32> to vector<2x32xf32>
    %87 = arith.negf %86 : vector<2x32xf32>
    %88 = math.exp %87 : vector<2x32xf32>
    %cst_51 = arith.constant 1.000000e+00 : f32
    %89 = vector.broadcast %cst_51 : f32 to vector<2x32xf32>
    %90 = arith.addf %89, %88 : vector<2x32xf32>
    %91 = arith.divf %89, %90 : vector<2x32xf32>
    %92 = arith.mulf %83, %71 : vector<2x32xf32>
    %93 = arith.mulf %77, %85 : vector<2x32xf32>
    %94 = arith.addf %92, %93 : vector<2x32xf32>
    %95 = math.tanh %94 : vector<2x32xf32>
    %96 = arith.mulf %91, %95 : vector<2x32xf32>
    %c0_52 = arith.constant 0 : index
    %c0_53 = arith.constant 0 : index
    %97 = vector.load %arg13[%c0_52, %c0_53] : memref<2x32xf32, #tpu.memory_space<vmem>>, vector<2x32xf32>
    tpu.vector_store %arg13[%c0_52, %c0_53], %96 {strides = array<i32>} : memref<2x32xf32, #tpu.memory_space<vmem>>, vector<2x32xf32>,
    %c0_54 = arith.constant 0 : index
    %c0_55 = arith.constant 0 : index
    %98 = vector.load %arg14[%c0_54, %c0_55] : memref<2x32xf32, #tpu.memory_space<vmem>>, vector<2x32xf32>
    tpu.vector_store %arg14[%c0_54, %c0_55], %94 {strides = array<i32>} : memref<2x32xf32, #tpu.memory_space<vmem>>, vector<2x32xf32>,
    %99 = arith.truncf %96 : vector<2x32xf32> to vector<2x32xbf16>
    %100 = arith.index_cast %61 : i32 to index
    %c0_56 = arith.constant 0 : index
    %c0_57 = arith.constant 0 : index
    %101 = vector.load %arg10[%100, %c0_56, %c0_57] : memref<8x2x32xbf16, #tpu.memory_space<vmem>>, vector<1x2x32xbf16>
    %102 = vector.shape_cast %101 : vector<1x2x32xbf16> to vector<2x32xbf16>
    %103 = vector.shape_cast %99 : vector<2x32xbf16> to vector<1x2x32xbf16>
    tpu.vector_store %arg10[%100, %c0_56, %c0_57], %103 {strides = array<i32>} : memref<8x2x32xbf16, #tpu.memory_space<vmem>>, vector<1x2x32xbf16>,
    %c1_i32 = arith.constant 1 : i32
    %104 = arith.index_cast %c1_i32 : i32 to index
    %c0_58 = arith.constant 0 : index
    %c0_59 = arith.constant 0 : index
    %105 = vector.load %arg15[%104, %c0_58, %c0_59] : memref<8x2x128xf32, #tpu.memory_space<vmem>>, vector<1x2x128xf32>
    %106 = vector.shape_cast %105 : vector<1x2x128xf32> to vector<2x128xf32>
    %107 = vector.broadcast %17 : vector<1x128xf32> to vector<2x128xf32>
    %108 = arith.addf %106, %107 : vector<2x128xf32>
    %c0_60 = arith.constant 0 : index
    %c0_61 = arith.constant 0 : index
    %109 = vector.load %arg11[%c0_60, %c0_61] : memref<2x32xf32, #tpu.memory_space<vmem>>, vector<2x32xf32>
    %110 = arith.truncf %109 : vector<2x32xf32> to vector<2x32xbf16>
    %cst_62 = arith.constant dense<0.000000e+00> : vector<2x128xf32>
    %111 = tpu.matmul %110, %15, %cst_62 {dimension_numbers = #tpu.dot_dimension_numbers<[1], [0], [0], [1], [0, 0, 1, 1], [], []>} : vector<2x32xbf16>, vector<32x128xbf16>, vector<2x128xf32> -> vector<2x128xf32>
    %112 = arith.addf %108, %111 : vector<2x128xf32>
    %c0_63 = arith.constant 0 : index
    %c0_64 = arith.constant 0 : index
    %113 = vector.load %arg12[%c0_63, %c0_64] : memref<2x32xf32, #tpu.memory_space<vmem>>, vector<2x32xf32>
    %114 = vector.extract_strided_slice %112 {offsets = [0, 0], sizes = [2, 32], strides = [1, 1]} : vector<2x128xf32> to vector<2x32xf32>
    %115 = arith.negf %114 : vector<2x32xf32>
    %116 = math.exp %115 : vector<2x32xf32>
    %cst_65 = arith.constant 1.000000e+00 : f32
    %117 = vector.broadcast %cst_65 : f32 to vector<2x32xf32>
    %118 = arith.addf %117, %116 : vector<2x32xf32>
    %119 = arith.divf %117, %118 : vector<2x32xf32>
    %120 = vector.extract_strided_slice %112 {offsets = [0, 32], sizes = [2, 32], strides = [1, 1]} : vector<2x128xf32> to vector<2x32xf32>
    %121 = arith.negf %120 : vector<2x32xf32>
    %122 = math.exp %121 : vector<2x32xf32>
    %cst_66 = arith.constant 1.000000e+00 : f32
    %123 = vector.broadcast %cst_66 : f32 to vector<2x32xf32>
    %124 = arith.addf %123, %122 : vector<2x32xf32>
    %125 = arith.divf %123, %124 : vector<2x32xf32>
    %126 = vector.extract_strided_slice %112 {offsets = [0, 64], sizes = [2, 32], strides = [1, 1]} : vector<2x128xf32> to vector<2x32xf32>
    %127 = math.tanh %126 : vector<2x32xf32>
    %128 = vector.extract_strided_slice %112 {offsets = [0, 96], sizes = [2, 32], strides = [1, 1]} : vector<2x128xf32> to vector<2x32xf32>
    %129 = arith.negf %128 : vector<2x32xf32>
    %130 = math.exp %129 : vector<2x32xf32>
    %cst_67 = arith.constant 1.000000e+00 : f32
    %131 = vector.broadcast %cst_67 : f32 to vector<2x32xf32>
    %132 = arith.addf %131, %130 : vector<2x32xf32>
    %133 = arith.divf %131, %132 : vector<2x32xf32>
    %134 = arith.mulf %125, %113 : vector<2x32xf32>
    %135 = arith.mulf %119, %127 : vector<2x32xf32>
    %136 = arith.addf %134, %135 : vector<2x32xf32>
    %137 = math.tanh %136 : vector<2x32xf32>
    %138 = arith.mulf %133, %137 : vector<2x32xf32>
    %c0_68 = arith.constant 0 : index
    %c0_69 = arith.constant 0 : index
    %139 = vector.load %arg11[%c0_68, %c0_69] : memref<2x32xf32, #tpu.memory_space<vmem>>, vector<2x32xf32>
    tpu.vector_store %arg11[%c0_68, %c0_69], %138 {strides = array<i32>} : memref<2x32xf32, #tpu.memory_space<vmem>>, vector<2x32xf32>,
    %c0_70 = arith.constant 0 : index
    %c0_71 = arith.constant 0 : index
    %140 = vector.load %arg12[%c0_70, %c0_71] : memref<2x32xf32, #tpu.memory_space<vmem>>, vector<2x32xf32>
    tpu.vector_store %arg12[%c0_70, %c0_71], %136 {strides = array<i32>} : memref<2x32xf32, #tpu.memory_space<vmem>>, vector<2x32xf32>,
    %141 = arith.truncf %138 : vector<2x32xf32> to vector<2x32xbf16>
    %142 = arith.index_cast %c1_i32 : i32 to index
    %c0_72 = arith.constant 0 : index
    %c0_73 = arith.constant 0 : index
    %143 = vector.load %arg9[%142, %c0_72, %c0_73] : memref<8x2x32xbf16, #tpu.memory_space<vmem>>, vector<1x2x32xbf16>
    %144 = vector.shape_cast %143 : vector<1x2x32xbf16> to vector<2x32xbf16>
    %145 = vector.shape_cast %141 : vector<2x32xbf16> to vector<1x2x32xbf16>
    tpu.vector_store %arg9[%142, %c0_72, %c0_73], %145 {strides = array<i32>} : memref<8x2x32xbf16, #tpu.memory_space<vmem>>, vector<1x2x32xbf16>,
    %c7_i32_74 = arith.constant 7 : i32
    %146 = arith.subi %c7_i32_74, %c1_i32 : i32
    %147 = arith.index_cast %146 : i32 to index
    %c0_75 = arith.constant 0 : index
    %c0_76 = arith.constant 0 : index
    %148 = vector.load %arg16[%147, %c0_75, %c0_76] : memref<8x2x128xf32, #tpu.memory_space<vmem>>, vector<1x2x128xf32>
    %149 = vector.shape_cast %148 : vector<1x2x128xf32> to vector<2x128xf32>
    %150 = vector.broadcast %18 : vector<1x128xf32> to vector<2x128xf32>
    %151 = arith.addf %149, %150 : vector<2x128xf32>
    %c0_77 = arith.constant 0 : index
    %c0_78 = arith.constant 0 : index
    %152 = vector.load %arg13[%c0_77, %c0_78] : memref<2x32xf32, #tpu.memory_space<vmem>>, vector<2x32xf32>
    %153 = arith.truncf %152 : vector<2x32xf32> to vector<2x32xbf16>
    %cst_79 = arith.constant dense<0.000000e+00> : vector<2x128xf32>
    %154 = tpu.matmul %153, %16, %cst_79 {dimension_numbers = #tpu.dot_dimension_numbers<[1], [0], [0], [1], [0, 0, 1, 1], [], []>} : vector<2x32xbf16>, vector<32x128xbf16>, vector<2x128xf32> -> vector<2x128xf32>
    %155 = arith.addf %151, %154 : vector<2x128xf32>
    %c0_80 = arith.constant 0 : index
    %c0_81 = arith.constant 0 : index
    %156 = vector.load %arg14[%c0_80, %c0_81] : memref<2x32xf32, #tpu.memory_space<vmem>>, vector<2x32xf32>
    %157 = vector.extract_strided_slice %155 {offsets = [0, 0], sizes = [2, 32], strides = [1, 1]} : vector<2x128xf32> to vector<2x32xf32>
    %158 = arith.negf %157 : vector<2x32xf32>
    %159 = math.exp %158 : vector<2x32xf32>
    %cst_82 = arith.constant 1.000000e+00 : f32
    %160 = vector.broadcast %cst_82 : f32 to vector<2x32xf32>
    %161 = arith.addf %160, %159 : vector<2x32xf32>
    %162 = arith.divf %160, %161 : vector<2x32xf32>
    %163 = vector.extract_strided_slice %155 {offsets = [0, 32], sizes = [2, 32], strides = [1, 1]} : vector<2x128xf32> to vector<2x32xf32>
    %164 = arith.negf %163 : vector<2x32xf32>
    %165 = math.exp %164 : vector<2x32xf32>
    %cst_83 = arith.constant 1.000000e+00 : f32
    %166 = vector.broadcast %cst_83 : f32 to vector<2x32xf32>
    %167 = arith.addf %166, %165 : vector<2x32xf32>
    %168 = arith.divf %166, %167 : vector<2x32xf32>
    %169 = vector.extract_strided_slice %155 {offsets = [0, 64], sizes = [2, 32], strides = [1, 1]} : vector<2x128xf32> to vector<2x32xf32>
    %170 = math.tanh %169 : vector<2x32xf32>
    %171 = vector.extract_strided_slice %155 {offsets = [0, 96], sizes = [2, 32], strides = [1, 1]} : vector<2x128xf32> to vector<2x32xf32>
    %172 = arith.negf %171 : vector<2x32xf32>
    %173 = math.exp %172 : vector<2x32xf32>
    %cst_84 = arith.constant 1.000000e+00 : f32
    %174 = vector.broadcast %cst_84 : f32 to vector<2x32xf32>
    %175 = arith.addf %174, %173 : vector<2x32xf32>
    %176 = arith.divf %174, %175 : vector<2x32xf32>
    %177 = arith.mulf %168, %156 : vector<2x32xf32>
    %178 = arith.mulf %162, %170 : vector<2x32xf32>
    %179 = arith.addf %177, %178 : vector<2x32xf32>
    %180 = math.tanh %179 : vector<2x32xf32>
    %181 = arith.mulf %176, %180 : vector<2x32xf32>
    %c0_85 = arith.constant 0 : index
    %c0_86 = arith.constant 0 : index
    %182 = vector.load %arg13[%c0_85, %c0_86] : memref<2x32xf32, #tpu.memory_space<vmem>>, vector<2x32xf32>
    tpu.vector_store %arg13[%c0_85, %c0_86], %181 {strides = array<i32>} : memref<2x32xf32, #tpu.memory_space<vmem>>, vector<2x32xf32>,
    %c0_87 = arith.constant 0 : index
    %c0_88 = arith.constant 0 : index
    %183 = vector.load %arg14[%c0_87, %c0_88] : memref<2x32xf32, #tpu.memory_space<vmem>>, vector<2x32xf32>
    tpu.vector_store %arg14[%c0_87, %c0_88], %179 {strides = array<i32>} : memref<2x32xf32, #tpu.memory_space<vmem>>, vector<2x32xf32>,
    %184 = arith.truncf %181 : vector<2x32xf32> to vector<2x32xbf16>
    %185 = arith.index_cast %146 : i32 to index
    %c0_89 = arith.constant 0 : index
    %c0_90 = arith.constant 0 : index
    %186 = vector.load %arg10[%185, %c0_89, %c0_90] : memref<8x2x32xbf16, #tpu.memory_space<vmem>>, vector<1x2x32xbf16>
    %187 = vector.shape_cast %186 : vector<1x2x32xbf16> to vector<2x32xbf16>
    %188 = vector.shape_cast %184 : vector<2x32xbf16> to vector<1x2x32xbf16>
    tpu.vector_store %arg10[%185, %c0_89, %c0_90], %188 {strides = array<i32>} : memref<8x2x32xbf16, #tpu.memory_space<vmem>>, vector<1x2x32xbf16>,
    %c2_i32 = arith.constant 2 : i32
    %189 = arith.index_cast %c2_i32 : i32 to index
    %c0_91 = arith.constant 0 : index
    %c0_92 = arith.constant 0 : index
    %190 = vector.load %arg15[%189, %c0_91, %c0_92] : memref<8x2x128xf32, #tpu.memory_space<vmem>>, vector<1x2x128xf32>
    %191 = vector.shape_cast %190 : vector<1x2x128xf32> to vector<2x128xf32>
    %192 = vector.broadcast %17 : vector<1x128xf32> to vector<2x128xf32>
    %193 = arith.addf %191, %192 : vector<2x128xf32>
    %c0_93 = arith.constant 0 : index
    %c0_94 = arith.constant 0 : index
    %194 = vector.load %arg11[%c0_93, %c0_94] : memref<2x32xf32, #tpu.memory_space<vmem>>, vector<2x32xf32>
    %195 = arith.truncf %194 : vector<2x32xf32> to vector<2x32xbf16>
    %cst_95 = arith.constant dense<0.000000e+00> : vector<2x128xf32>
    %196 = tpu.matmul %195, %15, %cst_95 {dimension_numbers = #tpu.dot_dimension_numbers<[1], [0], [0], [1], [0, 0, 1, 1], [], []>} : vector<2x32xbf16>, vector<32x128xbf16>, vector<2x128xf32> -> vector<2x128xf32>
    %197 = arith.addf %193, %196 : vector<2x128xf32>
    %c0_96 = arith.constant 0 : index
    %c0_97 = arith.constant 0 : index
    %198 = vector.load %arg12[%c0_96, %c0_97] : memref<2x32xf32, #tpu.memory_space<vmem>>, vector<2x32xf32>
    %199 = vector.extract_strided_slice %197 {offsets = [0, 0], sizes = [2, 32], strides = [1, 1]} : vector<2x128xf32> to vector<2x32xf32>
    %200 = arith.negf %199 : vector<2x32xf32>
    %201 = math.exp %200 : vector<2x32xf32>
    %cst_98 = arith.constant 1.000000e+00 : f32
    %202 = vector.broadcast %cst_98 : f32 to vector<2x32xf32>
    %203 = arith.addf %202, %201 : vector<2x32xf32>
    %204 = arith.divf %202, %203 : vector<2x32xf32>
    %205 = vector.extract_strided_slice %197 {offsets = [0, 32], sizes = [2, 32], strides = [1, 1]} : vector<2x128xf32> to vector<2x32xf32>
    %206 = arith.negf %205 : vector<2x32xf32>
    %207 = math.exp %206 : vector<2x32xf32>
    %cst_99 = arith.constant 1.000000e+00 : f32
    %208 = vector.broadcast %cst_99 : f32 to vector<2x32xf32>
    %209 = arith.addf %208, %207 : vector<2x32xf32>
    %210 = arith.divf %208, %209 : vector<2x32xf32>
    %211 = vector.extract_strided_slice %197 {offsets = [0, 64], sizes = [2, 32], strides = [1, 1]} : vector<2x128xf32> to vector<2x32xf32>
    %212 = math.tanh %211 : vector<2x32xf32>
    %213 = vector.extract_strided_slice %197 {offsets = [0, 96], sizes = [2, 32], strides = [1, 1]} : vector<2x128xf32> to vector<2x32xf32>
    %214 = arith.negf %213 : vector<2x32xf32>
    %215 = math.exp %214 : vector<2x32xf32>
    %cst_100 = arith.constant 1.000000e+00 : f32
    %216 = vector.broadcast %cst_100 : f32 to vector<2x32xf32>
    %217 = arith.addf %216, %215 : vector<2x32xf32>
    %218 = arith.divf %216, %217 : vector<2x32xf32>
    %219 = arith.mulf %210, %198 : vector<2x32xf32>
    %220 = arith.mulf %204, %212 : vector<2x32xf32>
    %221 = arith.addf %219, %220 : vector<2x32xf32>
    %222 = math.tanh %221 : vector<2x32xf32>
    %223 = arith.mulf %218, %222 : vector<2x32xf32>
    %c0_101 = arith.constant 0 : index
    %c0_102 = arith.constant 0 : index
    %224 = vector.load %arg11[%c0_101, %c0_102] : memref<2x32xf32, #tpu.memory_space<vmem>>, vector<2x32xf32>
    tpu.vector_store %arg11[%c0_101, %c0_102], %223 {strides = array<i32>} : memref<2x32xf32, #tpu.memory_space<vmem>>, vector<2x32xf32>,
    %c0_103 = arith.constant 0 : index
    %c0_104 = arith.constant 0 : index
    %225 = vector.load %arg12[%c0_103, %c0_104] : memref<2x32xf32, #tpu.memory_space<vmem>>, vector<2x32xf32>
    tpu.vector_store %arg12[%c0_103, %c0_104], %221 {strides = array<i32>} : memref<2x32xf32, #tpu.memory_space<vmem>>, vector<2x32xf32>,
    %226 = arith.truncf %223 : vector<2x32xf32> to vector<2x32xbf16>
    %227 = arith.index_cast %c2_i32 : i32 to index
    %c0_105 = arith.constant 0 : index
    %c0_106 = arith.constant 0 : index
    %228 = vector.load %arg9[%227, %c0_105, %c0_106] : memref<8x2x32xbf16, #tpu.memory_space<vmem>>, vector<1x2x32xbf16>
    %229 = vector.shape_cast %228 : vector<1x2x32xbf16> to vector<2x32xbf16>
    %230 = vector.shape_cast %226 : vector<2x32xbf16> to vector<1x2x32xbf16>
    tpu.vector_store %arg9[%227, %c0_105, %c0_106], %230 {strides = array<i32>} : memref<8x2x32xbf16, #tpu.memory_space<vmem>>, vector<1x2x32xbf16>,
    %c7_i32_107 = arith.constant 7 : i32
    %231 = arith.subi %c7_i32_107, %c2_i32 : i32
    %232 = arith.index_cast %231 : i32 to index
    %c0_108 = arith.constant 0 : index
    %c0_109 = arith.constant 0 : index
    %233 = vector.load %arg16[%232, %c0_108, %c0_109] : memref<8x2x128xf32, #tpu.memory_space<vmem>>, vector<1x2x128xf32>
    %234 = vector.shape_cast %233 : vector<1x2x128xf32> to vector<2x128xf32>
    %235 = vector.broadcast %18 : vector<1x128xf32> to vector<2x128xf32>
    %236 = arith.addf %234, %235 : vector<2x128xf32>
    %c0_110 = arith.constant 0 : index
    %c0_111 = arith.constant 0 : index
    %237 = vector.load %arg13[%c0_110, %c0_111] : memref<2x32xf32, #tpu.memory_space<vmem>>, vector<2x32xf32>
    %238 = arith.truncf %237 : vector<2x32xf32> to vector<2x32xbf16>
    %cst_112 = arith.constant dense<0.000000e+00> : vector<2x128xf32>
    %239 = tpu.matmul %238, %16, %cst_112 {dimension_numbers = #tpu.dot_dimension_numbers<[1], [0], [0], [1], [0, 0, 1, 1], [], []>} : vector<2x32xbf16>, vector<32x128xbf16>, vector<2x128xf32> -> vector<2x128xf32>
    %240 = arith.addf %236, %239 : vector<2x128xf32>
    %c0_113 = arith.constant 0 : index
    %c0_114 = arith.constant 0 : index
    %241 = vector.load %arg14[%c0_113, %c0_114] : memref<2x32xf32, #tpu.memory_space<vmem>>, vector<2x32xf32>
    %242 = vector.extract_strided_slice %240 {offsets = [0, 0], sizes = [2, 32], strides = [1, 1]} : vector<2x128xf32> to vector<2x32xf32>
    %243 = arith.negf %242 : vector<2x32xf32>
    %244 = math.exp %243 : vector<2x32xf32>
    %cst_115 = arith.constant 1.000000e+00 : f32
    %245 = vector.broadcast %cst_115 : f32 to vector<2x32xf32>
    %246 = arith.addf %245, %244 : vector<2x32xf32>
    %247 = arith.divf %245, %246 : vector<2x32xf32>
    %248 = vector.extract_strided_slice %240 {offsets = [0, 32], sizes = [2, 32], strides = [1, 1]} : vector<2x128xf32> to vector<2x32xf32>
    %249 = arith.negf %248 : vector<2x32xf32>
    %250 = math.exp %249 : vector<2x32xf32>
    %cst_116 = arith.constant 1.000000e+00 : f32
    %251 = vector.broadcast %cst_116 : f32 to vector<2x32xf32>
    %252 = arith.addf %251, %250 : vector<2x32xf32>
    %253 = arith.divf %251, %252 : vector<2x32xf32>
    %254 = vector.extract_strided_slice %240 {offsets = [0, 64], sizes = [2, 32], strides = [1, 1]} : vector<2x128xf32> to vector<2x32xf32>
    %255 = math.tanh %254 : vector<2x32xf32>
    %256 = vector.extract_strided_slice %240 {offsets = [0, 96], sizes = [2, 32], strides = [1, 1]} : vector<2x128xf32> to vector<2x32xf32>
    %257 = arith.negf %256 : vector<2x32xf32>
    %258 = math.exp %257 : vector<2x32xf32>
    %cst_117 = arith.constant 1.000000e+00 : f32
    %259 = vector.broadcast %cst_117 : f32 to vector<2x32xf32>
    %260 = arith.addf %259, %258 : vector<2x32xf32>
    %261 = arith.divf %259, %260 : vector<2x32xf32>
    %262 = arith.mulf %253, %241 : vector<2x32xf32>
    %263 = arith.mulf %247, %255 : vector<2x32xf32>
    %264 = arith.addf %262, %263 : vector<2x32xf32>
    %265 = math.tanh %264 : vector<2x32xf32>
    %266 = arith.mulf %261, %265 : vector<2x32xf32>
    %c0_118 = arith.constant 0 : index
    %c0_119 = arith.constant 0 : index
    %267 = vector.load %arg13[%c0_118, %c0_119] : memref<2x32xf32, #tpu.memory_space<vmem>>, vector<2x32xf32>
    tpu.vector_store %arg13[%c0_118, %c0_119], %266 {strides = array<i32>} : memref<2x32xf32, #tpu.memory_space<vmem>>, vector<2x32xf32>,
    %c0_120 = arith.constant 0 : index
    %c0_121 = arith.constant 0 : index
    %268 = vector.load %arg14[%c0_120, %c0_121] : memref<2x32xf32, #tpu.memory_space<vmem>>, vector<2x32xf32>
    tpu.vector_store %arg14[%c0_120, %c0_121], %264 {strides = array<i32>} : memref<2x32xf32, #tpu.memory_space<vmem>>, vector<2x32xf32>,
    %269 = arith.truncf %266 : vector<2x32xf32> to vector<2x32xbf16>
    %270 = arith.index_cast %231 : i32 to index
    %c0_122 = arith.constant 0 : index
    %c0_123 = arith.constant 0 : index
    %271 = vector.load %arg10[%270, %c0_122, %c0_123] : memref<8x2x32xbf16, #tpu.memory_space<vmem>>, vector<1x2x32xbf16>
    %272 = vector.shape_cast %271 : vector<1x2x32xbf16> to vector<2x32xbf16>
    %273 = vector.shape_cast %269 : vector<2x32xbf16> to vector<1x2x32xbf16>
    tpu.vector_store %arg10[%270, %c0_122, %c0_123], %273 {strides = array<i32>} : memref<8x2x32xbf16, #tpu.memory_space<vmem>>, vector<1x2x32xbf16>,
    %c3_i32 = arith.constant 3 : i32
    %274 = arith.index_cast %c3_i32 : i32 to index
    %c0_124 = arith.constant 0 : index
    %c0_125 = arith.constant 0 : index
    %275 = vector.load %arg15[%274, %c0_124, %c0_125] : memref<8x2x128xf32, #tpu.memory_space<vmem>>, vector<1x2x128xf32>
    %276 = vector.shape_cast %275 : vector<1x2x128xf32> to vector<2x128xf32>
    %277 = vector.broadcast %17 : vector<1x128xf32> to vector<2x128xf32>
    %278 = arith.addf %276, %277 : vector<2x128xf32>
    %c0_126 = arith.constant 0 : index
    %c0_127 = arith.constant 0 : index
    %279 = vector.load %arg11[%c0_126, %c0_127] : memref<2x32xf32, #tpu.memory_space<vmem>>, vector<2x32xf32>
    %280 = arith.truncf %279 : vector<2x32xf32> to vector<2x32xbf16>
    %cst_128 = arith.constant dense<0.000000e+00> : vector<2x128xf32>
    %281 = tpu.matmul %280, %15, %cst_128 {dimension_numbers = #tpu.dot_dimension_numbers<[1], [0], [0], [1], [0, 0, 1, 1], [], []>} : vector<2x32xbf16>, vector<32x128xbf16>, vector<2x128xf32> -> vector<2x128xf32>
    %282 = arith.addf %278, %281 : vector<2x128xf32>
    %c0_129 = arith.constant 0 : index
    %c0_130 = arith.constant 0 : index
    %283 = vector.load %arg12[%c0_129, %c0_130] : memref<2x32xf32, #tpu.memory_space<vmem>>, vector<2x32xf32>
    %284 = vector.extract_strided_slice %282 {offsets = [0, 0], sizes = [2, 32], strides = [1, 1]} : vector<2x128xf32> to vector<2x32xf32>
    %285 = arith.negf %284 : vector<2x32xf32>
    %286 = math.exp %285 : vector<2x32xf32>
    %cst_131 = arith.constant 1.000000e+00 : f32
    %287 = vector.broadcast %cst_131 : f32 to vector<2x32xf32>
    %288 = arith.addf %287, %286 : vector<2x32xf32>
    %289 = arith.divf %287, %288 : vector<2x32xf32>
    %290 = vector.extract_strided_slice %282 {offsets = [0, 32], sizes = [2, 32], strides = [1, 1]} : vector<2x128xf32> to vector<2x32xf32>
    %291 = arith.negf %290 : vector<2x32xf32>
    %292 = math.exp %291 : vector<2x32xf32>
    %cst_132 = arith.constant 1.000000e+00 : f32
    %293 = vector.broadcast %cst_132 : f32 to vector<2x32xf32>
    %294 = arith.addf %293, %292 : vector<2x32xf32>
    %295 = arith.divf %293, %294 : vector<2x32xf32>
    %296 = vector.extract_strided_slice %282 {offsets = [0, 64], sizes = [2, 32], strides = [1, 1]} : vector<2x128xf32> to vector<2x32xf32>
    %297 = math.tanh %296 : vector<2x32xf32>
    %298 = vector.extract_strided_slice %282 {offsets = [0, 96], sizes = [2, 32], strides = [1, 1]} : vector<2x128xf32> to vector<2x32xf32>
    %299 = arith.negf %298 : vector<2x32xf32>
    %300 = math.exp %299 : vector<2x32xf32>
    %cst_133 = arith.constant 1.000000e+00 : f32
    %301 = vector.broadcast %cst_133 : f32 to vector<2x32xf32>
    %302 = arith.addf %301, %300 : vector<2x32xf32>
    %303 = arith.divf %301, %302 : vector<2x32xf32>
    %304 = arith.mulf %295, %283 : vector<2x32xf32>
    %305 = arith.mulf %289, %297 : vector<2x32xf32>
    %306 = arith.addf %304, %305 : vector<2x32xf32>
    %307 = math.tanh %306 : vector<2x32xf32>
    %308 = arith.mulf %303, %307 : vector<2x32xf32>
    %c0_134 = arith.constant 0 : index
    %c0_135 = arith.constant 0 : index
    %309 = vector.load %arg11[%c0_134, %c0_135] : memref<2x32xf32, #tpu.memory_space<vmem>>, vector<2x32xf32>
    tpu.vector_store %arg11[%c0_134, %c0_135], %308 {strides = array<i32>} : memref<2x32xf32, #tpu.memory_space<vmem>>, vector<2x32xf32>,
    %c0_136 = arith.constant 0 : index
    %c0_137 = arith.constant 0 : index
    %310 = vector.load %arg12[%c0_136, %c0_137] : memref<2x32xf32, #tpu.memory_space<vmem>>, vector<2x32xf32>
    tpu.vector_store %arg12[%c0_136, %c0_137], %306 {strides = array<i32>} : memref<2x32xf32, #tpu.memory_space<vmem>>, vector<2x32xf32>,
    %311 = arith.truncf %308 : vector<2x32xf32> to vector<2x32xbf16>
    %312 = arith.index_cast %c3_i32 : i32 to index
    %c0_138 = arith.constant 0 : index
    %c0_139 = arith.constant 0 : index
    %313 = vector.load %arg9[%312, %c0_138, %c0_139] : memref<8x2x32xbf16, #tpu.memory_space<vmem>>, vector<1x2x32xbf16>
    %314 = vector.shape_cast %313 : vector<1x2x32xbf16> to vector<2x32xbf16>
    %315 = vector.shape_cast %311 : vector<2x32xbf16> to vector<1x2x32xbf16>
    tpu.vector_store %arg9[%312, %c0_138, %c0_139], %315 {strides = array<i32>} : memref<8x2x32xbf16, #tpu.memory_space<vmem>>, vector<1x2x32xbf16>,
    %c7_i32_140 = arith.constant 7 : i32
    %316 = arith.subi %c7_i32_140, %c3_i32 : i32
    %317 = arith.index_cast %316 : i32 to index
    %c0_141 = arith.constant 0 : index
    %c0_142 = arith.constant 0 : index
    %318 = vector.load %arg16[%317, %c0_141, %c0_142] : memref<8x2x128xf32, #tpu.memory_space<vmem>>, vector<1x2x128xf32>
    %319 = vector.shape_cast %318 : vector<1x2x128xf32> to vector<2x128xf32>
    %320 = vector.broadcast %18 : vector<1x128xf32> to vector<2x128xf32>
    %321 = arith.addf %319, %320 : vector<2x128xf32>
    %c0_143 = arith.constant 0 : index
    %c0_144 = arith.constant 0 : index
    %322 = vector.load %arg13[%c0_143, %c0_144] : memref<2x32xf32, #tpu.memory_space<vmem>>, vector<2x32xf32>
    %323 = arith.truncf %322 : vector<2x32xf32> to vector<2x32xbf16>
    %cst_145 = arith.constant dense<0.000000e+00> : vector<2x128xf32>
    %324 = tpu.matmul %323, %16, %cst_145 {dimension_numbers = #tpu.dot_dimension_numbers<[1], [0], [0], [1], [0, 0, 1, 1], [], []>} : vector<2x32xbf16>, vector<32x128xbf16>, vector<2x128xf32> -> vector<2x128xf32>
    %325 = arith.addf %321, %324 : vector<2x128xf32>
    %c0_146 = arith.constant 0 : index
    %c0_147 = arith.constant 0 : index
    %326 = vector.load %arg14[%c0_146, %c0_147] : memref<2x32xf32, #tpu.memory_space<vmem>>, vector<2x32xf32>
    %327 = vector.extract_strided_slice %325 {offsets = [0, 0], sizes = [2, 32], strides = [1, 1]} : vector<2x128xf32> to vector<2x32xf32>
    %328 = arith.negf %327 : vector<2x32xf32>
    %329 = math.exp %328 : vector<2x32xf32>
    %cst_148 = arith.constant 1.000000e+00 : f32
    %330 = vector.broadcast %cst_148 : f32 to vector<2x32xf32>
    %331 = arith.addf %330, %329 : vector<2x32xf32>
    %332 = arith.divf %330, %331 : vector<2x32xf32>
    %333 = vector.extract_strided_slice %325 {offsets = [0, 32], sizes = [2, 32], strides = [1, 1]} : vector<2x128xf32> to vector<2x32xf32>
    %334 = arith.negf %333 : vector<2x32xf32>
    %335 = math.exp %334 : vector<2x32xf32>
    %cst_149 = arith.constant 1.000000e+00 : f32
    %336 = vector.broadcast %cst_149 : f32 to vector<2x32xf32>
    %337 = arith.addf %336, %335 : vector<2x32xf32>
    %338 = arith.divf %336, %337 : vector<2x32xf32>
    %339 = vector.extract_strided_slice %325 {offsets = [0, 64], sizes = [2, 32], strides = [1, 1]} : vector<2x128xf32> to vector<2x32xf32>
    %340 = math.tanh %339 : vector<2x32xf32>
    %341 = vector.extract_strided_slice %325 {offsets = [0, 96], sizes = [2, 32], strides = [1, 1]} : vector<2x128xf32> to vector<2x32xf32>
    %342 = arith.negf %341 : vector<2x32xf32>
    %343 = math.exp %342 : vector<2x32xf32>
    %cst_150 = arith.constant 1.000000e+00 : f32
    %344 = vector.broadcast %cst_150 : f32 to vector<2x32xf32>
    %345 = arith.addf %344, %343 : vector<2x32xf32>
    %346 = arith.divf %344, %345 : vector<2x32xf32>
    %347 = arith.mulf %338, %326 : vector<2x32xf32>
    %348 = arith.mulf %332, %340 : vector<2x32xf32>
    %349 = arith.addf %347, %348 : vector<2x32xf32>
    %350 = math.tanh %349 : vector<2x32xf32>
    %351 = arith.mulf %346, %350 : vector<2x32xf32>
    %c0_151 = arith.constant 0 : index
    %c0_152 = arith.constant 0 : index
    %352 = vector.load %arg13[%c0_151, %c0_152] : memref<2x32xf32, #tpu.memory_space<vmem>>, vector<2x32xf32>
    tpu.vector_store %arg13[%c0_151, %c0_152], %351 {strides = array<i32>} : memref<2x32xf32, #tpu.memory_space<vmem>>, vector<2x32xf32>,
    %c0_153 = arith.constant 0 : index
    %c0_154 = arith.constant 0 : index
    %353 = vector.load %arg14[%c0_153, %c0_154] : memref<2x32xf32, #tpu.memory_space<vmem>>, vector<2x32xf32>
    tpu.vector_store %arg14[%c0_153, %c0_154], %349 {strides = array<i32>} : memref<2x32xf32, #tpu.memory_space<vmem>>, vector<2x32xf32>,
    %354 = arith.truncf %351 : vector<2x32xf32> to vector<2x32xbf16>
    %355 = arith.index_cast %316 : i32 to index
    %c0_155 = arith.constant 0 : index
    %c0_156 = arith.constant 0 : index
    %356 = vector.load %arg10[%355, %c0_155, %c0_156] : memref<8x2x32xbf16, #tpu.memory_space<vmem>>, vector<1x2x32xbf16>
    %357 = vector.shape_cast %356 : vector<1x2x32xbf16> to vector<2x32xbf16>
    %358 = vector.shape_cast %354 : vector<2x32xbf16> to vector<1x2x32xbf16>
    tpu.vector_store %arg10[%355, %c0_155, %c0_156], %358 {strides = array<i32>} : memref<8x2x32xbf16, #tpu.memory_space<vmem>>, vector<1x2x32xbf16>,
    %c4_i32 = arith.constant 4 : i32
    %359 = arith.index_cast %c4_i32 : i32 to index
    %c0_157 = arith.constant 0 : index
    %c0_158 = arith.constant 0 : index
    %360 = vector.load %arg15[%359, %c0_157, %c0_158] : memref<8x2x128xf32, #tpu.memory_space<vmem>>, vector<1x2x128xf32>
    %361 = vector.shape_cast %360 : vector<1x2x128xf32> to vector<2x128xf32>
    %362 = vector.broadcast %17 : vector<1x128xf32> to vector<2x128xf32>
    %363 = arith.addf %361, %362 : vector<2x128xf32>
    %c0_159 = arith.constant 0 : index
    %c0_160 = arith.constant 0 : index
    %364 = vector.load %arg11[%c0_159, %c0_160] : memref<2x32xf32, #tpu.memory_space<vmem>>, vector<2x32xf32>
    %365 = arith.truncf %364 : vector<2x32xf32> to vector<2x32xbf16>
    %cst_161 = arith.constant dense<0.000000e+00> : vector<2x128xf32>
    %366 = tpu.matmul %365, %15, %cst_161 {dimension_numbers = #tpu.dot_dimension_numbers<[1], [0], [0], [1], [0, 0, 1, 1], [], []>} : vector<2x32xbf16>, vector<32x128xbf16>, vector<2x128xf32> -> vector<2x128xf32>
    %367 = arith.addf %363, %366 : vector<2x128xf32>
    %c0_162 = arith.constant 0 : index
    %c0_163 = arith.constant 0 : index
    %368 = vector.load %arg12[%c0_162, %c0_163] : memref<2x32xf32, #tpu.memory_space<vmem>>, vector<2x32xf32>
    %369 = vector.extract_strided_slice %367 {offsets = [0, 0], sizes = [2, 32], strides = [1, 1]} : vector<2x128xf32> to vector<2x32xf32>
    %370 = arith.negf %369 : vector<2x32xf32>
    %371 = math.exp %370 : vector<2x32xf32>
    %cst_164 = arith.constant 1.000000e+00 : f32
    %372 = vector.broadcast %cst_164 : f32 to vector<2x32xf32>
    %373 = arith.addf %372, %371 : vector<2x32xf32>
    %374 = arith.divf %372, %373 : vector<2x32xf32>
    %375 = vector.extract_strided_slice %367 {offsets = [0, 32], sizes = [2, 32], strides = [1, 1]} : vector<2x128xf32> to vector<2x32xf32>
    %376 = arith.negf %375 : vector<2x32xf32>
    %377 = math.exp %376 : vector<2x32xf32>
    %cst_165 = arith.constant 1.000000e+00 : f32
    %378 = vector.broadcast %cst_165 : f32 to vector<2x32xf32>
    %379 = arith.addf %378, %377 : vector<2x32xf32>
    %380 = arith.divf %378, %379 : vector<2x32xf32>
    %381 = vector.extract_strided_slice %367 {offsets = [0, 64], sizes = [2, 32], strides = [1, 1]} : vector<2x128xf32> to vector<2x32xf32>
    %382 = math.tanh %381 : vector<2x32xf32>
    %383 = vector.extract_strided_slice %367 {offsets = [0, 96], sizes = [2, 32], strides = [1, 1]} : vector<2x128xf32> to vector<2x32xf32>
    %384 = arith.negf %383 : vector<2x32xf32>
    %385 = math.exp %384 : vector<2x32xf32>
    %cst_166 = arith.constant 1.000000e+00 : f32
    %386 = vector.broadcast %cst_166 : f32 to vector<2x32xf32>
    %387 = arith.addf %386, %385 : vector<2x32xf32>
    %388 = arith.divf %386, %387 : vector<2x32xf32>
    %389 = arith.mulf %380, %368 : vector<2x32xf32>
    %390 = arith.mulf %374, %382 : vector<2x32xf32>
    %391 = arith.addf %389, %390 : vector<2x32xf32>
    %392 = math.tanh %391 : vector<2x32xf32>
    %393 = arith.mulf %388, %392 : vector<2x32xf32>
    %c0_167 = arith.constant 0 : index
    %c0_168 = arith.constant 0 : index
    %394 = vector.load %arg11[%c0_167, %c0_168] : memref<2x32xf32, #tpu.memory_space<vmem>>, vector<2x32xf32>
    tpu.vector_store %arg11[%c0_167, %c0_168], %393 {strides = array<i32>} : memref<2x32xf32, #tpu.memory_space<vmem>>, vector<2x32xf32>,
    %c0_169 = arith.constant 0 : index
    %c0_170 = arith.constant 0 : index
    %395 = vector.load %arg12[%c0_169, %c0_170] : memref<2x32xf32, #tpu.memory_space<vmem>>, vector<2x32xf32>
    tpu.vector_store %arg12[%c0_169, %c0_170], %391 {strides = array<i32>} : memref<2x32xf32, #tpu.memory_space<vmem>>, vector<2x32xf32>,
    %396 = arith.truncf %393 : vector<2x32xf32> to vector<2x32xbf16>
    %397 = arith.index_cast %c4_i32 : i32 to index
    %c0_171 = arith.constant 0 : index
    %c0_172 = arith.constant 0 : index
    %398 = vector.load %arg9[%397, %c0_171, %c0_172] : memref<8x2x32xbf16, #tpu.memory_space<vmem>>, vector<1x2x32xbf16>
    %399 = vector.shape_cast %398 : vector<1x2x32xbf16> to vector<2x32xbf16>
    %400 = vector.shape_cast %396 : vector<2x32xbf16> to vector<1x2x32xbf16>
    tpu.vector_store %arg9[%397, %c0_171, %c0_172], %400 {strides = array<i32>} : memref<8x2x32xbf16, #tpu.memory_space<vmem>>, vector<1x2x32xbf16>,
    %c7_i32_173 = arith.constant 7 : i32
    %401 = arith.subi %c7_i32_173, %c4_i32 : i32
    %402 = arith.index_cast %401 : i32 to index
    %c0_174 = arith.constant 0 : index
    %c0_175 = arith.constant 0 : index
    %403 = vector.load %arg16[%402, %c0_174, %c0_175] : memref<8x2x128xf32, #tpu.memory_space<vmem>>, vector<1x2x128xf32>
    %404 = vector.shape_cast %403 : vector<1x2x128xf32> to vector<2x128xf32>
    %405 = vector.broadcast %18 : vector<1x128xf32> to vector<2x128xf32>
    %406 = arith.addf %404, %405 : vector<2x128xf32>
    %c0_176 = arith.constant 0 : index
    %c0_177 = arith.constant 0 : index
    %407 = vector.load %arg13[%c0_176, %c0_177] : memref<2x32xf32, #tpu.memory_space<vmem>>, vector<2x32xf32>
    %408 = arith.truncf %407 : vector<2x32xf32> to vector<2x32xbf16>
    %cst_178 = arith.constant dense<0.000000e+00> : vector<2x128xf32>
    %409 = tpu.matmul %408, %16, %cst_178 {dimension_numbers = #tpu.dot_dimension_numbers<[1], [0], [0], [1], [0, 0, 1, 1], [], []>} : vector<2x32xbf16>, vector<32x128xbf16>, vector<2x128xf32> -> vector<2x128xf32>
    %410 = arith.addf %406, %409 : vector<2x128xf32>
    %c0_179 = arith.constant 0 : index
    %c0_180 = arith.constant 0 : index
    %411 = vector.load %arg14[%c0_179, %c0_180] : memref<2x32xf32, #tpu.memory_space<vmem>>, vector<2x32xf32>
    %412 = vector.extract_strided_slice %410 {offsets = [0, 0], sizes = [2, 32], strides = [1, 1]} : vector<2x128xf32> to vector<2x32xf32>
    %413 = arith.negf %412 : vector<2x32xf32>
    %414 = math.exp %413 : vector<2x32xf32>
    %cst_181 = arith.constant 1.000000e+00 : f32
    %415 = vector.broadcast %cst_181 : f32 to vector<2x32xf32>
    %416 = arith.addf %415, %414 : vector<2x32xf32>
    %417 = arith.divf %415, %416 : vector<2x32xf32>
    %418 = vector.extract_strided_slice %410 {offsets = [0, 32], sizes = [2, 32], strides = [1, 1]} : vector<2x128xf32> to vector<2x32xf32>
    %419 = arith.negf %418 : vector<2x32xf32>
    %420 = math.exp %419 : vector<2x32xf32>
    %cst_182 = arith.constant 1.000000e+00 : f32
    %421 = vector.broadcast %cst_182 : f32 to vector<2x32xf32>
    %422 = arith.addf %421, %420 : vector<2x32xf32>
    %423 = arith.divf %421, %422 : vector<2x32xf32>
    %424 = vector.extract_strided_slice %410 {offsets = [0, 64], sizes = [2, 32], strides = [1, 1]} : vector<2x128xf32> to vector<2x32xf32>
    %425 = math.tanh %424 : vector<2x32xf32>
    %426 = vector.extract_strided_slice %410 {offsets = [0, 96], sizes = [2, 32], strides = [1, 1]} : vector<2x128xf32> to vector<2x32xf32>
    %427 = arith.negf %426 : vector<2x32xf32>
    %428 = math.exp %427 : vector<2x32xf32>
    %cst_183 = arith.constant 1.000000e+00 : f32
    %429 = vector.broadcast %cst_183 : f32 to vector<2x32xf32>
    %430 = arith.addf %429, %428 : vector<2x32xf32>
    %431 = arith.divf %429, %430 : vector<2x32xf32>
    %432 = arith.mulf %423, %411 : vector<2x32xf32>
    %433 = arith.mulf %417, %425 : vector<2x32xf32>
    %434 = arith.addf %432, %433 : vector<2x32xf32>
    %435 = math.tanh %434 : vector<2x32xf32>
    %436 = arith.mulf %431, %435 : vector<2x32xf32>
    %c0_184 = arith.constant 0 : index
    %c0_185 = arith.constant 0 : index
    %437 = vector.load %arg13[%c0_184, %c0_185] : memref<2x32xf32, #tpu.memory_space<vmem>>, vector<2x32xf32>
    tpu.vector_store %arg13[%c0_184, %c0_185], %436 {strides = array<i32>} : memref<2x32xf32, #tpu.memory_space<vmem>>, vector<2x32xf32>,
    %c0_186 = arith.constant 0 : index
    %c0_187 = arith.constant 0 : index
    %438 = vector.load %arg14[%c0_186, %c0_187] : memref<2x32xf32, #tpu.memory_space<vmem>>, vector<2x32xf32>
    tpu.vector_store %arg14[%c0_186, %c0_187], %434 {strides = array<i32>} : memref<2x32xf32, #tpu.memory_space<vmem>>, vector<2x32xf32>,
    %439 = arith.truncf %436 : vector<2x32xf32> to vector<2x32xbf16>
    %440 = arith.index_cast %401 : i32 to index
    %c0_188 = arith.constant 0 : index
    %c0_189 = arith.constant 0 : index
    %441 = vector.load %arg10[%440, %c0_188, %c0_189] : memref<8x2x32xbf16, #tpu.memory_space<vmem>>, vector<1x2x32xbf16>
    %442 = vector.shape_cast %441 : vector<1x2x32xbf16> to vector<2x32xbf16>
    %443 = vector.shape_cast %439 : vector<2x32xbf16> to vector<1x2x32xbf16>
    tpu.vector_store %arg10[%440, %c0_188, %c0_189], %443 {strides = array<i32>} : memref<8x2x32xbf16, #tpu.memory_space<vmem>>, vector<1x2x32xbf16>,
    %c5_i32 = arith.constant 5 : i32
    %444 = arith.index_cast %c5_i32 : i32 to index
    %c0_190 = arith.constant 0 : index
    %c0_191 = arith.constant 0 : index
    %445 = vector.load %arg15[%444, %c0_190, %c0_191] : memref<8x2x128xf32, #tpu.memory_space<vmem>>, vector<1x2x128xf32>
    %446 = vector.shape_cast %445 : vector<1x2x128xf32> to vector<2x128xf32>
    %447 = vector.broadcast %17 : vector<1x128xf32> to vector<2x128xf32>
    %448 = arith.addf %446, %447 : vector<2x128xf32>
    %c0_192 = arith.constant 0 : index
    %c0_193 = arith.constant 0 : index
    %449 = vector.load %arg11[%c0_192, %c0_193] : memref<2x32xf32, #tpu.memory_space<vmem>>, vector<2x32xf32>
    %450 = arith.truncf %449 : vector<2x32xf32> to vector<2x32xbf16>
    %cst_194 = arith.constant dense<0.000000e+00> : vector<2x128xf32>
    %451 = tpu.matmul %450, %15, %cst_194 {dimension_numbers = #tpu.dot_dimension_numbers<[1], [0], [0], [1], [0, 0, 1, 1], [], []>} : vector<2x32xbf16>, vector<32x128xbf16>, vector<2x128xf32> -> vector<2x128xf32>
    %452 = arith.addf %448, %451 : vector<2x128xf32>
    %c0_195 = arith.constant 0 : index
    %c0_196 = arith.constant 0 : index
    %453 = vector.load %arg12[%c0_195, %c0_196] : memref<2x32xf32, #tpu.memory_space<vmem>>, vector<2x32xf32>
    %454 = vector.extract_strided_slice %452 {offsets = [0, 0], sizes = [2, 32], strides = [1, 1]} : vector<2x128xf32> to vector<2x32xf32>
    %455 = arith.negf %454 : vector<2x32xf32>
    %456 = math.exp %455 : vector<2x32xf32>
    %cst_197 = arith.constant 1.000000e+00 : f32
    %457 = vector.broadcast %cst_197 : f32 to vector<2x32xf32>
    %458 = arith.addf %457, %456 : vector<2x32xf32>
    %459 = arith.divf %457, %458 : vector<2x32xf32>
    %460 = vector.extract_strided_slice %452 {offsets = [0, 32], sizes = [2, 32], strides = [1, 1]} : vector<2x128xf32> to vector<2x32xf32>
    %461 = arith.negf %460 : vector<2x32xf32>
    %462 = math.exp %461 : vector<2x32xf32>
    %cst_198 = arith.constant 1.000000e+00 : f32
    %463 = vector.broadcast %cst_198 : f32 to vector<2x32xf32>
    %464 = arith.addf %463, %462 : vector<2x32xf32>
    %465 = arith.divf %463, %464 : vector<2x32xf32>
    %466 = vector.extract_strided_slice %452 {offsets = [0, 64], sizes = [2, 32], strides = [1, 1]} : vector<2x128xf32> to vector<2x32xf32>
    %467 = math.tanh %466 : vector<2x32xf32>
    %468 = vector.extract_strided_slice %452 {offsets = [0, 96], sizes = [2, 32], strides = [1, 1]} : vector<2x128xf32> to vector<2x32xf32>
    %469 = arith.negf %468 : vector<2x32xf32>
    %470 = math.exp %469 : vector<2x32xf32>
    %cst_199 = arith.constant 1.000000e+00 : f32
    %471 = vector.broadcast %cst_199 : f32 to vector<2x32xf32>
    %472 = arith.addf %471, %470 : vector<2x32xf32>
    %473 = arith.divf %471, %472 : vector<2x32xf32>
    %474 = arith.mulf %465, %453 : vector<2x32xf32>
    %475 = arith.mulf %459, %467 : vector<2x32xf32>
    %476 = arith.addf %474, %475 : vector<2x32xf32>
    %477 = math.tanh %476 : vector<2x32xf32>
    %478 = arith.mulf %473, %477 : vector<2x32xf32>
    %c0_200 = arith.constant 0 : index
    %c0_201 = arith.constant 0 : index
    %479 = vector.load %arg11[%c0_200, %c0_201] : memref<2x32xf32, #tpu.memory_space<vmem>>, vector<2x32xf32>
    tpu.vector_store %arg11[%c0_200, %c0_201], %478 {strides = array<i32>} : memref<2x32xf32, #tpu.memory_space<vmem>>, vector<2x32xf32>,
    %c0_202 = arith.constant 0 : index
    %c0_203 = arith.constant 0 : index
    %480 = vector.load %arg12[%c0_202, %c0_203] : memref<2x32xf32, #tpu.memory_space<vmem>>, vector<2x32xf32>
    tpu.vector_store %arg12[%c0_202, %c0_203], %476 {strides = array<i32>} : memref<2x32xf32, #tpu.memory_space<vmem>>, vector<2x32xf32>,
    %481 = arith.truncf %478 : vector<2x32xf32> to vector<2x32xbf16>
    %482 = arith.index_cast %c5_i32 : i32 to index
    %c0_204 = arith.constant 0 : index
    %c0_205 = arith.constant 0 : index
    %483 = vector.load %arg9[%482, %c0_204, %c0_205] : memref<8x2x32xbf16, #tpu.memory_space<vmem>>, vector<1x2x32xbf16>
    %484 = vector.shape_cast %483 : vector<1x2x32xbf16> to vector<2x32xbf16>
    %485 = vector.shape_cast %481 : vector<2x32xbf16> to vector<1x2x32xbf16>
    tpu.vector_store %arg9[%482, %c0_204, %c0_205], %485 {strides = array<i32>} : memref<8x2x32xbf16, #tpu.memory_space<vmem>>, vector<1x2x32xbf16>,
    %c7_i32_206 = arith.constant 7 : i32
    %486 = arith.subi %c7_i32_206, %c5_i32 : i32
    %487 = arith.index_cast %486 : i32 to index
    %c0_207 = arith.constant 0 : index
    %c0_208 = arith.constant 0 : index
    %488 = vector.load %arg16[%487, %c0_207, %c0_208] : memref<8x2x128xf32, #tpu.memory_space<vmem>>, vector<1x2x128xf32>
    %489 = vector.shape_cast %488 : vector<1x2x128xf32> to vector<2x128xf32>
    %490 = vector.broadcast %18 : vector<1x128xf32> to vector<2x128xf32>
    %491 = arith.addf %489, %490 : vector<2x128xf32>
    %c0_209 = arith.constant 0 : index
    %c0_210 = arith.constant 0 : index
    %492 = vector.load %arg13[%c0_209, %c0_210] : memref<2x32xf32, #tpu.memory_space<vmem>>, vector<2x32xf32>
    %493 = arith.truncf %492 : vector<2x32xf32> to vector<2x32xbf16>
    %cst_211 = arith.constant dense<0.000000e+00> : vector<2x128xf32>
    %494 = tpu.matmul %493, %16, %cst_211 {dimension_numbers = #tpu.dot_dimension_numbers<[1], [0], [0], [1], [0, 0, 1, 1], [], []>} : vector<2x32xbf16>, vector<32x128xbf16>, vector<2x128xf32> -> vector<2x128xf32>
    %495 = arith.addf %491, %494 : vector<2x128xf32>
    %c0_212 = arith.constant 0 : index
    %c0_213 = arith.constant 0 : index
    %496 = vector.load %arg14[%c0_212, %c0_213] : memref<2x32xf32, #tpu.memory_space<vmem>>, vector<2x32xf32>
    %497 = vector.extract_strided_slice %495 {offsets = [0, 0], sizes = [2, 32], strides = [1, 1]} : vector<2x128xf32> to vector<2x32xf32>
    %498 = arith.negf %497 : vector<2x32xf32>
    %499 = math.exp %498 : vector<2x32xf32>
    %cst_214 = arith.constant 1.000000e+00 : f32
    %500 = vector.broadcast %cst_214 : f32 to vector<2x32xf32>
    %501 = arith.addf %500, %499 : vector<2x32xf32>
    %502 = arith.divf %500, %501 : vector<2x32xf32>
    %503 = vector.extract_strided_slice %495 {offsets = [0, 32], sizes = [2, 32], strides = [1, 1]} : vector<2x128xf32> to vector<2x32xf32>
    %504 = arith.negf %503 : vector<2x32xf32>
    %505 = math.exp %504 : vector<2x32xf32>
    %cst_215 = arith.constant 1.000000e+00 : f32
    %506 = vector.broadcast %cst_215 : f32 to vector<2x32xf32>
    %507 = arith.addf %506, %505 : vector<2x32xf32>
    %508 = arith.divf %506, %507 : vector<2x32xf32>
    %509 = vector.extract_strided_slice %495 {offsets = [0, 64], sizes = [2, 32], strides = [1, 1]} : vector<2x128xf32> to vector<2x32xf32>
    %510 = math.tanh %509 : vector<2x32xf32>
    %511 = vector.extract_strided_slice %495 {offsets = [0, 96], sizes = [2, 32], strides = [1, 1]} : vector<2x128xf32> to vector<2x32xf32>
    %512 = arith.negf %511 : vector<2x32xf32>
    %513 = math.exp %512 : vector<2x32xf32>
    %cst_216 = arith.constant 1.000000e+00 : f32
    %514 = vector.broadcast %cst_216 : f32 to vector<2x32xf32>
    %515 = arith.addf %514, %513 : vector<2x32xf32>
    %516 = arith.divf %514, %515 : vector<2x32xf32>
    %517 = arith.mulf %508, %496 : vector<2x32xf32>
    %518 = arith.mulf %502, %510 : vector<2x32xf32>
    %519 = arith.addf %517, %518 : vector<2x32xf32>
    %520 = math.tanh %519 : vector<2x32xf32>
    %521 = arith.mulf %516, %520 : vector<2x32xf32>
    %c0_217 = arith.constant 0 : index
    %c0_218 = arith.constant 0 : index
    %522 = vector.load %arg13[%c0_217, %c0_218] : memref<2x32xf32, #tpu.memory_space<vmem>>, vector<2x32xf32>
    tpu.vector_store %arg13[%c0_217, %c0_218], %521 {strides = array<i32>} : memref<2x32xf32, #tpu.memory_space<vmem>>, vector<2x32xf32>,
    %c0_219 = arith.constant 0 : index
    %c0_220 = arith.constant 0 : index
    %523 = vector.load %arg14[%c0_219, %c0_220] : memref<2x32xf32, #tpu.memory_space<vmem>>, vector<2x32xf32>
    tpu.vector_store %arg14[%c0_219, %c0_220], %519 {strides = array<i32>} : memref<2x32xf32, #tpu.memory_space<vmem>>, vector<2x32xf32>,
    %524 = arith.truncf %521 : vector<2x32xf32> to vector<2x32xbf16>
    %525 = arith.index_cast %486 : i32 to index
    %c0_221 = arith.constant 0 : index
    %c0_222 = arith.constant 0 : index
    %526 = vector.load %arg10[%525, %c0_221, %c0_222] : memref<8x2x32xbf16, #tpu.memory_space<vmem>>, vector<1x2x32xbf16>
    %527 = vector.shape_cast %526 : vector<1x2x32xbf16> to vector<2x32xbf16>
    %528 = vector.shape_cast %524 : vector<2x32xbf16> to vector<1x2x32xbf16>
    tpu.vector_store %arg10[%525, %c0_221, %c0_222], %528 {strides = array<i32>} : memref<8x2x32xbf16, #tpu.memory_space<vmem>>, vector<1x2x32xbf16>,
    %c6_i32 = arith.constant 6 : i32
    %529 = arith.index_cast %c6_i32 : i32 to index
    %c0_223 = arith.constant 0 : index
    %c0_224 = arith.constant 0 : index
    %530 = vector.load %arg15[%529, %c0_223, %c0_224] : memref<8x2x128xf32, #tpu.memory_space<vmem>>, vector<1x2x128xf32>
    %531 = vector.shape_cast %530 : vector<1x2x128xf32> to vector<2x128xf32>
    %532 = vector.broadcast %17 : vector<1x128xf32> to vector<2x128xf32>
    %533 = arith.addf %531, %532 : vector<2x128xf32>
    %c0_225 = arith.constant 0 : index
    %c0_226 = arith.constant 0 : index
    %534 = vector.load %arg11[%c0_225, %c0_226] : memref<2x32xf32, #tpu.memory_space<vmem>>, vector<2x32xf32>
    %535 = arith.truncf %534 : vector<2x32xf32> to vector<2x32xbf16>
    %cst_227 = arith.constant dense<0.000000e+00> : vector<2x128xf32>
    %536 = tpu.matmul %535, %15, %cst_227 {dimension_numbers = #tpu.dot_dimension_numbers<[1], [0], [0], [1], [0, 0, 1, 1], [], []>} : vector<2x32xbf16>, vector<32x128xbf16>, vector<2x128xf32> -> vector<2x128xf32>
    %537 = arith.addf %533, %536 : vector<2x128xf32>
    %c0_228 = arith.constant 0 : index
    %c0_229 = arith.constant 0 : index
    %538 = vector.load %arg12[%c0_228, %c0_229] : memref<2x32xf32, #tpu.memory_space<vmem>>, vector<2x32xf32>
    %539 = vector.extract_strided_slice %537 {offsets = [0, 0], sizes = [2, 32], strides = [1, 1]} : vector<2x128xf32> to vector<2x32xf32>
    %540 = arith.negf %539 : vector<2x32xf32>
    %541 = math.exp %540 : vector<2x32xf32>
    %cst_230 = arith.constant 1.000000e+00 : f32
    %542 = vector.broadcast %cst_230 : f32 to vector<2x32xf32>
    %543 = arith.addf %542, %541 : vector<2x32xf32>
    %544 = arith.divf %542, %543 : vector<2x32xf32>
    %545 = vector.extract_strided_slice %537 {offsets = [0, 32], sizes = [2, 32], strides = [1, 1]} : vector<2x128xf32> to vector<2x32xf32>
    %546 = arith.negf %545 : vector<2x32xf32>
    %547 = math.exp %546 : vector<2x32xf32>
    %cst_231 = arith.constant 1.000000e+00 : f32
    %548 = vector.broadcast %cst_231 : f32 to vector<2x32xf32>
    %549 = arith.addf %548, %547 : vector<2x32xf32>
    %550 = arith.divf %548, %549 : vector<2x32xf32>
    %551 = vector.extract_strided_slice %537 {offsets = [0, 64], sizes = [2, 32], strides = [1, 1]} : vector<2x128xf32> to vector<2x32xf32>
    %552 = math.tanh %551 : vector<2x32xf32>
    %553 = vector.extract_strided_slice %537 {offsets = [0, 96], sizes = [2, 32], strides = [1, 1]} : vector<2x128xf32> to vector<2x32xf32>
    %554 = arith.negf %553 : vector<2x32xf32>
    %555 = math.exp %554 : vector<2x32xf32>
    %cst_232 = arith.constant 1.000000e+00 : f32
    %556 = vector.broadcast %cst_232 : f32 to vector<2x32xf32>
    %557 = arith.addf %556, %555 : vector<2x32xf32>
    %558 = arith.divf %556, %557 : vector<2x32xf32>
    %559 = arith.mulf %550, %538 : vector<2x32xf32>
    %560 = arith.mulf %544, %552 : vector<2x32xf32>
    %561 = arith.addf %559, %560 : vector<2x32xf32>
    %562 = math.tanh %561 : vector<2x32xf32>
    %563 = arith.mulf %558, %562 : vector<2x32xf32>
    %c0_233 = arith.constant 0 : index
    %c0_234 = arith.constant 0 : index
    %564 = vector.load %arg11[%c0_233, %c0_234] : memref<2x32xf32, #tpu.memory_space<vmem>>, vector<2x32xf32>
    tpu.vector_store %arg11[%c0_233, %c0_234], %563 {strides = array<i32>} : memref<2x32xf32, #tpu.memory_space<vmem>>, vector<2x32xf32>,
    %c0_235 = arith.constant 0 : index
    %c0_236 = arith.constant 0 : index
    %565 = vector.load %arg12[%c0_235, %c0_236] : memref<2x32xf32, #tpu.memory_space<vmem>>, vector<2x32xf32>
    tpu.vector_store %arg12[%c0_235, %c0_236], %561 {strides = array<i32>} : memref<2x32xf32, #tpu.memory_space<vmem>>, vector<2x32xf32>,
    %566 = arith.truncf %563 : vector<2x32xf32> to vector<2x32xbf16>
    %567 = arith.index_cast %c6_i32 : i32 to index
    %c0_237 = arith.constant 0 : index
    %c0_238 = arith.constant 0 : index
    %568 = vector.load %arg9[%567, %c0_237, %c0_238] : memref<8x2x32xbf16, #tpu.memory_space<vmem>>, vector<1x2x32xbf16>
    %569 = vector.shape_cast %568 : vector<1x2x32xbf16> to vector<2x32xbf16>
    %570 = vector.shape_cast %566 : vector<2x32xbf16> to vector<1x2x32xbf16>
    tpu.vector_store %arg9[%567, %c0_237, %c0_238], %570 {strides = array<i32>} : memref<8x2x32xbf16, #tpu.memory_space<vmem>>, vector<1x2x32xbf16>,
    %c7_i32_239 = arith.constant 7 : i32
    %571 = arith.subi %c7_i32_239, %c6_i32 : i32
    %572 = arith.index_cast %571 : i32 to index
    %c0_240 = arith.constant 0 : index
    %c0_241 = arith.constant 0 : index
    %573 = vector.load %arg16[%572, %c0_240, %c0_241] : memref<8x2x128xf32, #tpu.memory_space<vmem>>, vector<1x2x128xf32>
    %574 = vector.shape_cast %573 : vector<1x2x128xf32> to vector<2x128xf32>
    %575 = vector.broadcast %18 : vector<1x128xf32> to vector<2x128xf32>
    %576 = arith.addf %574, %575 : vector<2x128xf32>
    %c0_242 = arith.constant 0 : index
    %c0_243 = arith.constant 0 : index
    %577 = vector.load %arg13[%c0_242, %c0_243] : memref<2x32xf32, #tpu.memory_space<vmem>>, vector<2x32xf32>
    %578 = arith.truncf %577 : vector<2x32xf32> to vector<2x32xbf16>
    %cst_244 = arith.constant dense<0.000000e+00> : vector<2x128xf32>
    %579 = tpu.matmul %578, %16, %cst_244 {dimension_numbers = #tpu.dot_dimension_numbers<[1], [0], [0], [1], [0, 0, 1, 1], [], []>} : vector<2x32xbf16>, vector<32x128xbf16>, vector<2x128xf32> -> vector<2x128xf32>
    %580 = arith.addf %576, %579 : vector<2x128xf32>
    %c0_245 = arith.constant 0 : index
    %c0_246 = arith.constant 0 : index
    %581 = vector.load %arg14[%c0_245, %c0_246] : memref<2x32xf32, #tpu.memory_space<vmem>>, vector<2x32xf32>
    %582 = vector.extract_strided_slice %580 {offsets = [0, 0], sizes = [2, 32], strides = [1, 1]} : vector<2x128xf32> to vector<2x32xf32>
    %583 = arith.negf %582 : vector<2x32xf32>
    %584 = math.exp %583 : vector<2x32xf32>
    %cst_247 = arith.constant 1.000000e+00 : f32
    %585 = vector.broadcast %cst_247 : f32 to vector<2x32xf32>
    %586 = arith.addf %585, %584 : vector<2x32xf32>
    %587 = arith.divf %585, %586 : vector<2x32xf32>
    %588 = vector.extract_strided_slice %580 {offsets = [0, 32], sizes = [2, 32], strides = [1, 1]} : vector<2x128xf32> to vector<2x32xf32>
    %589 = arith.negf %588 : vector<2x32xf32>
    %590 = math.exp %589 : vector<2x32xf32>
    %cst_248 = arith.constant 1.000000e+00 : f32
    %591 = vector.broadcast %cst_248 : f32 to vector<2x32xf32>
    %592 = arith.addf %591, %590 : vector<2x32xf32>
    %593 = arith.divf %591, %592 : vector<2x32xf32>
    %594 = vector.extract_strided_slice %580 {offsets = [0, 64], sizes = [2, 32], strides = [1, 1]} : vector<2x128xf32> to vector<2x32xf32>
    %595 = math.tanh %594 : vector<2x32xf32>
    %596 = vector.extract_strided_slice %580 {offsets = [0, 96], sizes = [2, 32], strides = [1, 1]} : vector<2x128xf32> to vector<2x32xf32>
    %597 = arith.negf %596 : vector<2x32xf32>
    %598 = math.exp %597 : vector<2x32xf32>
    %cst_249 = arith.constant 1.000000e+00 : f32
    %599 = vector.broadcast %cst_249 : f32 to vector<2x32xf32>
    %600 = arith.addf %599, %598 : vector<2x32xf32>
    %601 = arith.divf %599, %600 : vector<2x32xf32>
    %602 = arith.mulf %593, %581 : vector<2x32xf32>
    %603 = arith.mulf %587, %595 : vector<2x32xf32>
    %604 = arith.addf %602, %603 : vector<2x32xf32>
    %605 = math.tanh %604 : vector<2x32xf32>
    %606 = arith.mulf %601, %605 : vector<2x32xf32>
    %c0_250 = arith.constant 0 : index
    %c0_251 = arith.constant 0 : index
    %607 = vector.load %arg13[%c0_250, %c0_251] : memref<2x32xf32, #tpu.memory_space<vmem>>, vector<2x32xf32>
    tpu.vector_store %arg13[%c0_250, %c0_251], %606 {strides = array<i32>} : memref<2x32xf32, #tpu.memory_space<vmem>>, vector<2x32xf32>,
    %c0_252 = arith.constant 0 : index
    %c0_253 = arith.constant 0 : index
    %608 = vector.load %arg14[%c0_252, %c0_253] : memref<2x32xf32, #tpu.memory_space<vmem>>, vector<2x32xf32>
    tpu.vector_store %arg14[%c0_252, %c0_253], %604 {strides = array<i32>} : memref<2x32xf32, #tpu.memory_space<vmem>>, vector<2x32xf32>,
    %609 = arith.truncf %606 : vector<2x32xf32> to vector<2x32xbf16>
    %610 = arith.index_cast %571 : i32 to index
    %c0_254 = arith.constant 0 : index
    %c0_255 = arith.constant 0 : index
    %611 = vector.load %arg10[%610, %c0_254, %c0_255] : memref<8x2x32xbf16, #tpu.memory_space<vmem>>, vector<1x2x32xbf16>
    %612 = vector.shape_cast %611 : vector<1x2x32xbf16> to vector<2x32xbf16>
    %613 = vector.shape_cast %609 : vector<2x32xbf16> to vector<1x2x32xbf16>
    tpu.vector_store %arg10[%610, %c0_254, %c0_255], %613 {strides = array<i32>} : memref<8x2x32xbf16, #tpu.memory_space<vmem>>, vector<1x2x32xbf16>,
    %c7_i32_256 = arith.constant 7 : i32
    %614 = arith.index_cast %c7_i32_256 : i32 to index
    %c0_257 = arith.constant 0 : index
    %c0_258 = arith.constant 0 : index
    %615 = vector.load %arg15[%614, %c0_257, %c0_258] : memref<8x2x128xf32, #tpu.memory_space<vmem>>, vector<1x2x128xf32>
    %616 = vector.shape_cast %615 : vector<1x2x128xf32> to vector<2x128xf32>
    %617 = vector.broadcast %17 : vector<1x128xf32> to vector<2x128xf32>
    %618 = arith.addf %616, %617 : vector<2x128xf32>
    %c0_259 = arith.constant 0 : index
    %c0_260 = arith.constant 0 : index
    %619 = vector.load %arg11[%c0_259, %c0_260] : memref<2x32xf32, #tpu.memory_space<vmem>>, vector<2x32xf32>
    %620 = arith.truncf %619 : vector<2x32xf32> to vector<2x32xbf16>
    %cst_261 = arith.constant dense<0.000000e+00> : vector<2x128xf32>
    %621 = tpu.matmul %620, %15, %cst_261 {dimension_numbers = #tpu.dot_dimension_numbers<[1], [0], [0], [1], [0, 0, 1, 1], [], []>} : vector<2x32xbf16>, vector<32x128xbf16>, vector<2x128xf32> -> vector<2x128xf32>
    %622 = arith.addf %618, %621 : vector<2x128xf32>
    %c0_262 = arith.constant 0 : index
    %c0_263 = arith.constant 0 : index
    %623 = vector.load %arg12[%c0_262, %c0_263] : memref<2x32xf32, #tpu.memory_space<vmem>>, vector<2x32xf32>
    %624 = vector.extract_strided_slice %622 {offsets = [0, 0], sizes = [2, 32], strides = [1, 1]} : vector<2x128xf32> to vector<2x32xf32>
    %625 = arith.negf %624 : vector<2x32xf32>
    %626 = math.exp %625 : vector<2x32xf32>
    %cst_264 = arith.constant 1.000000e+00 : f32
    %627 = vector.broadcast %cst_264 : f32 to vector<2x32xf32>
    %628 = arith.addf %627, %626 : vector<2x32xf32>
    %629 = arith.divf %627, %628 : vector<2x32xf32>
    %630 = vector.extract_strided_slice %622 {offsets = [0, 32], sizes = [2, 32], strides = [1, 1]} : vector<2x128xf32> to vector<2x32xf32>
    %631 = arith.negf %630 : vector<2x32xf32>
    %632 = math.exp %631 : vector<2x32xf32>
    %cst_265 = arith.constant 1.000000e+00 : f32
    %633 = vector.broadcast %cst_265 : f32 to vector<2x32xf32>
    %634 = arith.addf %633, %632 : vector<2x32xf32>
    %635 = arith.divf %633, %634 : vector<2x32xf32>
    %636 = vector.extract_strided_slice %622 {offsets = [0, 64], sizes = [2, 32], strides = [1, 1]} : vector<2x128xf32> to vector<2x32xf32>
    %637 = math.tanh %636 : vector<2x32xf32>
    %638 = vector.extract_strided_slice %622 {offsets = [0, 96], sizes = [2, 32], strides = [1, 1]} : vector<2x128xf32> to vector<2x32xf32>
    %639 = arith.negf %638 : vector<2x32xf32>
    %640 = math.exp %639 : vector<2x32xf32>
    %cst_266 = arith.constant 1.000000e+00 : f32
    %641 = vector.broadcast %cst_266 : f32 to vector<2x32xf32>
    %642 = arith.addf %641, %640 : vector<2x32xf32>
    %643 = arith.divf %641, %642 : vector<2x32xf32>
    %644 = arith.mulf %635, %623 : vector<2x32xf32>
    %645 = arith.mulf %629, %637 : vector<2x32xf32>
    %646 = arith.addf %644, %645 : vector<2x32xf32>
    %647 = math.tanh %646 : vector<2x32xf32>
    %648 = arith.mulf %643, %647 : vector<2x32xf32>
    %c0_267 = arith.constant 0 : index
    %c0_268 = arith.constant 0 : index
    %649 = vector.load %arg11[%c0_267, %c0_268] : memref<2x32xf32, #tpu.memory_space<vmem>>, vector<2x32xf32>
    tpu.vector_store %arg11[%c0_267, %c0_268], %648 {strides = array<i32>} : memref<2x32xf32, #tpu.memory_space<vmem>>, vector<2x32xf32>,
    %c0_269 = arith.constant 0 : index
    %c0_270 = arith.constant 0 : index
    %650 = vector.load %arg12[%c0_269, %c0_270] : memref<2x32xf32, #tpu.memory_space<vmem>>, vector<2x32xf32>
    tpu.vector_store %arg12[%c0_269, %c0_270], %646 {strides = array<i32>} : memref<2x32xf32, #tpu.memory_space<vmem>>, vector<2x32xf32>,
    %651 = arith.truncf %648 : vector<2x32xf32> to vector<2x32xbf16>
    %652 = arith.index_cast %c7_i32_256 : i32 to index
    %c0_271 = arith.constant 0 : index
    %c0_272 = arith.constant 0 : index
    %653 = vector.load %arg9[%652, %c0_271, %c0_272] : memref<8x2x32xbf16, #tpu.memory_space<vmem>>, vector<1x2x32xbf16>
    %654 = vector.shape_cast %653 : vector<1x2x32xbf16> to vector<2x32xbf16>
    %655 = vector.shape_cast %651 : vector<2x32xbf16> to vector<1x2x32xbf16>
    tpu.vector_store %arg9[%652, %c0_271, %c0_272], %655 {strides = array<i32>} : memref<8x2x32xbf16, #tpu.memory_space<vmem>>, vector<1x2x32xbf16>,
    %c7_i32_273 = arith.constant 7 : i32
    %656 = arith.subi %c7_i32_273, %c7_i32_256 : i32
    %657 = arith.index_cast %656 : i32 to index
    %c0_274 = arith.constant 0 : index
    %c0_275 = arith.constant 0 : index
    %658 = vector.load %arg16[%657, %c0_274, %c0_275] : memref<8x2x128xf32, #tpu.memory_space<vmem>>, vector<1x2x128xf32>
    %659 = vector.shape_cast %658 : vector<1x2x128xf32> to vector<2x128xf32>
    %660 = vector.broadcast %18 : vector<1x128xf32> to vector<2x128xf32>
    %661 = arith.addf %659, %660 : vector<2x128xf32>
    %c0_276 = arith.constant 0 : index
    %c0_277 = arith.constant 0 : index
    %662 = vector.load %arg13[%c0_276, %c0_277] : memref<2x32xf32, #tpu.memory_space<vmem>>, vector<2x32xf32>
    %663 = arith.truncf %662 : vector<2x32xf32> to vector<2x32xbf16>
    %cst_278 = arith.constant dense<0.000000e+00> : vector<2x128xf32>
    %664 = tpu.matmul %663, %16, %cst_278 {dimension_numbers = #tpu.dot_dimension_numbers<[1], [0], [0], [1], [0, 0, 1, 1], [], []>} : vector<2x32xbf16>, vector<32x128xbf16>, vector<2x128xf32> -> vector<2x128xf32>
    %665 = arith.addf %661, %664 : vector<2x128xf32>
    %c0_279 = arith.constant 0 : index
    %c0_280 = arith.constant 0 : index
    %666 = vector.load %arg14[%c0_279, %c0_280] : memref<2x32xf32, #tpu.memory_space<vmem>>, vector<2x32xf32>
    %667 = vector.extract_strided_slice %665 {offsets = [0, 0], sizes = [2, 32], strides = [1, 1]} : vector<2x128xf32> to vector<2x32xf32>
    %668 = arith.negf %667 : vector<2x32xf32>
    %669 = math.exp %668 : vector<2x32xf32>
    %cst_281 = arith.constant 1.000000e+00 : f32
    %670 = vector.broadcast %cst_281 : f32 to vector<2x32xf32>
    %671 = arith.addf %670, %669 : vector<2x32xf32>
    %672 = arith.divf %670, %671 : vector<2x32xf32>
    %673 = vector.extract_strided_slice %665 {offsets = [0, 32], sizes = [2, 32], strides = [1, 1]} : vector<2x128xf32> to vector<2x32xf32>
    %674 = arith.negf %673 : vector<2x32xf32>
    %675 = math.exp %674 : vector<2x32xf32>
    %cst_282 = arith.constant 1.000000e+00 : f32
    %676 = vector.broadcast %cst_282 : f32 to vector<2x32xf32>
    %677 = arith.addf %676, %675 : vector<2x32xf32>
    %678 = arith.divf %676, %677 : vector<2x32xf32>
    %679 = vector.extract_strided_slice %665 {offsets = [0, 64], sizes = [2, 32], strides = [1, 1]} : vector<2x128xf32> to vector<2x32xf32>
    %680 = math.tanh %679 : vector<2x32xf32>
    %681 = vector.extract_strided_slice %665 {offsets = [0, 96], sizes = [2, 32], strides = [1, 1]} : vector<2x128xf32> to vector<2x32xf32>
    %682 = arith.negf %681 : vector<2x32xf32>
    %683 = math.exp %682 : vector<2x32xf32>
    %cst_283 = arith.constant 1.000000e+00 : f32
    %684 = vector.broadcast %cst_283 : f32 to vector<2x32xf32>
    %685 = arith.addf %684, %683 : vector<2x32xf32>
    %686 = arith.divf %684, %685 : vector<2x32xf32>
    %687 = arith.mulf %678, %666 : vector<2x32xf32>
    %688 = arith.mulf %672, %680 : vector<2x32xf32>
    %689 = arith.addf %687, %688 : vector<2x32xf32>
    %690 = math.tanh %689 : vector<2x32xf32>
    %691 = arith.mulf %686, %690 : vector<2x32xf32>
    %c0_284 = arith.constant 0 : index
    %c0_285 = arith.constant 0 : index
    %692 = vector.load %arg13[%c0_284, %c0_285] : memref<2x32xf32, #tpu.memory_space<vmem>>, vector<2x32xf32>
    tpu.vector_store %arg13[%c0_284, %c0_285], %691 {strides = array<i32>} : memref<2x32xf32, #tpu.memory_space<vmem>>, vector<2x32xf32>,
    %c0_286 = arith.constant 0 : index
    %c0_287 = arith.constant 0 : index
    %693 = vector.load %arg14[%c0_286, %c0_287] : memref<2x32xf32, #tpu.memory_space<vmem>>, vector<2x32xf32>
    tpu.vector_store %arg14[%c0_286, %c0_287], %689 {strides = array<i32>} : memref<2x32xf32, #tpu.memory_space<vmem>>, vector<2x32xf32>,
    %694 = arith.truncf %691 : vector<2x32xf32> to vector<2x32xbf16>
    %695 = arith.index_cast %656 : i32 to index
    %c0_288 = arith.constant 0 : index
    %c0_289 = arith.constant 0 : index
    %696 = vector.load %arg10[%695, %c0_288, %c0_289] : memref<8x2x32xbf16, #tpu.memory_space<vmem>>, vector<1x2x32xbf16>
    %697 = vector.shape_cast %696 : vector<1x2x32xbf16> to vector<2x32xbf16>
    %698 = vector.shape_cast %694 : vector<2x32xbf16> to vector<1x2x32xbf16>
    tpu.vector_store %arg10[%695, %c0_288, %c0_289], %698 {strides = array<i32>} : memref<8x2x32xbf16, #tpu.memory_space<vmem>>, vector<1x2x32xbf16>,
    %c8_i32 = arith.constant 8 : i32
    return
  }
  func.func @transform_0(%arg0: i32) -> (i32, i32, i32) {
    %c0_i32 = arith.constant 0 : i32
    %c0_i32_0 = arith.constant 0 : i32
    %c0_i32_1 = arith.constant 0 : i32
    return %arg0, %c0_i32, %c0_i32_0 : i32, i32, i32
  }
  func.func @transform_1(%arg0: i32) -> (i32, i32, i32) {
    %c1_i32 = arith.constant 1 : i32
    %0 = arith.subi %c1_i32, %arg0 : i32
    %c0_i32 = arith.constant 0 : i32
    %c0_i32_0 = arith.constant 0 : i32
    %c0_i32_1 = arith.constant 0 : i32
    return %0, %c0_i32, %c0_i32_0 : i32, i32, i32
  }
  func.func @transform_2(%arg0: i32) -> (i32, i32) {
    %c0_i32 = arith.constant 0 : i32
    %c0_i32_0 = arith.constant 0 : i32
    %c0_i32_1 = arith.constant 0 : i32
    return %c0_i32, %c0_i32_0 : i32, i32
  }
  func.func @transform_3(%arg0: i32) -> (i32, i32) {
    %c0_i32 = arith.constant 0 : i32
    %c0_i32_0 = arith.constant 0 : i32
    %c0_i32_1 = arith.constant 0 : i32
    return %c0_i32, %c0_i32_0 : i32, i32
  }
  func.func @transform_4(%arg0: i32) -> (i32, i32) {
    %c0_i32 = arith.constant 0 : i32
    %c0_i32_0 = arith.constant 0 : i32
    %c0_i32_1 = arith.constant 0 : i32
    return %c0_i32, %c0_i32_0 : i32, i32
  }
  func.func @transform_5(%arg0: i32) -> (i32, i32) {
    %c0_i32 = arith.constant 0 : i32
    %c0_i32_0 = arith.constant 0 : i32
    %c0_i32_1 = arith.constant 0 : i32
    return %c0_i32, %c0_i32_0 : i32, i32
  }
  func.func @transform_6(%arg0: i32) -> (i32, i32) {
    %c0_i32 = arith.constant 0 : i32
    %c0_i32_0 = arith.constant 0 : i32
    %c0_i32_1 = arith.constant 0 : i32
    return %c0_i32, %c0_i32_0 : i32, i32
  }
  func.func @transform_7(%arg0: i32) -> (i32, i32) {
    %c0_i32 = arith.constant 0 : i32
    %c0_i32_0 = arith.constant 0 : i32
    %c0_i32_1 = arith.constant 0 : i32
    return %c0_i32, %c0_i32_0 : i32, i32
  }
  func.func @transform_8(%arg0: i32) -> (i32, i32, i32) {
    %c0_i32 = arith.constant 0 : i32
    %c0_i32_0 = arith.constant 0 : i32
    %c0_i32_1 = arith.constant 0 : i32
    return %arg0, %c0_i32, %c0_i32_0 : i32, i32, i32
  }
  func.func @transform_9(%arg0: i32) -> (i32, i32, i32) {
    %c1_i32 = arith.constant 1 : i32
    %0 = arith.subi %c1_i32, %arg0 : i32
    %c0_i32 = arith.constant 0 : i32
    %c0_i32_0 = arith.constant 0 : i32
    %c0_i32_1 = arith.constant 0 : i32
    return %0, %c0_i32, %c0_i32_0 : i32, i32, i32
  }
}

</mosaic_0001>

<bundles_post_ra>
// kernel: tpu_custom_call.1
= control target key start
LH: loop header
LB: loop body
LE: loop exit
PB: predicated region body
PF: predicated region fallthrough
CT: control target
= control target key end

     0   :  { %15 = vsyncpa [#allocation9], 0  ;;  %s3153_s0 = inlined_call_operand.vmem [shape: bf16[16,2,8], index: 0, kind: input, shape index: {}]   ;;  %s3154_s1 = inlined_call_operand.vmem [shape: bf16[16,2,8], index: 1, kind: input, shape index: {}]   ;;  %s3155_s2 = inlined_call_operand.vmem [shape: bf16[8,128], index: 2, kind: input, shape index: {}]   ;;  %s3156_s3 = inlined_call_operand.vmem [shape: bf16[8,128], index: 3, kind: input, shape index: {}]   ;;  %s3157_s4 = inlined_call_operand.vmem [shape: bf16[32,128], index: 4, kind: input, shape index: {}]   ;;  %s3158_s5 = inlined_call_operand.vmem [shape: bf16[32,128], index: 5, kind: input, shape index: {}]   ;;  %s3159_s6 = inlined_call_operand.vmem [shape: f32[1,128], index: 6, kind: input, shape index: {}]   ;;  %s3160_s7 = inlined_call_operand.vmem [shape: f32[1,128], index: 7, kind: input, shape index: {}]   ;;  %s3161_s8 = inlined_call_operand.hbm [shape: bf16[16,2,32], index: 8, kind: output, shape index: {0}]   ;;  %s3162_s9 = inlined_call_operand.hbm [shape: bf16[16,2,32], index: 9, kind: output, shape index: {1}]  }
   0x1   :  { %17 = vsyncpa [#allocation9 + $0x1], 0 }
   0x2   :  { %18 = vsyncpa [#allocation11], 0 }
   0x3   :  { %20 = vsyncpa [#allocation11 + $0x1], 0  ;;  %s2551_s30 = smov 0   ;;  %s2553_s10 = smov 0  }
   0x4   :  { %s2555_s11 = smov 0   ;;  %s2557_s12 = smov 0  }
   0x5   :  { %s2559_s13 = smov 0   ;;  %s2561_s14 = smov 0  }
   0x6   :  { %s2563_s15 = smov 0  }
   0x7 LB: > { %3173 = sst [smem:[#allocation14_spill]] %s2469_s30  ;;  %s2587_s16 = sadd.s32 4294967295, %s2493_s15   ;;  %s2493_s15 = sphi %s2563_s15, %s3193_s15   ;;  %s2489_s14 = sphi %s2561_s14, %s3197_s14   ;;  %s2485_s13 = sphi %s2559_s13, %s3201_s13   ;;  %s2481_s12 = sphi %s2557_s12, %s3200_s12   ;;  %s2477_s11 = sphi %s2555_s11, %s3195_s11   ;;  %s2473_s10 = sphi %s2553_s10, %s3199_s10   ;;  %s2469_s30 = sphi %s2551_s30, %s3198_s30  }
   0x8   : > { %3174 = sst [smem:[#allocation15_spill]] %s2477_s11  ;;  %s2086_s17 = sadd.s32 4294967294, %s2493_s15  }
   0x9   : > { %3175 = sst [smem:[#allocation16_spill]] %s2481_s12  ;;  %s2591_s18 = sadd.s32 1, %s2493_s15  }
   0xa   : > { %3176 = sst [smem:[#allocation17_spill]] %s2489_s14  ;;  %s213_s19 = sadd.s32 1, %s2489_s14 }
   0xb   : > { %3177 = sst [smem:[#allocation18_spill]] %s2591_s18  ;;  %s210_s20 = ssub.s32 %s2493_s15, %s2591_s18 }
   0xc   : > { %p223_p0 = scmp.ne.s32.totalorder %s2489_s14, %s2485_s13  ;;  %p211_p1 = scmp.eq.s32.totalorder %s210_s20, 0 }
   0xd   : > { %p224_p2 = scmp.eq.s32.totalorder %s2587_s16, 1  ;;  %p229_p3 = scmp.ne.s32.totalorder %s2485_s13, %s2481_s12 }
   0xe   : > { %p2601_p4 = scmp.eq.s32.totalorder %s2086_s17, 1  ;;  %s236_s25 = ssub.s32 1, %s2493_s15 }
   0xf   : > { %s2606_s22 = scalar_select %p211_p1, %s2489_s14, %s213_s19  }
  0x10   : > { %p2610_p5 = por %p224_p2, %p223_p0  ;;  %p2616_p6 = por %p2601_p4, %p229_p3 }
  0x11   : > { %3179 = sst [smem:[#allocation19_spill]] %s2606_s22  ;;  %s237_s26 = ssub.s32 1, %s2591_s18 }
  0x12   : > { %s3181_s24 = scalar_select %p2616_p6, 1, 0 }
  0x13   : > { %s238_s27 = ssub.s32 %s236_s25, %s237_s26  ;;  %s241_s28 = sadd.s32 1, %s2477_s11 }
  0x14   : > { %3182 = sst [smem:[#allocation20_spill]] %s3181_s24  ;;  %p239_p7 = scmp.eq.s32.totalorder %s238_s27, 0 }
  0x15   : > { %p251_p8 = scmp.ne.s32.totalorder %s2477_s11, %s2473_s10  ;;  %p257_p9 = scmp.ne.s32.totalorder %s2473_s10, %s2469_s30 }
  0x16   : > { %p2089_p10 = scmp.ge.s32.totalorder %s2493_s15, 1  ;;  %p312_p13 = scmp.lt.s32.totalorder %s2493_s15, 3 }
  0x17   : > { %s2629_s29 = scalar_select %p239_p7, %s2477_s11, %s241_s28  }
  0x18   : > { %p2633_p11 = por %p251_p8, %p224_p2  ;;  %p2639_p12 = por %p257_p9, %p2601_p4 }
  0x19   : > { %3183 = sst [smem:[#allocation21_spill]] %s2629_s29  ;;  %p313_p0 = pnand %p2089_p10, %p312_p13 }
  0x1a   : > { %s3185_s19 = scalar_select %p2639_p12, 1, 0 }
  0x1b   : > { %316 = sbr.rel (%p313_p0) target bundleno = 4859 (0x12fb), region = 52  ;;  %s3168_s20 = sand.u32 (!%p313_p0), 1, %s2485_s13  }
  0x1c   : > { %3186 = sst [smem:[#allocation22_spill]] %s3185_s19  ;;  %s3169_s25 = sand.u32 (!%p313_p0), 1, %s2473_s10  }
  0x1d   : > { %s2090_s26 = sshll.u32 (!%p313_p0), %s3168_s20, 3  ;;  %s2091_s27 = sshll.u32 (!%p313_p0), %s3169_s25, 3 }
  0x1e   : > { %s2651_s21 = sshll.u32 (!%p313_p0), %s2587_s16, 3  ;;  %s362_s28 = ssub.s32 (!%p313_p0), 1, %s2587_s16 }
  0x1f   : > { %p358_p1 = scmp.lt.s32.totalorder (!%p313_p0), %s2651_s21, 15  ;;  %s2655_s22 = sshll.u32 (!%p313_p0), %s362_s28, 3 }
  0x20   : > { %p364_p2 = scmp.lt.s32.totalorder %s2655_s22, 15  ;;  %s2670_s24 = scalar_lea.vmem [#allocation8], %s2090_s26 }
  0x21   : > { %s359_s14 = scalar_select %p358_p1, %s2651_s21, 15 }
  0x22   : > { %s365_s29 = scalar_select %p364_p2, %s2655_s22, 15 }
  0x23   : > { %s2663_s19 = scalar_lea.vmem %s3153_s0, %s359_s14  ;;  %s2672_s12 = scalar_lea.vmem [#allocation10], %s2091_s27 }
  0x24   : > { %s2668_s30 = scalar_lea.vmem %s3154_s1, %s365_s29  ;;  %p2094_p3 = scmp.ne.s32.totalorder %s2587_s16, 0 }
  0x26   : > { %376 = sbr.rel (%p2094_p3) target bundleno = 48 (0x30), region = 56 }
  0x2b   : > { %vm377_vm0 = vcmask 254976   ;;  %v2495_v0 = vmov 0.0  }
  0x2c   : > { %378 = vst.msk [vmem:[#allocation2] sm:$0x3] %vm377_vm0, %v2495_v0 }
  0x2d   : > { %379 = vst.msk [vmem:[#allocation3] sm:$0x3] %vm377_vm0, %v2495_v0 }
  0x2e   : > { %380 = vst.msk [vmem:[#allocation4] sm:$0x3] %vm377_vm0, %v2495_v0 }
  0x2f   : > { %381 = vst.msk [vmem:[#allocation5] sm:$0x3] %vm377_vm0, %v2495_v0 }
  0x30 PF: > { %v2678_v1 = vld [vmem:[%s3157_s4 + $0x8] sm:$0xff]  ;;  %v390_v2 = vld [vmem:[%s3155_s2] sm:$0xf]  ;;  %vm418_vm1 = vcmask 1043456   ;;  %v386_v11 = vld [vmem:[%s2663_s19 + $0x4] sm:$0x1]  ;;  %s1964_s18 = scalar_lea.hbm %s3161_s8, %s2651_s21 }
  0x31   : > { %v420_v3 = vsel %vm418_vm1, %v390_v2, 0  ;;  %v382_v4 = vld [vmem:[%s2663_s19] sm:$0x1]  ;;  %571 = vmatpush.bf16.msra.mxu2 %v2678_v1  ;;  %v383_v6 = vld [vmem:[%s2663_s19 + $0x1] sm:$0x1]  ;;  %v2703_v14 = vld [vmem:[%s3158_s5 + $0x8] sm:$0xff] }
  0x32   : > { %429 = vmatpush.bf16.msra.mxu0 %v420_v3  ;;  %v2689_v5 = vld [vmem:[%s3157_s4] sm:$0xff]  ;;  %392 = vst [vmem:[#allocation1] ss:$9 sm:$0xff] %v382_v4  ;;  %vm561_vm2 = vcmask 261120   ;;  %674 = vmatpush.bf16.msra.mxu3 %v2703_v14  ;;  %vm415_vm3 = vcmask 64512   ;;  %s2497_s16 = smov 64  }
  0x33   : > { %v384_v7 = vld [vmem:[%s2663_s19 + $0x2] sm:$0x1]  ;;  %v385_v8 = vld [vmem:[%s2663_s19 + $0x3] sm:$0x1]  ;;  %v547_v9 = vld [vmem:[#allocation2] sm:$0x3] }
  0x34   : > { %v444_v10 = vld [vmem:[%s3156_s3] sm:$0xf]  ;;  %395 = vst [vmem:[#allocation1 + $0x1] ss:$9 sm:$0xff] %v383_v6  ;;  %v548_v12 = vpack.c.bf16 %v547_v9, %v547_v9  ;;  %v387_v15 = vld [vmem:[%s2663_s19 + $0x5] sm:$0x1] }
  0x35   : > { %v472_v13 = vsel %vm418_vm1, %v444_v10, 0  ;;  %572 = vmatpush.bf16.msra.mxu2 %v2689_v5  ;;  %398 = vst [vmem:[#allocation1 + $0x2] ss:$9 sm:$0xff] %v384_v7  ;;  %v388_v16 = vld [vmem:[%s2663_s19 + $0x6] sm:$0x1]  ;;  %s2498_s25 = smov 96  }
  0x36   : > { %760 = vmatpush.bf16.msrb.mxu0 %v2678_v1  ;;  %481 = vmatpush.bf16.msra.mxu1 %v472_v13  ;;  %401 = vst [vmem:[#allocation1 + $0x3] ss:$9 sm:$0xff] %v385_v8  ;;  %v389_v17 = vld [vmem:[%s2663_s19 + $0x7] sm:$0x1]  ;;  %v651_v19 = vld [vmem:[#allocation4] sm:$0x3] }
  0x37   : > { %404 = vst [vmem:[#allocation1 + $0x4] ss:$9 sm:$0xff] %v386_v11  ;;  %v2717_v18 = vld [vmem:[%s3158_s5] sm:$0xff]  ;;  %v579_v20 = vld [vmem:[#allocation3] sm:$0x3]  ;;  %v652_v21 = vpack.c.bf16 %v651_v19, %v651_v19  ;;  %s2496_s19 = smov 32  }
  0x38   : > { %407 = vst [vmem:[#allocation1 + $0x5] ss:$9 sm:$0xff] %v387_v15  ;;  %2105 = vmatmul.msk.bf16.vlgmr.msra.gmra.mxu2 %vm561_vm2, %v548_v12  ;;  %675 = vmatpush.bf16.msra.mxu3 %v2717_v18  ;;  %v436_v22 = vld [vmem:[%s2668_s30] sm:$0x1]  ;;  %v682_v23 = vld [vmem:[#allocation5] sm:$0x3] }
  0x39   : > { %932 = vmatpush.bf16.msrb.mxu2 %v2678_v1  ;;  %410 = vst [vmem:[#allocation1 + $0x6] ss:$9 sm:$0xff] %v388_v16  ;;  %601 = vrot.lane.b32.xlu1 %v579_v20, %s2496_s19  ;;  %v437_v24 = vld [vmem:[%s2668_s30 + $0x1] sm:$0x1]  ;;  %v438_v26 = vld [vmem:[%s2668_s30 + $0x2] sm:$0x1] }
  0x3a   : > { %761 = vmatpush.bf16.msrb.mxu0 %v2689_v5  ;;  %846 = vmatpush.bf16.msrb.mxu1 %v2703_v14  ;;  %413 = vst [vmem:[#allocation1 + $0x7] ss:$9 sm:$0xff] %v389_v17  ;;  %v439_v27 = vld [vmem:[%s2668_s30 + $0x3] sm:$0x1]  ;;  %v440_v28 = vld [vmem:[%s2668_s30 + $0x4] sm:$0x1] }
  0x3b   : > { %2115 = vmatmul.msk.bf16.vlgmr.msra.gmra.mxu3 %vm561_vm2, %v652_v21  ;;  %v441_v29 = vld [vmem:[%s2668_s30 + $0x5] sm:$0x1]  ;;  %v442_v30 = vld [vmem:[%s2668_s30 + $0x6] sm:$0x1]  ;;  %v443_v31 = vld [vmem:[%s2668_s30 + $0x7] sm:$0x1] }
  0x3c   : > { %1018 = vmatpush.bf16.msrb.mxu3 %v2703_v14  ;;  %v2748_v40 = vld [vmem:[%s3159_s6] ss:$0 sm:$0xff]  ;;  %vm625_vm12 = vcmask 254976   ;;  %s3074_s29 = sshll.u32 %s1964_s18, 4  ;;  %s1982_s26 = sshll.u32 %s2672_s12, 4  ;;  %s1968_s29 = int_to_ptr.hbm [resolvable:$true] %s3074_s29  ;;  %s3087_s26 = int_to_ptr.vmem [resolvable:$true] %s1982_s26 }
  0x3d   : > { %933 = vmatpush.bf16.msrb.mxu2 %v2689_v5  ;;  %v2755_v58 = vld [vmem:[%s3160_s7] ss:$0 sm:$0xff]  ;;  %s3187_s21 = sand.u32 1, %s2485_s13   ;;  %s2389_s11 = sshra.s32 %s1968_s29, 4  ;;  %s2390_s11 = int_to_ptr.hbm [resolvable:$true] %s2389_s11 }
  0x3e   : > { %847 = vmatpush.bf16.msrb.mxu1 %v2717_v18  ;;  %s1949_s28 = scalar_lea.sflag [#allocation9], %s3187_s21  ;;  %s2391_s14 = scalar_lea.hbm %s2390_s11, 8 }
  0x3f   : > { %p2392_p4 = scmp.ne.s32.totalorder %s2390_s11, %s2391_s14  ;;  %s2395_s18 = scalar_lea.hbm %s3161_s8, 16 }
  0x40   : > { %1019 = vmatpush.bf16.msrb.mxu3 %v2717_v18  ;;  %p2396_p9 = scmp.lt.s32.totalorder %s2390_s11, %s3161_s8  ;;  %p2397_p10 = scmp.lt.s32.totalorder %s2395_s18, %s2391_s14 }
  0x41   : > { %1276 = vmatpush.bf16.msra.mxu2 %v2678_v1  ;;  %v414_v25 = vld [vmem:[#allocation1] sm:$0xff]  ;;  %704 = vrot.lane.b32.xlu1 %v682_v23, %s2496_s19  ;;  %p2393_p7 = pnand %p2392_p4, %p2610_p5 }
  0x42   : > { %2095 = vmatmul.msk.bf16.vlgmr.msra.gmra.mxu0 %vm415_vm3, %v414_v25  ;;  %446 = vst [vmem:[#allocation1] ss:$9 sm:$0xff] %v436_v22  ;;  %p2398_p13 = por %p2397_p10, %p2396_p9 }
  0x43   : > { %449 = vst [vmem:[#allocation1 + $0x1] ss:$9 sm:$0xff] %v437_v24  ;;  %1104 = vmatpush.bf16.msra.mxu0 %v2678_v1  ;;  %p2394_p8 = pneg %p2393_p7 }
  0x44   : > { %1362 = vmatpush.bf16.msra.mxu3 %v2703_v14  ;;  %452 = vst [vmem:[#allocation1 + $0x2] ss:$9 sm:$0xff] %v438_v26 }
  0x45   : > { %1277 = vmatpush.bf16.msra.mxu2 %v2689_v5  ;;  %455 = vst [vmem:[#allocation1 + $0x3] ss:$9 sm:$0xff] %v439_v27  ;;  %p2399_p0 = pnand %p2398_p13, %p2394_p8 }
  0x46   : > { %458 = vst [vmem:[#allocation1 + $0x4] ss:$9 sm:$0xff] %v440_v28 }
  0x47   : > { %461 = vst [vmem:[#allocation1 + $0x5] ss:$9 sm:$0xff] %v441_v29  ;;  %1105 = vmatpush.bf16.msra.mxu0 %v2689_v5 }
  0x48   : > { %1363 = vmatpush.bf16.msra.mxu3 %v2717_v18  ;;  %464 = vst [vmem:[#allocation1 + $0x6] ss:$9 sm:$0xff] %v442_v30 }
  0x49   : > { %467 = vst [vmem:[#allocation1 + $0x7] ss:$9 sm:$0xff] %v443_v31 }
  0x50   : > { %v468_v32 = vld [vmem:[#allocation1] sm:$0xff] }
  0x51   : > { %2096 = vmatmul.msk.bf16.vlgmr.msra.gmra.mxu1 %vm415_vm3, %v468_v32 }
  0x52   : > { %1190 = vmatpush.bf16.msra.mxu1 %v2703_v14 }
  0x56   : > { %1191 = vmatpush.bf16.msra.mxu1 %v2717_v18 }
  0xbb   : > { %v574_v33 = vpop.f32.mrf.mxu2 }
  0xbe   : > { %v677_v38 = vpop.f32.mrf.mxu3 }
  0xbf   : > { %v431_v34 = vpop.f32.mrf.mxu0 }
  0xc0   : > { %v490_v35 = vrot.slane %v431_v34, 2  ;;  %v491_v36 = vrot.slane %v431_v34, 4  ;;  %v492_v37 = vrot.slane %v431_v34, 6  ;;  %502 = vst [vmem:[#allocation6] sm:$0x3] %v431_v34 }
  0xc2   : > { %503 = vst [vmem:[#allocation6 + $0x2] sm:$0x3] %v490_v35 }
  0xc3   : > { %504 = vst [vmem:[#allocation6 + $0x4] sm:$0x3] %v491_v36  ;;  %v576_v39 = vpop.f32.mrf.mxu2 }
  0xc4   : > { %505 = vst [vmem:[#allocation6 + $0x6] sm:$0x3] %v492_v37 }
  0xc6   : > { %v679_v48 = vpop.f32.mrf.mxu3 }
  0xc7   : > { %v542_v41 = vld [vmem:[#allocation6] sm:$0x3]  ;;  %v433_v42 = vpop.f32.mrf.mxu0 }
  0xc8   : > { %v546_v43 = vadd.f32 %v2748_v40, %v542_v41  ;;  %v493_v44 = vrot.slane %v433_v42, 2  ;;  %v494_v45 = vrot.slane %v433_v42, 4  ;;  %v495_v46 = vrot.slane %v433_v42, 6  ;;  %506 = vst [vmem:[#allocation6 + $0x8] sm:$0x3] %v433_v42 }
  0xca   : > { %v578_v47 = vadd.f32 %v574_v33, %v546_v43  ;;  %507 = vst [vmem:[#allocation6 + $0xa] sm:$0x3] %v493_v44  ;;  %v602_v33 = vpop.permute.xlu1 %601 }
  0xcb   : > { %508 = vst [vmem:[#allocation6 + $0xc] sm:$0x3] %v494_v45 }
  0xcc   : > { %2245 = vtanh.f32 %v578_v47  ;;  %509 = vst [vmem:[#allocation6 + $0xe] sm:$0x3] %v495_v46  ;;  %v2106_v63 = vmul.f32 -1.442695, %v578_v47 }
  0xce   : > { %v483_v49 = vpop.f32.mrf.mxu1 }
  0xcf   : > { %v512_v50 = vrot.slane %v483_v49, 2  ;;  %v513_v51 = vrot.slane %v483_v49, 4  ;;  %v514_v52 = vrot.slane %v483_v49, 6  ;;  %524 = vst [vmem:[#allocation7] sm:$0x3] %v483_v49 }
  0xd1   : > { %525 = vst [vmem:[#allocation7 + $0x2] sm:$0x3] %v512_v50 }
  0xd2   : > { %v2246_v53 = vpop.eup %2245  ;;  %526 = vst [vmem:[#allocation7 + $0x4] sm:$0x3] %v513_v51 }
  0xd3   : > { %527 = vst [vmem:[#allocation7 + $0x6] sm:$0x3] %v514_v52  ;;  %606 = vrot.lane.b32.xlu0 %v2246_v53, %s2497_s16 }
  0xd6   : > { %v485_v54 = vpop.f32.mrf.mxu1 }
  0xd7   : > { %v515_v55 = vrot.slane %v485_v54, 2  ;;  %v516_v56 = vrot.slane %v485_v54, 4  ;;  %v517_v57 = vrot.slane %v485_v54, 6  ;;  %528 = vst [vmem:[#allocation7 + $0x8] sm:$0x3] %v485_v54 }
  0xd9   : > { %529 = vst [vmem:[#allocation7 + $0xa] sm:$0x3] %v515_v55 }
  0xda   : > { %530 = vst [vmem:[#allocation7 + $0xc] sm:$0x3] %v516_v56 }
  0xdb   : > { %531 = vst [vmem:[#allocation7 + $0xe] sm:$0x3] %v517_v57  ;;  %v747_v57 = vld [vmem:[#allocation6 + $0x2] sm:$0x3] }
  0xe2   : > { %v646_v59 = vld [vmem:[#allocation7 + $0xe] sm:$0x3] }
  0xe3   : > { %v650_v60 = vadd.f32 %v2755_v58, %v646_v59  ;;  %v748_v59 = vadd.f32 %v2748_v40, %v747_v57 }
  0xe5   : > { %v681_v61 = vadd.f32 %v677_v38, %v650_v60  ;;  %v705_v38 = vpop.permute.xlu1 %704 }
  0xe7   : > { %2247 = vtanh.f32 %v681_v61  ;;  %v2116_v6 = vmul.f32 -1.442695, %v681_v61 }
  0xe8   : > { %2249 = vpow2.f32 %v2106_v63 }
  0xed   : > { %v2248_v62 = vpop.eup %2247 }
  0xee   : > { %709 = vrot.lane.b32.xlu0 %v2248_v62, %s2497_s16  ;;  %v2250_v0 = vpop.eup %2249 }
  0xef   : > { %v583_v2 = vadd.f32 1.0, %v2250_v0 }
  0xf1   : > { %2251 = vrcp.f32 %v583_v2  ;;  %v595_v11 = vand.u32 2147483648, %v583_v2  ;;  %vm589_vm5 = vweird.f32 %v583_v2  ;;  %v593_v13 = vand.u32 2147483647, %v583_v2 }
  0xf2   : > { %2253 = vpow2.f32 %v2116_v6 }
  0xf3   : > { %v596_v16 = vor.u32 1.1754944e-38, %v595_v11  ;;  %vm594_vm7 = vcmp.eq.f32.partialorder %v593_v13, 8.507059e+37 }
  0xf7   : > { %v2252_v3 = vpop.eup %2251 }
  0xf8   : > { %v585_v4 = vmul.f32 %v2252_v3, %v583_v2  ;;  %v2254_v9 = vpop.eup %2253  ;;  %vm590_vm4 = vweird.f32 %v2252_v3  ;;  %v833_v2 = vld [vmem:[#allocation7 + $0xc] sm:$0x3] }
  0xf9   : > { %v686_v12 = vadd.f32 1.0, %v2254_v9  ;;  %vm591_vm6 = vmor %vm589_vm5, %vm590_vm4 }
  0xfa   : > { %v586_v7 = vsub.f32 1.0, %v585_v4 }
  0xfb   : > { %2255 = vrcp.f32 %v686_v12  ;;  %v698_v26 = vand.u32 2147483648, %v686_v12  ;;  %vm692_vm9 = vweird.f32 %v686_v12  ;;  %v696_v27 = vand.u32 2147483647, %v686_v12 }
  0xfc   : > { %v587_v8 = vmul.f32 %v2252_v3, %v586_v7 }
  0xfd   : > { %v699_v29 = vor.u32 1.1754944e-38, %v698_v26  ;;  %vm697_vm11 = vcmp.eq.f32.partialorder %v696_v27, 8.507059e+37 }
  0xfe   : > { %v588_v10 = vadd.f32 %v2252_v3, %v587_v8 }
 0x100   : > { %v592_v15 = vsel %vm591_vm6, %v2252_v3, %v588_v10  ;;  %v834_v3 = vadd.f32 %v2755_v58, %v833_v2 }
 0x101   : > { %v597_v17 = vsel %vm594_vm7, %v596_v16, %v592_v15  ;;  %v2256_v21 = vpop.eup %2255 }
 0x102   : > { %v688_v22 = vmul.f32 %v2256_v21, %v686_v12  ;;  %vm693_vm8 = vweird.f32 %v2256_v21  ;;  %v604_v34 = vmul.f32 %v602_v33, %v597_v17 }
 0x103   : > { %vm694_vm10 = vmor %vm692_vm9, %vm693_vm8 }
 0x104   : > { %v689_v23 = vsub.f32 1.0, %v688_v22 }
 0x106   : > { %v690_v24 = vmul.f32 %v2256_v21, %v689_v23 }
 0x108   : > { %v691_v25 = vadd.f32 %v2256_v21, %v690_v24 }
 0x10a   : > { %v695_v28 = vsel %vm694_vm10, %v2256_v21, %v691_v25 }
 0x10b   : > { %v700_v30 = vsel %vm697_vm11, %v699_v29, %v695_v28 }
 0x10c   : > { %v707_v39 = vmul.f32 %v705_v38, %v700_v30 }
 0x145   : > { %v607_v19 = vpop.permute.xlu0 %606 }
 0x146   : > { %v609_v20 = vmul.f32 %v607_v19, %v597_v17 }
 0x148   : > { %611 = vrot.lane.b32.xlu2 %v609_v20, %s2496_s19 }
 0x160   : > { %v710_v31 = vpop.permute.xlu0 %709 }
 0x161   : > { %v712_v32 = vmul.f32 %v710_v31, %v700_v30 }
 0x163   : > { %714 = vrot.lane.b32.xlu2 %v712_v32, %s2496_s19 }
 0x1a2   : > { %v612_v35 = vpop.permute.xlu2 %611 }
 0x1a3   : > { %v614_v36 = vadd.f32 %v612_v35, %v604_v34 }
 0x1a5   : > { %2257 = vtanh.f32 %v614_v36 }
 0x1ab   : > { %v2258_v37 = vpop.eup %2257 }
 0x1ac   : > { %617 = vrot.lane.b32.xlu0 %v2258_v37, %s2497_s16 }
 0x1bd   : > { %v715_v41 = vpop.permute.xlu2 %714 }
 0x1be   : > { %v717_v42 = vadd.f32 %v715_v41, %v707_v39 }
 0x1c0   : > { %2259 = vtanh.f32 %v717_v42 }
 0x1c6   : > { %v2260_v43 = vpop.eup %2259 }
 0x1c7   : > { %720 = vrot.lane.b32.xlu1 %v2260_v43, %s2497_s16 }
 0x1cf   : > { %628 = vrot.lane.b32.xlu1 %v614_v36, %s2498_s25 }
 0x21e   : > { %v618_v44 = vpop.permute.xlu0 %617 }
 0x21f   : > { %v2764_v45 = vmul.f32 %v618_v44, %v597_v17 }
 0x221   : > { %622 = vrot.lane.b32.xlu2 %v2764_v45, %s2496_s19 }
 0x229   : > { %730 = vrot.lane.b32.xlu2 %v717_v42, %s2498_s25 }
 0x239   : > { %v721_v46 = vpop.permute.xlu1 %720 }
 0x23a   : > { %v2769_v47 = vmul.f32 %v721_v46, %v700_v30 }
 0x23c   : > { %725 = vrot.lane.b32.xlu0 %v2769_v47, %s2496_s19 }
 0x241   : > { %v629_v48 = vpop.permute.xlu1 %628 }
 0x242   : > { %631 = vst.msk [vmem:[#allocation3] sm:$0x3] %vm625_vm12, %v629_v48 }
 0x249   : > { %v768_v49 = vld [vmem:[#allocation3] sm:$0x3] }
 0x24a   : > { %790 = vrot.lane.b32.xlu2 %v768_v49, %s2496_s19 }
 0x27b   : > { %v623_v50 = vpop.permute.xlu2 %622 }
 0x27c   : > { %626 = vst.msk [vmem:[#allocation2] sm:$0x3] %vm625_vm12, %v623_v50 }
 0x283   : > { %v731_v51 = vpop.permute.xlu2 %730  ;;  %v749_v52 = vld [vmem:[#allocation2] sm:$0x3] }
 0x284   : > { %733 = vst.msk [vmem:[#allocation5] sm:$0x3] %vm625_vm12, %v731_v51  ;;  %v750_v53 = vpack.c.bf16 %v749_v52, %v749_v52 }
 0x286   : > { %2118 = vmatmul.msk.bf16.vlgmr.msrb.gmra.mxu0 %vm561_vm2, %v750_v53 }
 0x287   : > { %1448 = vmatpush.bf16.msrb.mxu0 %v2678_v1 }
 0x28b   : > { %1449 = vmatpush.bf16.msrb.mxu0 %v2689_v5  ;;  %v854_v0 = vld [vmem:[#allocation5] sm:$0x3] }
 0x2a4   : > { %v791_v42 = vpop.permute.xlu2 %790 }
 0x2ae   : > { %v726_v54 = vpop.permute.xlu0 %725 }
 0x2af   : > { %728 = vst.msk [vmem:[#allocation4] sm:$0x3] %vm625_vm12, %v726_v54 }
 0x2b6   : > { %v835_v55 = vld [vmem:[#allocation4] sm:$0x3] }
 0x2b7   : > { %v836_v56 = vpack.c.bf16 %v835_v55, %v835_v55 }
 0x2b9   : > { %2121 = vmatmul.msk.bf16.vlgmr.msrb.gmra.mxu1 %vm561_vm2, %v836_v56 }
 0x2ba   : > { %1534 = vmatpush.bf16.msrb.mxu1 %v2703_v14 }
 0x2be   : > { %1535 = vmatpush.bf16.msrb.mxu1 %v2717_v18 }
 0x303   : > { %v763_v60 = vpop.f32.mrf.mxu0 }
 0x304   : > { %v767_v61 = vadd.f32 %v763_v60, %v748_v59 }
 0x306   : > { %2261 = vtanh.f32 %v767_v61  ;;  %v2119_v9 = vmul.f32 -1.442695, %v767_v61 }
 0x30b   : > { %v765_v62 = vpop.f32.mrf.mxu0 }
 0x30c   : > { %v2262_v63 = vpop.eup %2261 }
 0x30d   : > { %795 = vrot.lane.b32.xlu0 %v2262_v63, %s2497_s16 }
 0x315   : > { %876 = vrot.lane.b32.xlu0 %v854_v0, %s2496_s19 }
 0x336   : > { %v849_v4 = vpop.f32.mrf.mxu1 }
 0x337   : > { %v853_v6 = vadd.f32 %v849_v4, %v834_v3 }
 0x339   : > { %2263 = vtanh.f32 %v853_v6  ;;  %v2122_v26 = vmul.f32 -1.442695, %v853_v6  ;;  %v919_v6 = vld [vmem:[#allocation6 + $0x4] sm:$0x3] }
 0x33a   : > { %2265 = vpow2.f32 %v2119_v9 }
 0x33e   : > { %v851_v7 = vpop.f32.mrf.mxu1 }
 0x33f   : > { %v2264_v8 = vpop.eup %2263  ;;  %v920_v7 = vadd.f32 %v2748_v40, %v919_v6 }
 0x340   : > { %881 = vrot.lane.b32.xlu1 %v2264_v8, %s2497_s16  ;;  %v2266_v10 = vpop.eup %2265 }
 0x341   : > { %v772_v11 = vadd.f32 1.0, %v2266_v10 }
 0x343   : > { %2267 = vrcp.f32 %v772_v11  ;;  %v784_v19 = vand.u32 2147483648, %v772_v11  ;;  %vm778_vm14 = vweird.f32 %v772_v11  ;;  %v782_v20 = vand.u32 2147483647, %v772_v11 }
 0x344   : > { %2269 = vpow2.f32 %v2122_v26 }
 0x345   : > { %v785_v22 = vor.u32 1.1754944e-38, %v784_v19  ;;  %vm783_vm0 = vcmp.eq.f32.partialorder %v782_v20, 8.507059e+37 }
 0x349   : > { %v2268_v12 = vpop.eup %2267 }
 0x34a   : > { %v774_v13 = vmul.f32 %v2268_v12, %v772_v11  ;;  %vm779_vm13 = vweird.f32 %v2268_v12  ;;  %v2270_v27 = vpop.eup %2269 }
 0x34b   : > { %vm780_vm15 = vmor %vm778_vm14, %vm779_vm13  ;;  %v858_v28 = vadd.f32 1.0, %v2270_v27 }
 0x34c   : > { %v775_v15 = vsub.f32 1.0, %v774_v13  ;;  %v1005_v13 = vld [vmem:[#allocation7 + $0xa] sm:$0x3] }
 0x34d   : > { %2271 = vrcp.f32 %v858_v28  ;;  %v870_v34 = vand.u32 2147483648, %v858_v28  ;;  %vm864_vm3 = vweird.f32 %v858_v28  ;;  %v868_v35 = vand.u32 2147483647, %v858_v28 }
 0x34e   : > { %v776_v16 = vmul.f32 %v2268_v12, %v775_v15  ;;  %v1006_v15 = vadd.f32 %v2755_v58, %v1005_v13 }
 0x34f   : > { %v871_v37 = vor.u32 1.1754944e-38, %v870_v34  ;;  %vm869_vm5 = vcmp.eq.f32.partialorder %v868_v35, 8.507059e+37 }
 0x350   : > { %v777_v17 = vadd.f32 %v2268_v12, %v776_v16 }
 0x352   : > { %v781_v21 = vsel %vm780_vm15, %v2268_v12, %v777_v17 }
 0x353   : > { %v786_v24 = vsel %vm783_vm0, %v785_v22, %v781_v21  ;;  %v2272_v29 = vpop.eup %2271 }
 0x354   : > { %v860_v30 = vmul.f32 %v2272_v29, %v858_v28  ;;  %vm865_vm1 = vweird.f32 %v2272_v29  ;;  %v793_v43 = vmul.f32 %v791_v42, %v786_v24 }
 0x355   : > { %vm866_vm4 = vmor %vm864_vm3, %vm865_vm1 }
 0x356   : > { %v861_v31 = vsub.f32 1.0, %v860_v30 }
 0x358   : > { %v862_v32 = vmul.f32 %v2272_v29, %v861_v31 }
 0x35a   : > { %v863_v33 = vadd.f32 %v2272_v29, %v862_v32 }
 0x35c   : > { %v867_v36 = vsel %vm866_vm4, %v2272_v29, %v863_v33 }
 0x35d   : > { %v872_v38 = vsel %vm869_vm5, %v871_v37, %v867_v36 }
 0x37f   : > { %v796_v23 = vpop.permute.xlu0 %795 }
 0x380   : > { %v798_v25 = vmul.f32 %v796_v23, %v786_v24 }
 0x382   : > { %800 = vrot.lane.b32.xlu1 %v798_v25, %s2496_s19 }
 0x387   : > { %v877_v49 = vpop.permute.xlu0 %876 }
 0x388   : > { %v879_v50 = vmul.f32 %v877_v49, %v872_v38 }
 0x3b2   : > { %v882_v39 = vpop.permute.xlu1 %881 }
 0x3b3   : > { %v884_v41 = vmul.f32 %v882_v39, %v872_v38 }
 0x3b5   : > { %886 = vrot.lane.b32.xlu2 %v884_v41, %s2496_s19 }
 0x3f4   : > { %v801_v44 = vpop.permute.xlu1 %800 }
 0x3f5   : > { %v803_v46 = vadd.f32 %v801_v44, %v793_v43 }
 0x3f7   : > { %2273 = vtanh.f32 %v803_v46 }
 0x3fd   : > { %v2274_v48 = vpop.eup %2273 }
 0x3fe   : > { %806 = vrot.lane.b32.xlu0 %v2274_v48, %s2497_s16 }
 0x40f   : > { %v887_v51 = vpop.permute.xlu2 %886 }
 0x410   : > { %v889_v52 = vadd.f32 %v887_v51, %v879_v50 }
 0x412   : > { %2275 = vtanh.f32 %v889_v52 }
 0x418   : > { %v2276_v53 = vpop.eup %2275 }
 0x419   : > { %892 = vrot.lane.b32.xlu1 %v2276_v53, %s2497_s16 }
 0x421   : > { %816 = vrot.lane.b32.xlu1 %v803_v46, %s2498_s25 }
 0x470   : > { %v807_v54 = vpop.permute.xlu0 %806 }
 0x471   : > { %v2794_v55 = vmul.f32 %v807_v54, %v786_v24 }
 0x473   : > { %811 = vrot.lane.b32.xlu2 %v2794_v55, %s2496_s19 }
 0x47b   : > { %902 = vrot.lane.b32.xlu2 %v889_v52, %s2498_s25 }
 0x48b   : > { %v893_v56 = vpop.permute.xlu1 %892 }
 0x48c   : > { %v2799_v57 = vmul.f32 %v893_v56, %v872_v38 }
 0x48e   : > { %897 = vrot.lane.b32.xlu0 %v2799_v57, %s2496_s19 }
 0x493   : > { %v817_v59 = vpop.permute.xlu1 %816 }
 0x494   : > { %819 = vst.msk [vmem:[#allocation3] sm:$0x3] %vm625_vm12, %v817_v59 }
 0x49b   : > { %v940_v60 = vld [vmem:[#allocation3] sm:$0x3] }
 0x49c   : > { %962 = vrot.lane.b32.xlu2 %v940_v60, %s2496_s19 }
 0x4cd   : > { %v812_v61 = vpop.permute.xlu2 %811 }
 0x4ce   : > { %814 = vst.msk [vmem:[#allocation2] sm:$0x3] %vm625_vm12, %v812_v61 }
 0x4d5   : > { %v903_v62 = vpop.permute.xlu2 %902  ;;  %v921_v63 = vld [vmem:[#allocation2] sm:$0x3] }
 0x4d6   : > { %905 = vst.msk [vmem:[#allocation5] sm:$0x3] %vm625_vm12, %v903_v62  ;;  %v922_v0 = vpack.c.bf16 %v921_v63, %v921_v63 }
 0x4d8   : > { %2124 = vmatmul.msk.bf16.vlgmr.msrb.gmra.mxu2 %vm561_vm2, %v922_v0 }
 0x4d9   : > { %1620 = vmatpush.bf16.msrb.mxu2 %v2678_v1 }
 0x4dd   : > { %1621 = vmatpush.bf16.msrb.mxu2 %v2689_v5  ;;  %v1026_v12 = vld [vmem:[#allocation5] sm:$0x3] }
 0x4f6   : > { %v963_v54 = vpop.permute.xlu2 %962 }
 0x500   : > { %v898_v2 = vpop.permute.xlu0 %897 }
 0x501   : > { %900 = vst.msk [vmem:[#allocation4] sm:$0x3] %vm625_vm12, %v898_v2 }
 0x508   : > { %v1007_v3 = vld [vmem:[#allocation4] sm:$0x3] }
 0x509   : > { %v1008_v4 = vpack.c.bf16 %v1007_v3, %v1007_v3 }
 0x50b   : > { %2127 = vmatmul.msk.bf16.vlgmr.msrb.gmra.mxu3 %vm561_vm2, %v1008_v4 }
 0x50c   : > { %1706 = vmatpush.bf16.msrb.mxu3 %v2703_v14 }
 0x510   : > { %1707 = vmatpush.bf16.msrb.mxu3 %v2717_v18 }
 0x55b   : > { %v935_v8 = vpop.f32.mrf.mxu2 }
 0x55c   : > { %v939_v9 = vadd.f32 %v935_v8, %v920_v7 }
 0x55e   : > { %2277 = vtanh.f32 %v939_v9  ;;  %v2125_v21 = vmul.f32 -1.442695, %v939_v9 }
 0x563   : > { %v937_v10 = vpop.f32.mrf.mxu2 }
 0x564   : > { %v2278_v11 = vpop.eup %2277 }
 0x565   : > { %967 = vrot.lane.b32.xlu0 %v2278_v11, %s2497_s16 }
 0x56d   : > { %1048 = vrot.lane.b32.xlu0 %v1026_v12, %s2496_s19 }
 0x58e   : > { %v1021_v16 = vpop.f32.mrf.mxu3 }
 0x58f   : > { %v1025_v17 = vadd.f32 %v1021_v16, %v1006_v15 }
 0x591   : > { %2279 = vtanh.f32 %v1025_v17  ;;  %v2128_v36 = vmul.f32 -1.442695, %v1025_v17 }
 0x592   : > { %2281 = vpow2.f32 %v2125_v21 }
 0x596   : > { %v1023_v19 = vpop.f32.mrf.mxu3 }
 0x597   : > { %v2280_v20 = vpop.eup %2279 }
 0x598   : > { %1053 = vrot.lane.b32.xlu1 %v2280_v20, %s2497_s16  ;;  %v2282_v22 = vpop.eup %2281  ;;  %v1091_v20 = vld [vmem:[#allocation6 + $0x6] sm:$0x3] }
 0x599   : > { %v944_v23 = vadd.f32 1.0, %v2282_v22  ;;  %v1092_v21 = vadd.f32 %v2748_v40, %v1091_v20 }
 0x59b   : > { %2283 = vrcp.f32 %v944_v23  ;;  %v956_v29 = vand.u32 2147483648, %v944_v23  ;;  %vm950_vm7 = vweird.f32 %v944_v23  ;;  %v954_v30 = vand.u32 2147483647, %v944_v23 }
 0x59c   : > { %2285 = vpow2.f32 %v2128_v36 }
 0x59d   : > { %v957_v32 = vor.u32 1.1754944e-38, %v956_v29  ;;  %vm955_vm9 = vcmp.eq.f32.partialorder %v954_v30, 8.507059e+37 }
 0x5a1   : > { %v2284_v24 = vpop.eup %2283 }
 0x5a2   : > { %v946_v25 = vmul.f32 %v2284_v24, %v944_v23  ;;  %vm951_vm6 = vweird.f32 %v2284_v24  ;;  %v2286_v37 = vpop.eup %2285 }
 0x5a3   : > { %vm952_vm8 = vmor %vm950_vm7, %vm951_vm6  ;;  %v1030_v38 = vadd.f32 1.0, %v2286_v37 }
 0x5a4   : > { %v947_v26 = vsub.f32 1.0, %v946_v25  ;;  %v1177_v25 = vld [vmem:[#allocation7 + $0x8] sm:$0x3] }
 0x5a5   : > { %2287 = vrcp.f32 %v1030_v38  ;;  %v1042_v46 = vand.u32 2147483648, %v1030_v38  ;;  %vm1036_vm11 = vweird.f32 %v1030_v38  ;;  %v1040_v48 = vand.u32 2147483647, %v1030_v38 }
 0x5a6   : > { %v948_v27 = vmul.f32 %v2284_v24, %v947_v26  ;;  %v1178_v26 = vadd.f32 %v2755_v58, %v1177_v25 }
 0x5a7   : > { %v1043_v50 = vor.u32 1.1754944e-38, %v1042_v46  ;;  %vm1041_vm14 = vcmp.eq.f32.partialorder %v1040_v48, 8.507059e+37 }
 0x5a8   : > { %v949_v28 = vadd.f32 %v2284_v24, %v948_v27 }
 0x5aa   : > { %v953_v31 = vsel %vm952_vm8, %v2284_v24, %v949_v28 }
 0x5ab   : > { %v958_v33 = vsel %vm955_vm9, %v957_v32, %v953_v31  ;;  %v2288_v39 = vpop.eup %2287 }
 0x5ac   : > { %v1032_v41 = vmul.f32 %v2288_v39, %v1030_v38  ;;  %vm1037_vm10 = vweird.f32 %v2288_v39  ;;  %v965_v56 = vmul.f32 %v963_v54, %v958_v33 }
 0x5ad   : > { %vm1038_vm13 = vmor %vm1036_vm11, %vm1037_vm10 }
 0x5ae   : > { %v1033_v42 = vsub.f32 1.0, %v1032_v41 }
 0x5b0   : > { %v1034_v43 = vmul.f32 %v2288_v39, %v1033_v42 }
 0x5b2   : > { %v1035_v44 = vadd.f32 %v2288_v39, %v1034_v43 }
 0x5b4   : > { %v1039_v49 = vsel %vm1038_vm13, %v2288_v39, %v1035_v44 }
 0x5b5   : > { %v1044_v51 = vsel %vm1041_vm14, %v1043_v50, %v1039_v49 }
 0x5d7   : > { %v968_v34 = vpop.permute.xlu0 %967 }
 0x5d8   : > { %v970_v35 = vmul.f32 %v968_v34, %v958_v33 }
 0x5da   : > { %972 = vrot.lane.b32.xlu1 %v970_v35, %s2496_s19 }
 0x5df   : > { %v1049_v62 = vpop.permute.xlu0 %1048 }
 0x5e0   : > { %v1051_v63 = vmul.f32 %v1049_v62, %v1044_v51 }
 0x60a   : > { %v1054_v52 = vpop.permute.xlu1 %1053 }
 0x60b   : > { %v1056_v53 = vmul.f32 %v1054_v52, %v1044_v51 }
 0x60d   : > { %1058 = vrot.lane.b32.xlu2 %v1056_v53, %s2496_s19 }
 0x64c   : > { %v973_v59 = vpop.permute.xlu1 %972 }
 0x64d   : > { %v975_v60 = vadd.f32 %v973_v59, %v965_v56 }
 0x64f   : > { %2289 = vtanh.f32 %v975_v60 }
 0x655   : > { %v2290_v61 = vpop.eup %2289 }
 0x656   : > { %978 = vrot.lane.b32.xlu0 %v2290_v61, %s2497_s16 }
 0x667   : > { %v1059_v0 = vpop.permute.xlu2 %1058 }
 0x668   : > { %v1061_v2 = vadd.f32 %v1059_v0, %v1051_v63 }
 0x66a   : > { %2291 = vtanh.f32 %v1061_v2 }
 0x670   : > { %v2292_v3 = vpop.eup %2291 }
 0x671   : > { %1064 = vrot.lane.b32.xlu1 %v2292_v3, %s2497_s16 }
 0x679   : > { %988 = vrot.lane.b32.xlu1 %v975_v60, %s2498_s25 }
 0x6c8   : > { %v979_v4 = vpop.permute.xlu0 %978 }
 0x6c9   : > { %v2824_v6 = vmul.f32 %v979_v4, %v958_v33 }
 0x6cb   : > { %983 = vrot.lane.b32.xlu2 %v2824_v6, %s2496_s19 }
 0x6d3   : > { %1074 = vrot.lane.b32.xlu2 %v1061_v2, %s2498_s25 }
 0x6e3   : > { %v1065_v7 = vpop.permute.xlu1 %1064 }
 0x6e4   : > { %v2829_v8 = vmul.f32 %v1065_v7, %v1044_v51 }
 0x6e6   : > { %1069 = vrot.lane.b32.xlu0 %v2829_v8, %s2496_s19 }
 0x6eb   : > { %v989_v9 = vpop.permute.xlu1 %988 }
 0x6ec   : > { %991 = vst.msk [vmem:[#allocation3] sm:$0x3] %vm625_vm12, %v989_v9 }
 0x6f3   : > { %v1112_v10 = vld [vmem:[#allocation3] sm:$0x3] }
 0x6f4   : > { %1134 = vrot.lane.b32.xlu2 %v1112_v10, %s2496_s19 }
 0x725   : > { %v984_v11 = vpop.permute.xlu2 %983 }
 0x726   : > { %986 = vst.msk [vmem:[#allocation2] sm:$0x3] %vm625_vm12, %v984_v11 }
 0x72d   : > { %v1075_v12 = vpop.permute.xlu2 %1074  ;;  %v1093_v13 = vld [vmem:[#allocation2] sm:$0x3] }
 0x72e   : > { %1077 = vst.msk [vmem:[#allocation5] sm:$0x3] %vm625_vm12, %v1075_v12  ;;  %v1094_v15 = vpack.c.bf16 %v1093_v13, %v1093_v13 }
 0x730   : > { %2130 = vmatmul.msk.bf16.vlgmr.msra.gmra.mxu0 %vm561_vm2, %v1094_v15 }
 0x731   : > { %1792 = vmatpush.bf16.msra.mxu0 %v2678_v1 }
 0x735   : > { %1793 = vmatpush.bf16.msra.mxu0 %v2689_v5  ;;  %v1198_v5 = vld [vmem:[#allocation5] sm:$0x3] }
 0x74e   : > { %v1135_v2 = vpop.permute.xlu2 %1134 }
 0x758   : > { %v1070_v16 = vpop.permute.xlu0 %1069 }
 0x759   : > { %1072 = vst.msk [vmem:[#allocation4] sm:$0x3] %vm625_vm12, %v1070_v16 }
 0x760   : > { %v1179_v17 = vld [vmem:[#allocation4] sm:$0x3] }
 0x761   : > { %v1180_v19 = vpack.c.bf16 %v1179_v17, %v1179_v17 }
 0x763   : > { %2133 = vmatmul.msk.bf16.vlgmr.msra.gmra.mxu1 %vm561_vm2, %v1180_v19 }
 0x764   : > { %1877 = vmatpush.bf16.msra.mxu1 %v2703_v14 }
 0x768   : > { %1878 = vmatpush.bf16.msra.mxu1 %v2717_v18 }
 0x7ad   : > { %v1107_v22 = vpop.f32.mrf.mxu0 }
 0x7ae   : > { %v1111_v23 = vadd.f32 %v1107_v22, %v1092_v21 }
 0x7b0   : > { %2293 = vtanh.f32 %v1111_v23  ;;  %v2131_v29 = vmul.f32 -1.442695, %v1111_v23 }
 0x7b5   : > { %v1109_v1 = vpop.f32.mrf.mxu0 }
 0x7b6   : > { %v2294_v24 = vpop.eup %2293 }
 0x7b7   : > { %1139 = vrot.lane.b32.xlu0 %v2294_v24, %s2497_s16 }
 0x7bf   : > { %1220 = vrot.lane.b32.xlu0 %v1198_v5, %s2496_s19 }
 0x7e0   : > { %v1193_v27 = vpop.f32.mrf.mxu1 }
 0x7e1   : > { %v1197_v14 = vadd.f32 %v1193_v27, %v1178_v26 }
 0x7e3   : > { %2295 = vtanh.f32 %v1197_v14  ;;  %v2134_v46 = vmul.f32 -1.442695, %v1197_v14  ;;  %v1263_v14 = vld [vmem:[#allocation6 + $0x8] sm:$0x3] }
 0x7e4   : > { %2297 = vpow2.f32 %v2131_v29 }
 0x7e8   : > { %v1195_v18 = vpop.f32.mrf.mxu1 }
 0x7e9   : > { %v2296_v28 = vpop.eup %2295  ;;  %v1264_v18 = vadd.f32 %v2748_v40, %v1263_v14 }
 0x7ea   : > { %1225 = vrot.lane.b32.xlu1 %v2296_v28, %s2497_s16  ;;  %v2298_v30 = vpop.eup %2297 }
 0x7eb   : > { %v1116_v31 = vadd.f32 1.0, %v2298_v30 }
 0x7ed   : > { %2299 = vrcp.f32 %v1116_v31  ;;  %v1128_v37 = vand.u32 2147483648, %v1116_v31  ;;  %vm1122_vm0 = vweird.f32 %v1116_v31  ;;  %v1126_v38 = vand.u32 2147483647, %v1116_v31 }
 0x7ee   : > { %2301 = vpow2.f32 %v2134_v46 }
 0x7ef   : > { %v1129_v41 = vor.u32 1.1754944e-38, %v1128_v37  ;;  %vm1127_vm3 = vcmp.eq.f32.partialorder %v1126_v38, 8.507059e+37 }
 0x7f3   : > { %v2300_v32 = vpop.eup %2299 }
 0x7f4   : > { %v1118_v33 = vmul.f32 %v2300_v32, %v1116_v31  ;;  %vm1123_vm15 = vweird.f32 %v2300_v32  ;;  %v2302_v48 = vpop.eup %2301 }
 0x7f5   : > { %vm1124_vm1 = vmor %vm1122_vm0, %vm1123_vm15  ;;  %v1202_v49 = vadd.f32 1.0, %v2302_v48 }
 0x7f6   : > { %v1119_v34 = vsub.f32 1.0, %v1118_v33  ;;  %v1349_v33 = vld [vmem:[#allocation7 + $0x6] sm:$0x3] }
 0x7f7   : > { %2303 = vrcp.f32 %v1202_v49  ;;  %v1214_v56 = vand.u32 2147483648, %v1202_v49  ;;  %vm1208_vm5 = vweird.f32 %v1202_v49  ;;  %v1212_v59 = vand.u32 2147483647, %v1202_v49 }
 0x7f8   : > { %v1120_v35 = vmul.f32 %v2300_v32, %v1119_v34  ;;  %v1350_v34 = vadd.f32 %v2755_v58, %v1349_v33 }
 0x7f9   : > { %v1215_v61 = vor.u32 1.1754944e-38, %v1214_v56  ;;  %vm1213_vm7 = vcmp.eq.f32.partialorder %v1212_v59, 8.507059e+37 }
 0x7fa   : > { %v1121_v36 = vadd.f32 %v2300_v32, %v1120_v35 }
 0x7fc   : > { %v1125_v39 = vsel %vm1124_vm1, %v2300_v32, %v1121_v36 }
 0x7fd   : > { %v1130_v43 = vsel %vm1127_vm3, %v1129_v41, %v1125_v39  ;;  %v2304_v50 = vpop.eup %2303 }
 0x7fe   : > { %v1204_v51 = vmul.f32 %v2304_v50, %v1202_v49  ;;  %vm1209_vm4 = vweird.f32 %v2304_v50  ;;  %v1137_v3 = vmul.f32 %v1135_v2, %v1130_v43 }
 0x7ff   : > { %vm1210_vm6 = vmor %vm1208_vm5, %vm1209_vm4 }
 0x800   : > { %v1205_v52 = vsub.f32 1.0, %v1204_v51 }
 0x802   : > { %v1206_v53 = vmul.f32 %v2304_v50, %v1205_v52 }
 0x804   : > { %v1207_v54 = vadd.f32 %v2304_v50, %v1206_v53 }
 0x806   : > { %v1211_v60 = vsel %vm1210_vm6, %v2304_v50, %v1207_v54 }
 0x807   : > { %v1216_v62 = vsel %vm1213_vm7, %v1215_v61, %v1211_v60 }
 0x829   : > { %v1140_v42 = vpop.permute.xlu0 %1139 }
 0x82a   : > { %v1142_v44 = vmul.f32 %v1140_v42, %v1130_v43 }
 0x82c   : > { %1144 = vrot.lane.b32.xlu1 %v1142_v44, %s2496_s19 }
 0x831   : > { %v1221_v10 = vpop.permute.xlu0 %1220 }
 0x832   : > { %v1223_v11 = vmul.f32 %v1221_v10, %v1216_v62 }
 0x85c   : > { %v1226_v63 = vpop.permute.xlu1 %1225 }
 0x85d   : > { %v1228_v0 = vmul.f32 %v1226_v63, %v1216_v62 }
 0x85f   : > { %1230 = vrot.lane.b32.xlu2 %v1228_v0, %s2496_s19 }
 0x89e   : > { %v1145_v4 = vpop.permute.xlu1 %1144 }
 0x89f   : > { %v1147_v7 = vadd.f32 %v1145_v4, %v1137_v3 }
 0x8a1   : > { %2305 = vtanh.f32 %v1147_v7 }
 0x8a7   : > { %v2306_v9 = vpop.eup %2305 }
 0x8a8   : > { %1150 = vrot.lane.b32.xlu0 %v2306_v9, %s2497_s16 }
 0x8b9   : > { %v1231_v12 = vpop.permute.xlu2 %1230 }
 0x8ba   : > { %v1233_v13 = vadd.f32 %v1231_v12, %v1223_v11 }
 0x8bc   : > { %2307 = vtanh.f32 %v1233_v13 }
 0x8c2   : > { %v2308_v15 = vpop.eup %2307 }
 0x8c3   : > { %1236 = vrot.lane.b32.xlu1 %v2308_v15, %s2497_s16 }
 0x8cb   : > { %1160 = vrot.lane.b32.xlu1 %v1147_v7, %s2498_s25 }
 0x91a   : > { %v1151_v16 = vpop.permute.xlu0 %1150 }
 0x91b   : > { %v2854_v17 = vmul.f32 %v1151_v16, %v1130_v43 }
 0x91d   : > { %1155 = vrot.lane.b32.xlu2 %v2854_v17, %s2496_s19 }
 0x925   : > { %1246 = vrot.lane.b32.xlu2 %v1233_v13, %s2498_s25 }
 0x935   : > { %v1237_v19 = vpop.permute.xlu1 %1236 }
 0x936   : > { %v2859_v20 = vmul.f32 %v1237_v19, %v1216_v62 }
 0x938   : > { %1241 = vrot.lane.b32.xlu0 %v2859_v20, %s2496_s19 }
 0x93d   : > { %v1161_v21 = vpop.permute.xlu1 %1160 }
 0x93e   : > { %1163 = vst.msk [vmem:[#allocation3] sm:$0x3] %vm625_vm12, %v1161_v21 }
 0x945   : > { %v1284_v22 = vld [vmem:[#allocation3] sm:$0x3] }
 0x946   : > { %1306 = vrot.lane.b32.xlu2 %v1284_v22, %s2496_s19 }
 0x977   : > { %v1156_v23 = vpop.permute.xlu2 %1155 }
 0x978   : > { %1158 = vst.msk [vmem:[#allocation2] sm:$0x3] %vm625_vm12, %v1156_v23 }
 0x97f   : > { %v1247_v1 = vpop.permute.xlu2 %1246  ;;  %v1265_v24 = vld [vmem:[#allocation2] sm:$0x3] }
 0x980   : > { %1249 = vst.msk [vmem:[#allocation5] sm:$0x3] %vm625_vm12, %v1247_v1  ;;  %v1266_v5 = vpack.c.bf16 %v1265_v24, %v1265_v24 }
 0x982   : > { %2136 = vmatmul.msk.bf16.vlgmr.msra.gmra.mxu2 %vm561_vm2, %v1266_v5 }
 0x987   : > { %v1370_v32 = vld [vmem:[#allocation5] sm:$0x3] }
 0x9a0   : > { %v1307_v13 = vpop.permute.xlu2 %1306 }
 0x9aa   : > { %v1242_v25 = vpop.permute.xlu0 %1241 }
 0x9ab   : > { %1244 = vst.msk [vmem:[#allocation4] sm:$0x3] %vm625_vm12, %v1242_v25 }
 0x9b2   : > { %v1351_v26 = vld [vmem:[#allocation4] sm:$0x3] }
 0x9b3   : > { %v1352_v27 = vpack.c.bf16 %v1351_v26, %v1351_v26 }
 0x9b5   : > { %2139 = vmatmul.msk.bf16.vlgmr.msra.gmra.mxu3 %vm561_vm2, %v1352_v27 }
 0xa05   : > { %v1279_v28 = vpop.f32.mrf.mxu2 }
 0xa06   : > { %v1283_v29 = vadd.f32 %v1279_v28, %v1264_v18 }
 0xa08   : > { %2309 = vtanh.f32 %v1283_v29  ;;  %v2137_v40 = vmul.f32 -1.442695, %v1283_v29 }
 0xa0d   : > { %v1281_v30 = vpop.f32.mrf.mxu2 }
 0xa0e   : > { %v2310_v31 = vpop.eup %2309 }
 0xa0f   : > { %1311 = vrot.lane.b32.xlu0 %v2310_v31, %s2497_s16 }
 0xa17   : > { %1392 = vrot.lane.b32.xlu0 %v1370_v32, %s2496_s19 }
 0xa38   : > { %v1365_v35 = vpop.f32.mrf.mxu3 }
 0xa39   : > { %v1369_v36 = vadd.f32 %v1365_v35, %v1350_v34 }
 0xa3b   : > { %2311 = vtanh.f32 %v1369_v36  ;;  %v2140_v56 = vmul.f32 -1.442695, %v1369_v36  ;;  %v1435_v36 = vld [vmem:[#allocation6 + $0xa] sm:$0x3] }
 0xa3c   : > { %2313 = vpow2.f32 %v2137_v40 }
 0xa40   : > { %v1367_v37 = vpop.f32.mrf.mxu3 }
 0xa41   : > { %v2312_v38 = vpop.eup %2311  ;;  %v2899_v37 = vld [vmem:[%s3159_s6] ss:$0 sm:$0xff] }
 0xa42   : > { %1397 = vrot.lane.b32.xlu1 %v2312_v38, %s2497_s16  ;;  %v2314_v39 = vpop.eup %2313  ;;  %v1436_v38 = vadd.f32 %v2899_v37, %v1435_v36 }
 0xa43   : > { %v1288_v41 = vadd.f32 1.0, %v2314_v39 }
 0xa45   : > { %2315 = vrcp.f32 %v1288_v41  ;;  %v1300_v49 = vand.u32 2147483648, %v1288_v41  ;;  %vm1294_vm9 = vweird.f32 %v1288_v41  ;;  %v1298_v58 = vand.u32 2147483647, %v1288_v41 }
 0xa46   : > { %2317 = vpow2.f32 %v2140_v56 }
 0xa47   : > { %v1301_v51 = vor.u32 1.1754944e-38, %v1300_v49  ;;  %vm1299_vm11 = vcmp.eq.f32.partialorder %v1298_v58, 8.507059e+37 }
 0xa4b   : > { %v2316_v42 = vpop.eup %2315 }
 0xa4c   : > { %v1290_v43 = vmul.f32 %v2316_v42, %v1288_v41  ;;  %vm1295_vm8 = vweird.f32 %v2316_v42  ;;  %v2318_v59 = vpop.eup %2317 }
 0xa4d   : > { %vm1296_vm10 = vmor %vm1294_vm9, %vm1295_vm8  ;;  %v1374_v60 = vadd.f32 1.0, %v2318_v59 }
 0xa4e   : > { %v1291_v44 = vsub.f32 1.0, %v1290_v43 }
 0xa4f   : > { %2319 = vrcp.f32 %v1374_v60  ;;  %v1386_v3 = vand.u32 2147483648, %v1374_v60  ;;  %vm1380_vm14 = vweird.f32 %v1374_v60  ;;  %v1384_v4 = vand.u32 2147483647, %v1374_v60 }
 0xa50   : > { %v1292_v46 = vmul.f32 %v2316_v42, %v1291_v44  ;;  %v1521_v44 = vld [vmem:[#allocation7 + $0x4] sm:$0x3] }
 0xa51   : > { %v1387_v9 = vor.u32 1.1754944e-38, %v1386_v3  ;;  %vm1385_vm0 = vcmp.eq.f32.partialorder %v1384_v4, 8.507059e+37 }
 0xa52   : > { %v1293_v48 = vadd.f32 %v2316_v42, %v1292_v46  ;;  %v2907_v46 = vld [vmem:[%s3160_s7] ss:$0 sm:$0xff] }
 0xa54   : > { %v1297_v50 = vsel %vm1296_vm10, %v2316_v42, %v1293_v48  ;;  %v1522_v48 = vadd.f32 %v2907_v46, %v1521_v44 }
 0xa55   : > { %v1302_v53 = vsel %vm1299_vm11, %v1301_v51, %v1297_v50  ;;  %v2320_v61 = vpop.eup %2319 }
 0xa56   : > { %v1376_v62 = vmul.f32 %v2320_v61, %v1374_v60  ;;  %vm1381_vm13 = vweird.f32 %v2320_v61  ;;  %v1309_v15 = vmul.f32 %v1307_v13, %v1302_v53 }
 0xa57   : > { %vm1382_vm15 = vmor %vm1380_vm14, %vm1381_vm13 }
 0xa58   : > { %v1377_v63 = vsub.f32 1.0, %v1376_v62 }
 0xa5a   : > { %v1378_v0 = vmul.f32 %v2320_v61, %v1377_v63 }
 0xa5c   : > { %v1379_v2 = vadd.f32 %v2320_v61, %v1378_v0 }
 0xa5e   : > { %v1383_v7 = vsel %vm1382_vm15, %v2320_v61, %v1379_v2 }
 0xa5f   : > { %v1388_v10 = vsel %vm1385_vm0, %v1387_v9, %v1383_v7 }
 0xa81   : > { %v1312_v52 = vpop.permute.xlu0 %1311 }
 0xa82   : > { %v1314_v54 = vmul.f32 %v1312_v52, %v1302_v53 }
 0xa84   : > { %1316 = vrot.lane.b32.xlu1 %v1314_v54, %s2496_s19 }
 0xa89   : > { %v1393_v22 = vpop.permute.xlu0 %1392 }
 0xa8a   : > { %v1395_v23 = vmul.f32 %v1393_v22, %v1388_v10 }
 0xab4   : > { %v1398_v11 = vpop.permute.xlu1 %1397 }
 0xab5   : > { %v1400_v12 = vmul.f32 %v1398_v11, %v1388_v10 }
 0xab7   : > { %1402 = vrot.lane.b32.xlu2 %v1400_v12, %s2496_s19 }
 0xaf6   : > { %v1317_v16 = vpop.permute.xlu1 %1316 }
 0xaf7   : > { %v1319_v19 = vadd.f32 %v1317_v16, %v1309_v15 }
 0xaf9   : > { %2321 = vtanh.f32 %v1319_v19 }
 0xaff   : > { %v2322_v21 = vpop.eup %2321 }
 0xb00   : > { %1322 = vrot.lane.b32.xlu0 %v2322_v21, %s2497_s16 }
 0xb11   : > { %v1403_v1 = vpop.permute.xlu2 %1402 }
 0xb12   : > { %v1405_v24 = vadd.f32 %v1403_v1, %v1395_v23 }
 0xb14   : > { %2323 = vtanh.f32 %v1405_v24 }
 0xb1a   : > { %v2324_v5 = vpop.eup %2323 }
 0xb1b   : > { %1408 = vrot.lane.b32.xlu1 %v2324_v5, %s2497_s16 }
 0xb23   : > { %1332 = vrot.lane.b32.xlu1 %v1319_v19, %s2498_s25 }
 0xb72   : > { %v1323_v25 = vpop.permute.xlu0 %1322 }
 0xb73   : > { %v2880_v26 = vmul.f32 %v1323_v25, %v1302_v53 }
 0xb75   : > { %1327 = vrot.lane.b32.xlu2 %v2880_v26, %s2496_s19 }
 0xb7d   : > { %1418 = vrot.lane.b32.xlu2 %v1405_v24, %s2498_s25 }
 0xb8d   : > { %v1409_v27 = vpop.permute.xlu1 %1408 }
 0xb8e   : > { %v2885_v14 = vmul.f32 %v1409_v27, %v1388_v10 }
 0xb90   : > { %1413 = vrot.lane.b32.xlu0 %v2885_v14, %s2496_s19 }
 0xb95   : > { %v1333_v18 = vpop.permute.xlu1 %1332 }
 0xb96   : > { %1335 = vst.msk [vmem:[#allocation3] sm:$0x3] %vm625_vm12, %v1333_v18 }
 0xb9d   : > { %v1456_v28 = vld [vmem:[#allocation3] sm:$0x3] }
 0xb9e   : > { %1478 = vrot.lane.b32.xlu2 %v1456_v28, %s2496_s19 }
 0xbcf   : > { %v1328_v29 = vpop.permute.xlu2 %1327 }
 0xbd0   : > { %1330 = vst.msk [vmem:[#allocation2] sm:$0x3] %vm625_vm12, %v1328_v29 }
 0xbd7   : > { %v1419_v30 = vpop.permute.xlu2 %1418  ;;  %v1437_v31 = vld [vmem:[#allocation2] sm:$0x3] }
 0xbd8   : > { %1421 = vst.msk [vmem:[#allocation5] sm:$0x3] %vm625_vm12, %v1419_v30  ;;  %v1438_v32 = vpack.c.bf16 %v1437_v31, %v1437_v31 }
 0xbda   : > { %2142 = vmatmul.msk.bf16.vlgmr.msrb.gmra.mxu0 %vm561_vm2, %v1438_v32 }
 0xbdf   : > { %v1542_v43 = vld [vmem:[#allocation5] sm:$0x3] }
 0xbf8   : > { %v1479_v18 = vpop.permute.xlu2 %1478 }
 0xc02   : > { %v1414_v33 = vpop.permute.xlu0 %1413 }
 0xc03   : > { %1416 = vst.msk [vmem:[#allocation4] sm:$0x3] %vm625_vm12, %v1414_v33 }
 0xc0a   : > { %v1523_v34 = vld [vmem:[#allocation4] sm:$0x3] }
 0xc0b   : > { %v1524_v35 = vpack.c.bf16 %v1523_v34, %v1523_v34 }
 0xc0d   : > { %2145 = vmatmul.msk.bf16.vlgmr.msrb.gmra.mxu1 %vm561_vm2, %v1524_v35 }
 0xc57   : > { %v1451_v40 = vpop.f32.mrf.mxu0 }
 0xc58   : > { %v1455_v39 = vadd.f32 %v1451_v40, %v1436_v38 }
 0xc5a   : > { %2325 = vtanh.f32 %v1455_v39  ;;  %v2143_v52 = vmul.f32 -1.442695, %v1455_v39 }
 0xc5f   : > { %v1453_v41 = vpop.f32.mrf.mxu0 }
 0xc60   : > { %v2326_v42 = vpop.eup %2325 }
 0xc61   : > { %1483 = vrot.lane.b32.xlu0 %v2326_v42, %s2497_s16 }
 0xc69   : > { %1564 = vrot.lane.b32.xlu0 %v1542_v43, %s2496_s19 }
 0xc8a   : > { %v1537_v49 = vpop.f32.mrf.mxu1 }
 0xc8b   : > { %v1541_v58 = vadd.f32 %v1537_v49, %v1522_v48 }
 0xc8d   : > { %2327 = vtanh.f32 %v1541_v58  ;;  %v2146_v10 = vmul.f32 -1.442695, %v1541_v58 }
 0xc8e   : > { %2329 = vpow2.f32 %v2143_v52 }
 0xc92   : > { %v1539_v50 = vpop.f32.mrf.mxu1 }
 0xc93   : > { %v2328_v51 = vpop.eup %2327 }
 0xc94   : > { %1569 = vrot.lane.b32.xlu1 %v2328_v51, %s2497_s16  ;;  %v2330_v53 = vpop.eup %2329 }
 0xc95   : > { %v1460_v54 = vadd.f32 1.0, %v2330_v53  ;;  %v1607_v53 = vld [vmem:[#allocation6 + $0xc] sm:$0x3] }
 0xc97   : > { %2331 = vrcp.f32 %v1460_v54  ;;  %v1472_v63 = vand.u32 2147483648, %v1460_v54  ;;  %vm1466_vm3 = vweird.f32 %v1460_v54  ;;  %v1470_v0 = vand.u32 2147483647, %v1460_v54 }
 0xc98   : > { %2333 = vpow2.f32 %v2146_v10 }
 0xc99   : > { %v1473_v3 = vor.u32 1.1754944e-38, %v1472_v63  ;;  %vm1471_vm5 = vcmp.eq.f32.partialorder %v1470_v0, 8.507059e+37  ;;  %v1693_v63 = vld [vmem:[#allocation7 + $0x2] sm:$0x3] }
 0xc9a   : > { %v1694_v0 = vadd.f32 %v2907_v46, %v1693_v63 }
 0xc9d   : > { %v2332_v56 = vpop.eup %2331 }
 0xc9e   : > { %v1462_v59 = vmul.f32 %v2332_v56, %v1460_v54  ;;  %vm1467_vm1 = vweird.f32 %v2332_v56  ;;  %v2334_v11 = vpop.eup %2333  ;;  %v1608_v54 = vadd.f32 %v2899_v37, %v1607_v53 }
 0xc9f   : > { %vm1468_vm4 = vmor %vm1466_vm3, %vm1467_vm1  ;;  %v1546_v12 = vadd.f32 1.0, %v2334_v11 }
 0xca0   : > { %v1463_v60 = vsub.f32 1.0, %v1462_v59 }
 0xca1   : > { %2335 = vrcp.f32 %v1546_v12  ;;  %v1558_v22 = vand.u32 2147483648, %v1546_v12  ;;  %vm1552_vm7 = vweird.f32 %v1546_v12  ;;  %v1556_v23 = vand.u32 2147483647, %v1546_v12 }
 0xca2   : > { %v1464_v61 = vmul.f32 %v2332_v56, %v1463_v60 }
 0xca3   : > { %v1559_v24 = vor.u32 1.1754944e-38, %v1558_v22  ;;  %vm1557_vm9 = vcmp.eq.f32.partialorder %v1556_v23, 8.507059e+37 }
 0xca4   : > { %v1465_v62 = vadd.f32 %v2332_v56, %v1464_v61 }
 0xca6   : > { %v1469_v2 = vsel %vm1468_vm4, %v2332_v56, %v1465_v62  ;;  %vm635_vm4 = vcmask 1040384  }
 0xca7   : > { %v1474_v7 = vsel %vm1471_vm5, %v1473_v3, %v1469_v2  ;;  %v2336_v13 = vpop.eup %2335 }
 0xca8   : > { %v1548_v15 = vmul.f32 %v2336_v13, %v1546_v12  ;;  %vm1553_vm6 = vweird.f32 %v2336_v13  ;;  %v1481_v28 = vmul.f32 %v1479_v18, %v1474_v7 }
 0xca9   : > { %vm1554_vm8 = vmor %vm1552_vm7, %vm1553_vm6 }
 0xcaa   : > { %v1549_v16 = vsub.f32 1.0, %v1548_v15 }
 0xcac   : > { %v1550_v19 = vmul.f32 %v2336_v13, %v1549_v16 }
 0xcae   : > { %v1551_v21 = vadd.f32 %v2336_v13, %v1550_v19 }
 0xcb0   : > { %v1555_v1 = vsel %vm1554_vm8, %v2336_v13, %v1551_v21  ;;  %vm643_vm8 = vcmask 253952  }
 0xcb1   : > { %v1560_v5 = vsel %vm1557_vm9, %v1559_v24, %v1555_v1 }
 0xcd3   : > { %v1484_v4 = vpop.permute.xlu0 %1483 }
 0xcd4   : > { %v1486_v9 = vmul.f32 %v1484_v4, %v1474_v7 }
 0xcd6   : > { %1488 = vrot.lane.b32.xlu1 %v1486_v9, %s2496_s19 }
 0xcdb   : > { %v1565_v32 = vpop.permute.xlu0 %1564 }
 0xcdc   : > { %v1567_v33 = vmul.f32 %v1565_v32, %v1560_v5 }
 0xd06   : > { %v1570_v25 = vpop.permute.xlu1 %1569 }
 0xd07   : > { %v1572_v27 = vmul.f32 %v1570_v25, %v1560_v5 }
 0xd09   : > { %1574 = vrot.lane.b32.xlu2 %v1572_v27, %s2496_s19 }
 0xd48   : > { %v1489_v29 = vpop.permute.xlu1 %1488 }
 0xd49   : > { %v1491_v30 = vadd.f32 %v1489_v29, %v1481_v28 }
 0xd4b   : > { %2337 = vtanh.f32 %v1491_v30 }
 0xd51   : > { %v2338_v31 = vpop.eup %2337 }
 0xd52   : > { %1494 = vrot.lane.b32.xlu0 %v2338_v31, %s2497_s16 }
 0xd63   : > { %v1575_v34 = vpop.permute.xlu2 %1574 }
 0xd64   : > { %v1577_v35 = vadd.f32 %v1575_v34, %v1567_v33 }
 0xd66   : > { %2339 = vtanh.f32 %v1577_v35 }
 0xd6c   : > { %v2340_v36 = vpop.eup %2339 }
 0xd6d   : > { %1580 = vrot.lane.b32.xlu1 %v2340_v36, %s2497_s16 }
 0xd75   : > { %1504 = vrot.lane.b32.xlu1 %v1491_v30, %s2498_s25 }
 0xdc4   : > { %v1495_v38 = vpop.permute.xlu0 %1494 }
 0xdc5   : > { %v2916_v40 = vmul.f32 %v1495_v38, %v1474_v7 }
 0xdc7   : > { %1499 = vrot.lane.b32.xlu2 %v2916_v40, %s2496_s19 }
 0xdcf   : > { %1590 = vrot.lane.b32.xlu2 %v1577_v35, %s2498_s25 }
 0xddf   : > { %v1581_v39 = vpop.permute.xlu1 %1580 }
 0xde0   : > { %v2921_v41 = vmul.f32 %v1581_v39, %v1560_v5 }
 0xde2   : > { %1585 = vrot.lane.b32.xlu0 %v2921_v41, %s2496_s19 }
 0xde7   : > { %v1505_v42 = vpop.permute.xlu1 %1504 }
 0xde8   : > { %1507 = vst.msk [vmem:[#allocation3] sm:$0x3] %vm625_vm12, %v1505_v42 }
 0xdef   : > { %v1628_v43 = vld [vmem:[#allocation3] sm:$0x3] }
 0xdf0   : > { %1650 = vrot.lane.b32.xlu2 %v1628_v43, %s2496_s19 }
 0xe21   : > { %v1500_v44 = vpop.permute.xlu2 %1499 }
 0xe22   : > { %1502 = vst.msk [vmem:[#allocation2] sm:$0x3] %vm625_vm12, %v1500_v44 }
 0xe29   : > { %v1591_v48 = vpop.permute.xlu2 %1590  ;;  %v1609_v49 = vld [vmem:[#allocation2] sm:$0x3] }
 0xe2a   : > { %1593 = vst.msk [vmem:[#allocation5] sm:$0x3] %vm625_vm12, %v1591_v48  ;;  %v1610_v58 = vpack.c.bf16 %v1609_v49, %v1609_v49 }
 0xe2c   : > { %2148 = vmatmul.msk.bf16.vlgmr.msrb.gmra.mxu2 %vm561_vm2, %v1610_v58 }
 0xe31   : > { %v1714_v62 = vld [vmem:[#allocation5] sm:$0x3] }
 0xe4a   : > { %v1651_v44 = vpop.permute.xlu2 %1650 }
 0xe54   : > { %v1586_v50 = vpop.permute.xlu0 %1585 }
 0xe55   : > { %1588 = vst.msk [vmem:[#allocation4] sm:$0x3] %vm625_vm12, %v1586_v50 }
 0xe5c   : > { %v1695_v51 = vld [vmem:[#allocation4] sm:$0x3] }
 0xe5d   : > { %v1696_v52 = vpack.c.bf16 %v1695_v51, %v1695_v51 }
 0xe5f   : > { %2151 = vmatmul.msk.bf16.vlgmr.msrb.gmra.mxu3 %vm561_vm2, %v1696_v52 }
 0xeaf   : > { %v1623_v56 = vpop.f32.mrf.mxu2 }
 0xeb0   : > { %v1627_v59 = vadd.f32 %v1623_v56, %v1608_v54 }
 0xeb2   : > { %2341 = vtanh.f32 %v1627_v59  ;;  %v2149_v9 = vmul.f32 -1.442695, %v1627_v59 }
 0xeb7   : > { %v1625_v60 = vpop.f32.mrf.mxu2 }
 0xeb8   : > { %v2342_v61 = vpop.eup %2341 }
 0xeb9   : > { %1655 = vrot.lane.b32.xlu0 %v2342_v61, %s2497_s16 }
 0xec1   : > { %1736 = vrot.lane.b32.xlu0 %v1714_v62, %s2496_s19 }
 0xee2   : > { %v1709_v2 = vpop.f32.mrf.mxu3 }
 0xee3   : > { %v1713_v3 = vadd.f32 %v1709_v2, %v1694_v0 }
 0xee5   : > { %2343 = vtanh.f32 %v1713_v3  ;;  %v2152_v27 = vmul.f32 -1.442695, %v1713_v3 }
 0xee6   : > { %2345 = vpow2.f32 %v2149_v9 }
 0xeea   : > { %v1711_v4 = vpop.f32.mrf.mxu3 }
 0xeeb   : > { %v2344_v7 = vpop.eup %2343 }
 0xeec   : > { %1741 = vrot.lane.b32.xlu1 %v2344_v7, %s2497_s16  ;;  %v2346_v10 = vpop.eup %2345 }
 0xeed   : > { %v1632_v11 = vadd.f32 1.0, %v2346_v10 }
 0xeef   : > { %2347 = vrcp.f32 %v1632_v11  ;;  %v1644_v21 = vand.u32 2147483648, %v1632_v11  ;;  %vm1638_vm11 = vweird.f32 %v1632_v11  ;;  %v1642_v22 = vand.u32 2147483647, %v1632_v11 }
 0xef0   : > { %2349 = vpow2.f32 %v2152_v27 }
 0xef1   : > { %v1645_v1 = vor.u32 1.1754944e-38, %v1644_v21  ;;  %vm1643_vm14 = vcmp.eq.f32.partialorder %v1642_v22, 8.507059e+37  ;;  %v734_v22 = vpack.c.bf16 %v2769_v47, %v2769_v47 }
 0xef5   : > { %v2348_v12 = vpop.eup %2347 }
 0xef6   : > { %v1634_v13 = vmul.f32 %v2348_v12, %v1632_v11  ;;  %vm1639_vm10 = vweird.f32 %v2348_v12  ;;  %v2350_v18 = vpop.eup %2349 }
 0xef7   : > { %vm1640_vm13 = vmor %vm1638_vm11, %vm1639_vm10  ;;  %v1718_v28 = vadd.f32 1.0, %v2350_v18 }
 0xef8   : > { %v1635_v15 = vsub.f32 1.0, %v1634_v13 }
 0xef9   : > { %2351 = vrcp.f32 %v1718_v28  ;;  %v1730_v34 = vand.u32 2147483648, %v1718_v28  ;;  %vm1724_vm0 = vweird.f32 %v1718_v28  ;;  %v1728_v35 = vand.u32 2147483647, %v1718_v28 }
 0xefa   : > { %v1636_v16 = vmul.f32 %v2348_v12, %v1635_v15 }
 0xefb   : > { %v1731_v38 = vor.u32 1.1754944e-38, %v1730_v34  ;;  %vm1729_vm3 = vcmp.eq.f32.partialorder %v1728_v35, 8.507059e+37 }
 0xefc   : > { %v1637_v19 = vadd.f32 %v2348_v12, %v1636_v16 }
 0xefe   : > { %v1641_v23 = vsel %vm1640_vm13, %v2348_v12, %v1637_v19  ;;  %v1779_v12 = vld [vmem:[#allocation6 + $0xe] sm:$0x3] }
 0xeff   : > { %v1646_v24 = vsel %vm1643_vm14, %v1645_v1, %v1641_v23  ;;  %v2352_v29 = vpop.eup %2351  ;;  %v1780_v13 = vadd.f32 %v2899_v37, %v1779_v12  ;;  %v736_v1 = vrot.slane %v734_v22, 3  ;;  %v1864_v37 = vld [vmem:[#allocation7] sm:$0x3] }
 0xf00   : > { %v1720_v30 = vmul.f32 %v2352_v29, %v1718_v28  ;;  %vm1725_vm15 = vweird.f32 %v2352_v29  ;;  %v1653_v48 = vmul.f32 %v1651_v44, %v1646_v24 }
 0xf01   : > { %vm1726_vm1 = vmor %vm1724_vm0, %vm1725_vm15 }
 0xf02   : > { %v1721_v31 = vsub.f32 1.0, %v1720_v30 }
 0xf04   : > { %v1722_v32 = vmul.f32 %v2352_v29, %v1721_v31 }
 0xf06   : > { %v1723_v33 = vadd.f32 %v2352_v29, %v1722_v32 }
 0xf08   : > { %v1727_v36 = vsel %vm1726_vm1, %v2352_v29, %v1723_v33 }
 0xf09   : > { %v1732_v39 = vsel %vm1729_vm3, %v1731_v38, %v1727_v36 }
 0xf2b   : > { %v1656_v5 = vpop.permute.xlu0 %1655 }
 0xf2c   : > { %v1658_v25 = vmul.f32 %v1656_v5, %v1646_v24  ;;  %v1865_v5 = vadd.f32 %v2907_v46, %v1864_v37 }
 0xf2e   : > { %1660 = vrot.lane.b32.xlu1 %v1658_v25, %s2496_s19 }
 0xf33   : > { %v1737_v51 = vpop.permute.xlu0 %1736 }
 0xf34   : > { %v1739_v52 = vmul.f32 %v1737_v51, %v1732_v39 }
 0xf5e   : > { %v1742_v42 = vpop.permute.xlu1 %1741 }
 0xf5f   : > { %v1744_v43 = vmul.f32 %v1742_v42, %v1732_v39 }
 0xf61   : > { %1746 = vrot.lane.b32.xlu2 %v1744_v43, %s2496_s19 }
 0xfa0   : > { %v1661_v49 = vpop.permute.xlu1 %1660 }
 0xfa1   : > { %v1663_v58 = vadd.f32 %v1661_v49, %v1653_v48 }
 0xfa3   : > { %2353 = vtanh.f32 %v1663_v58 }
 0xfa9   : > { %v2354_v50 = vpop.eup %2353 }
 0xfaa   : > { %1666 = vrot.lane.b32.xlu0 %v2354_v50, %s2497_s16 }
 0xfbb   : > { %v1747_v53 = vpop.permute.xlu2 %1746 }
 0xfbc   : > { %v1749_v54 = vadd.f32 %v1747_v53, %v1739_v52 }
 0xfbe   : > { %2355 = vtanh.f32 %v1749_v54 }
 0xfc4   : > { %v2356_v56 = vpop.eup %2355 }
 0xfc5   : > { %1752 = vrot.lane.b32.xlu1 %v2356_v56, %s2497_s16 }
 0xfcd   : > { %1676 = vrot.lane.b32.xlu1 %v1663_v58, %s2498_s25 }
0x101c   : > { %v1667_v59 = vpop.permute.xlu0 %1666 }
0x101d   : > { %v2942_v60 = vmul.f32 %v1667_v59, %v1646_v24  ;;  %v739_v24 = vsel %vm635_vm4, %v734_v22, %v736_v1 }
0x101f   : > { %1671 = vrot.lane.b32.xlu2 %v2942_v60, %s2496_s19  ;;  %v1680_v22 = vpack.c.bf16 %v2942_v60, %v2942_v60 }
0x1027   : > { %1762 = vrot.lane.b32.xlu2 %v1749_v54, %s2498_s25 }
0x1037   : > { %v1753_v61 = vpop.permute.xlu1 %1752 }
0x1038   : > { %v2947_v62 = vmul.f32 %v1753_v61, %v1732_v39 }
0x103a   : > { %1757 = vrot.lane.b32.xlu0 %v2947_v62, %s2496_s19 }
0x103f   : > { %v1677_v63 = vpop.permute.xlu1 %1676 }
0x1040   : > { %1679 = vst.msk [vmem:[#allocation3] sm:$0x3] %vm625_vm12, %v1677_v63 }
0x1047   : > { %v1800_v0 = vld [vmem:[#allocation3] sm:$0x3] }
0x1048   : > { %1822 = vrot.lane.b32.xlu2 %v1800_v0, %s2496_s19 }
0x1079   : > { %v1672_v2 = vpop.permute.xlu2 %1671 }
0x107a   : > { %1674 = vst.msk [vmem:[#allocation2] sm:$0x3] %vm625_vm12, %v1672_v2 }
0x1081   : > { %v1763_v3 = vpop.permute.xlu2 %1762  ;;  %v1781_v4 = vld [vmem:[#allocation2] sm:$0x3] }
0x1082   : > { %1765 = vst.msk [vmem:[#allocation5] sm:$0x3] %vm625_vm12, %v1763_v3  ;;  %v1782_v7 = vpack.c.bf16 %v1781_v4, %v1781_v4 }
0x1084   : > { %2154 = vmatmul.msk.bf16.vlgmr.msra.gmra.mxu0 %vm561_vm2, %v1782_v7 }
0x1089   : > { %v1885_v23 = vld [vmem:[#allocation5] sm:$0x3] }
0x10ac   : > { %v1758_v9 = vpop.permute.xlu0 %1757 }
0x10ad   : > { %1760 = vst.msk [vmem:[#allocation4] sm:$0x3] %vm625_vm12, %v1758_v9  ;;  %v632_v9 = vpack.c.bf16 %v2764_v45, %v2764_v45  ;;  %v1422_v45 = vpack.c.bf16 %v2885_v14, %v2885_v14 }
0x10b4   : > { %v1866_v10 = vld [vmem:[#allocation4] sm:$0x3] }
0x10b5   : > { %v1867_v11 = vpack.c.bf16 %v1866_v10, %v1866_v10  ;;  %v634_v10 = vrot.slane %v632_v9, 3 }
0x10b7   : > { %2157 = vmatmul.msk.bf16.vlgmr.msra.gmra.mxu1 %vm561_vm2, %v1867_v11  ;;  %v906_v11 = vpack.c.bf16 %v2799_v57, %v2799_v57  ;;  %v638_v12 = vsel %vm635_vm4, %v632_v9, %v634_v10  ;;  %v1424_v57 = vrot.slane %v1422_v45, 3 }
0x1101   : > { %v1795_v15 = vpop.f32.mrf.mxu0 }
0x1102   : > { %v1799_v16 = vadd.f32 %v1795_v15, %v1780_v13  ;;  %v908_v13 = vrot.slane %v906_v11, 3  ;;  %v1164_v15 = vpack.c.bf16 %v2854_v17, %v2854_v17  ;;  %v1682_v17 = vrot.slane %v1680_v22, 3 }
0x1104   : > { %2357 = vtanh.f32 %v1799_v16  ;;  %v2155_v47 = vmul.f32 -1.442695, %v1799_v16  ;;  %v911_v16 = vsel %vm635_vm4, %v906_v11, %v908_v13  ;;  %v1685_v1 = vsel %vm635_vm4, %v1680_v22, %v1682_v17 }
0x1109   : > { %v1797_v19 = vpop.f32.mrf.mxu0 }
0x110a   : > { %v2358_v21 = vpop.eup %2357  ;;  %v1166_v19 = vrot.slane %v1164_v15, 3 }
0x110b   : > { %1827 = vrot.lane.b32.xlu0 %v2358_v21, %s2497_s16 }
0x110c   : > { %v1169_v21 = vsel %vm635_vm4, %v1164_v15, %v1166_v19 }
0x1113   : > { %1907 = vrot.lane.b32.xlu0 %v1885_v23, %s2496_s19  ;;  %v1427_v23 = vsel %vm635_vm4, %v1422_v45, %v1424_v57 }
0x111b   : > { %741 = vrot.lane.b32.xlu0 %v739_v24, %s2496_s19  ;;  %v1823_v24 = vpop.permute.xlu2 %1822 }
0x1134   : > { %v1880_v25 = vpop.f32.mrf.mxu1 }
0x1135   : > { %v1884_v27 = vadd.f32 %v1880_v25, %v1865_v5 }
0x1137   : > { %2359 = vtanh.f32 %v1884_v27  ;;  %v2158_v48 = vmul.f32 -1.442695, %v1884_v27  ;;  %v992_v27 = vpack.c.bf16 %v2824_v6, %v2824_v6 }
0x1138   : > { %2361 = vpow2.f32 %v2155_v47 }
0x1139   : > { %v994_v60 = vrot.slane %v992_v27, 3 }
0x113c   : > { %v1882_v18 = vpop.f32.mrf.mxu1 }
0x113d   : > { %v2360_v28 = vpop.eup %2359  ;;  %v1250_v18 = vpack.c.bf16 %v2859_v20, %v2859_v20  ;;  %v1766_v20 = vpack.c.bf16 %v2947_v62, %v2947_v62 }
0x113e   : > { %1912 = vrot.lane.b32.xlu1 %v2360_v28, %s2497_s16  ;;  %v2362_v29 = vpop.eup %2361  ;;  %v997_v28 = vsel %vm635_vm4, %v992_v27, %v994_v60 }
0x113f   : > { %v1804_v30 = vadd.f32 1.0, %v2362_v29  ;;  %v1252_v47 = vrot.slane %v1250_v18, 3  ;;  %v1508_v29 = vpack.c.bf16 %v2916_v40, %v2916_v40 }
0x1141   : > { %2363 = vrcp.f32 %v1804_v30  ;;  %v1816_v36 = vand.u32 2147483648, %v1804_v30  ;;  %vm1810_vm5 = vweird.f32 %v1804_v30  ;;  %v1814_v46 = vand.u32 2147483647, %v1804_v30 }
0x1142   : > { %2365 = vpow2.f32 %v2158_v48 }
0x1143   : > { %v1817_v39 = vor.u32 1.1754944e-38, %v1816_v36  ;;  %vm1815_vm7 = vcmp.eq.f32.partialorder %v1814_v46, 8.507059e+37  ;;  %v820_v36 = vpack.c.bf16 %v2794_v55, %v2794_v55  ;;  %v1768_v46 = vrot.slane %v1766_v20, 3 }
0x1147   : > { %v2364_v31 = vpop.eup %2363 }
0x1148   : > { %v1806_v32 = vmul.f32 %v2364_v31, %v1804_v30  ;;  %vm1811_vm2 = vweird.f32 %v2364_v31  ;;  %v2366_v58 = vpop.eup %2365  ;;  %v1255_v30 = vsel %vm635_vm4, %v1250_v18, %v1252_v47 }
0x1149   : > { %vm1812_vm6 = vmor %vm1810_vm5, %vm1811_vm2  ;;  %v1889_v51 = vadd.f32 1.0, %v2366_v58 }
0x114a   : > { %v1807_v33 = vsub.f32 1.0, %v1806_v32 }
0x114b   : > { %2367 = vrcp.f32 %v1889_v51  ;;  %v1901_v61 = vand.u32 2147483648, %v1889_v51  ;;  %vm1895_vm10 = vweird.f32 %v1889_v51  ;;  %v1899_v63 = vand.u32 2147483647, %v1889_v51 }
0x114c   : > { %v1808_v34 = vmul.f32 %v2364_v31, %v1807_v33  ;;  %v1510_v33 = vrot.slane %v1508_v29, 3 }
0x114d   : > { %v1902_v2 = vor.u32 1.1754944e-38, %v1901_v61  ;;  %vm1900_vm13 = vcmp.eq.f32.partialorder %v1899_v63, 8.507059e+37 }
0x114e   : > { %v1809_v35 = vadd.f32 %v2364_v31, %v1808_v34  ;;  %v1513_v34 = vsel %vm635_vm4, %v1508_v29, %v1510_v33 }
0x1150   : > { %v1813_v38 = vsel %vm1812_vm6, %v2364_v31, %v1809_v35 }
0x1151   : > { %v2967_v42 = vsel %vm1815_vm7, %v1817_v39, %v1813_v38  ;;  %v2368_v52 = vpop.eup %2367  ;;  %v822_v38 = vrot.slane %v820_v36, 3  ;;  %v1771_v39 = vsel %vm635_vm4, %v1766_v20, %v1768_v46 }
0x1152   : > { %v1891_v53 = vmul.f32 %v2368_v52, %v1889_v51  ;;  %vm1896_vm9 = vweird.f32 %v2368_v52  ;;  %v1825_v14 = vmul.f32 %v1823_v24, %v2967_v42  ;;  %v1594_v51 = vpack.c.bf16 %v2921_v41, %v2921_v41 }
0x1153   : > { %vm1897_vm11 = vmor %vm1895_vm10, %vm1896_vm9 }
0x1154   : > { %v1892_v54 = vsub.f32 1.0, %v1891_v53  ;;  %v1596_v53 = vrot.slane %v1594_v51, 3 }
0x1156   : > { %v1893_v56 = vmul.f32 %v2368_v52, %v1892_v54  ;;  %v1599_v54 = vsel %vm635_vm4, %v1594_v51, %v1596_v53 }
0x1158   : > { %v1894_v59 = vadd.f32 %v2368_v52, %v1893_v56 }
0x115a   : > { %v1898_v0 = vsel %vm1897_vm11, %v2368_v52, %v1894_v59 }
0x115b   : > { %v2973_v3 = vsel %vm1900_vm13, %v1902_v2, %v1898_v0 }
0x117d   : > { %v1828_v43 = vpop.permute.xlu0 %1827 }
0x117e   : > { %v1830_v44 = vmul.f32 %v1828_v43, %v2967_v42  ;;  %v1078_v43 = vpack.c.bf16 %v2829_v8, %v2829_v8 }
0x1180   : > { %1832 = vrot.lane.b32.xlu1 %v1830_v44, %s2496_s19  ;;  %v825_v44 = vsel %vm635_vm4, %v820_v36, %v822_v38  ;;  %v1080_v55 = vrot.slane %v1078_v43, 3 }
0x1182   : > { %v1083_v58 = vsel %vm635_vm4, %v1078_v43, %v1080_v55 }
0x1185   : > { %v1908_v49 = vpop.permute.xlu0 %1907 }
0x1186   : > { %v1910_v31 = vmul.f32 %v1908_v49, %v2973_v3  ;;  %v1336_v49 = vpack.c.bf16 %v2880_v26, %v2880_v26 }
0x118d   : > { %v742_v50 = vpop.permute.xlu0 %741 }
0x118e   : > { %2117 = vst.msk [vmem:[%s2672_s12 + $0x7] sm:$0x1] %vm643_vm8, %v742_v50  ;;  %v1338_v50 = vrot.slane %v1336_v49, 3 }
0x1190   : > { %v1341_v52 = vsel %vm635_vm4, %v1336_v49, %v1338_v50 }
0x11b0   : > { %v1913_v4 = vpop.permute.xlu1 %1912 }
0x11b1   : > { %v1915_v7 = vmul.f32 %v1913_v4, %v2973_v3 }
0x11b3   : > { %1917 = vrot.lane.b32.xlu2 %v1915_v7, %s2496_s19 }
0x11bb   : > { %640 = vrot.lane.b32.xlu2 %v638_v12, %s2496_s19 }
0x11c3   : > { %913 = vrot.lane.b32.xlu2 %v911_v16, %s2496_s19 }
0x11cb   : > { %1171 = vrot.lane.b32.xlu2 %v1169_v21, %s2496_s19 }
0x11d3   : > { %1429 = vrot.lane.b32.xlu2 %v1427_v23, %s2496_s19 }
0x11db   : > { %1687 = vrot.lane.b32.xlu2 %v1685_v1, %s2496_s19 }
0x11f2   : > { %v1833_v37 = vpop.permute.xlu1 %1832 }
0x11f3   : > { %v1835_v5 = vadd.f32 %v1833_v37, %v1825_v14 }
0x11f5   : > { %2369 = vtanh.f32 %v1835_v5 }
0x11fb   : > { %v2370_v25 = vpop.eup %2369 }
0x11fc   : > { %1838 = vrot.lane.b32.xlu0 %v2370_v25, %s2497_s16 }
0x1204   : > { %999 = vrot.lane.b32.xlu0 %v997_v28, %s2496_s19 }
0x120c   : > { %1257 = vrot.lane.b32.xlu0 %v1255_v30, %s2496_s19 }
0x120d   : > { %v1918_v6 = vpop.permute.xlu2 %1917 }
0x120e   : > { %v1920_v32 = vadd.f32 %v1918_v6, %v1910_v31 }
0x1210   : > { %2371 = vtanh.f32 %v1920_v32 }
0x1214   : > { %1515 = vrot.lane.b32.xlu0 %v1513_v34, %s2496_s19 }
0x1215   : > { %v641_v35 = vpop.permute.xlu2 %640 }
0x1216   : > { %v2372_v40 = vpop.eup %2371  ;;  %644 = vst.msk [vmem:[%s2670_s24] sm:$0x1] %vm643_vm8, %v641_v35 }
0x1217   : > { %1923 = vrot.lane.b32.xlu1 %v2372_v40, %s2497_s16  ;;  %s1965_s16 = sshll.u32 %s2670_s24, 4  ;;  %s1966_s16 = int_to_ptr.vmem [resolvable:$true] %s1965_s16 }
0x121c   : > { %1773 = vrot.lane.b32.xlu0 %v1771_v39, %s2496_s19 }
0x121d   : > { %v914_v62 = vpop.permute.xlu2 %913 }
0x121e   : > { %2123 = vst.msk [vmem:[%s2672_s12 + $0x6] sm:$0x1] %vm643_vm8, %v914_v62 }
0x121f   : > { %827 = vrot.lane.b32.xlu1 %v825_v44, %s2496_s19 }
0x1225   : > { %v1172_v48 = vpop.permute.xlu2 %1171 }
0x1226   : > { %2132 = vst.msk [vmem:[%s2670_s24 + $0x3] sm:$0x1] %vm643_vm8, %v1172_v48 }
0x1227   : > { %1085 = vrot.lane.b32.xlu1 %v1083_v58, %s2496_s19 }
0x122d   : > { %v1430_v8 = vpop.permute.xlu2 %1429 }
0x122e   : > { %2141 = vst.msk [vmem:[%s2672_s12 + $0x3] sm:$0x1] %vm643_vm8, %v1430_v8 }
0x122f   : > { %1343 = vrot.lane.b32.xlu1 %v1341_v52, %s2496_s19 }
0x1235   : > { %v1688_v26 = vpop.permute.xlu2 %1687 }
0x1236   : > { %2150 = vst.msk [vmem:[%s2670_s24 + $0x6] sm:$0x1] %vm643_vm8, %v1688_v26 }
0x1237   : > { %1601 = vrot.lane.b32.xlu1 %v1599_v54, %s2496_s19 }
0x126e   : > { %v1839_v56 = vpop.permute.xlu0 %1838 }
0x126f   : > { %v1841_v41 = vmul.f32 %v1839_v56, %v2967_v42 }
0x1271   : > { %v1852_v59 = vpack.c.bf16 %v1841_v41, %v1841_v41  ;;  %1843 = vrot.lane.b32.xlu0 %v1841_v41, %s2496_s19 }
0x1273   : > { %v1854_v61 = vrot.slane %v1852_v59, 3 }
0x1275   : > { %v1857_v63 = vsel %vm635_vm4, %v1852_v59, %v1854_v61 }
0x1276   : > { %1859 = vrot.lane.b32.xlu1 %v1857_v63, %s2496_s19  ;;  %v1000_v0 = vpop.permute.xlu0 %999 }
0x1277   : > { %2126 = vst.msk [vmem:[%s2670_s24 + $0x2] sm:$0x1] %vm643_vm8, %v1000_v0 }
0x1279   : > { %1933 = vrot.lane.b32.xlu0 %v1920_v32, %s2498_s25 }
0x127e   : > { %1848 = vrot.lane.b32.xlu1 %v1835_v5, %s2498_s25  ;;  %v1258_v2 = vpop.permute.xlu0 %1257  ;;  %s1981_s25 = scalar_lea.hbm %s3162_s9, %s2655_s22 }
0x127f   : > { %2135 = vst.msk [vmem:[%s2672_s12 + $0x4] sm:$0x1] %vm643_vm8, %v1258_v2  ;;  %s3083_s27 = sshll.u32 %s1981_s25, 4  ;;  %s1985_s27 = int_to_ptr.hbm [resolvable:$true] %s3083_s27 }
0x1286   : > { %v1516_v42 = vpop.permute.xlu0 %1515 }
0x1287   : > { %2144 = vst.msk [vmem:[%s2670_s24 + $0x5] sm:$0x1] %vm643_vm8, %v1516_v42 }
0x1289   : > { %v1924_v4 = vpop.permute.xlu1 %1923 }
0x128a   : > { %v1926_v7 = vmul.f32 %v1924_v4, %v2973_v3 }
0x128c   : > { %v1937_v9 = vpack.c.bf16 %v1926_v7, %v1926_v7 }
0x128e   : > { %v1939_v10 = vrot.slane %v1937_v9, 3  ;;  %v1774_v11 = vpop.permute.xlu0 %1773 }
0x128f   : > { %2153 = vst.msk [vmem:[%s2672_s12 + $0x1] sm:$0x1] %vm643_vm8, %v1774_v11 }
0x1290   : > { %v1942_v12 = vsel %vm635_vm4, %v1937_v9, %v1939_v10 }
0x1291   : > { %1944 = vrot.lane.b32.xlu2 %v1942_v12, %s2496_s19  ;;  %v828_v13 = vpop.permute.xlu1 %827 }
0x1292   : > { %2120 = vst.msk [vmem:[%s2670_s24 + $0x1] sm:$0x1] %vm643_vm8, %v828_v13 }
0x1299   : > { %1928 = vrot.lane.b32.xlu2 %v1926_v7, %s2496_s19  ;;  %v1086_v15 = vpop.permute.xlu1 %1085 }
0x129a   : > { %2129 = vst.msk [vmem:[%s2672_s12 + $0x5] sm:$0x1] %vm643_vm8, %v1086_v15 }
0x12a1   : > { %v1344_v3 = vpop.permute.xlu1 %1343 }
0x12a2   : > { %2138 = vst.msk [vmem:[%s2670_s24 + $0x4] sm:$0x1] %vm643_vm8, %v1344_v3 }
0x12a9   : > { %v1602_v16 = vpop.permute.xlu1 %1601 }
0x12aa   : > { %2147 = vst.msk [vmem:[%s2672_s12 + $0x2] sm:$0x1] %vm643_vm8, %v1602_v16 }
0x12e3   : > { %v1844_v19 = vpop.permute.xlu0 %1843 }
0x12e4   : > { %1846 = vst.msk [vmem:[#allocation2] sm:$0x3] %vm625_vm12, %v1844_v19 }
0x12e8   : > { %v1860_v45 = vpop.permute.xlu1 %1859 }
0x12e9   : > { %2156 = vst.msk [vmem:[%s2670_s24 + $0x7] sm:$0x1] %vm643_vm8, %v1860_v45 }
0x12ea   : > { %2402 = shalt.err (!%p2399_p0)
}
0x12eb   : > { %s2499_s24 = smov 16   ;;  %s2500_s25 = smov 1   ;;  %v1945_v21 = vpop.permute.xlu2 %1944  ;;  %v1934_v57 = vpop.permute.xlu0 %1933 }
0x12ec   : > { %2169 = dma.vmem_to_hbm [thread:$0]  (%p2610_p5), %s1966_s16, 128, %s1968_s29, %s1949_s28, %s2499_s24, %s2499_s24, %s2500_s25   ;;  %1936 = vst.msk [vmem:[#allocation5] sm:$0x3] %vm625_vm12, %v1934_v57 }
0x12ed   : > { %1947 = vst.msk [vmem:[%s2672_s12] sm:$0x1] %vm643_vm8, %v1945_v21  ;;  %s3188_s21 = sand.u32 1, %s2473_s10   ;;  %s2417_s14 = sshra.s32 %s1985_s27, 4  ;;  %s2418_s14 = int_to_ptr.hbm [resolvable:$true] %s2417_s14 }
0x12ee   : > { %s1954_s11 = scalar_lea.sflag [#allocation11], %s3188_s21  ;;  %s2419_s22 = scalar_lea.hbm %s2418_s14, 8 }
0x12ef   : > { %p2420_p1 = scmp.ne.s32.totalorder %s2418_s14, %s2419_s22  ;;  %s2423_s23 = scalar_lea.hbm %s3162_s9, 16 }
0x12f0   : > { %p2424_p5 = scmp.lt.s32.totalorder %s2418_s14, %s3162_s9  ;;  %p2425_p4 = scmp.lt.s32.totalorder %s2423_s23, %s2419_s22 }
0x12f1   : > { %p2421_p2 = pnand %p2420_p1, %p2633_p11 }
0x12f2   : > { %p2426_p7 = por %p2425_p4, %p2424_p5 }
0x12f3   : > { %p2422_p3 = pneg %p2421_p2 }
0x12f5   : > { %p2427_p8 = pnand %p2426_p7, %p2422_p3 }
0x12f7   : > { %2430 = shalt.err (!%p2427_p8)
}
0x12f8   : > { %2170 = dma.vmem_to_hbm [thread:$0]  (%p2633_p11), %s3087_s26, 128, %s1985_s27, %s1954_s11, %s2499_s24, %s2499_s24, %s2500_s25   ;;  %v1849_v22 = vpop.permute.xlu1 %1848  ;;  %v1929_v23 = vpop.permute.xlu2 %1928 }
0x12f9   : > { %1851 = vst.msk [vmem:[#allocation3] sm:$0x3] %vm625_vm12, %v1849_v22 }
0x12fa   : > { %1931 = vst.msk [vmem:[#allocation4] sm:$0x3] %vm625_vm12, %v1929_v23 }
0x12fb PF: > { %s3189_s12 = sld [smem:[#allocation16_spill]]  ;;  %p2180_p9 = scmp.ge.s32.totalorder %s2493_s15, 2 }
0x12fd   : > { %p2174_p10 = pnand %p2180_p9, %p2616_p6 }
0x12ff   : > { %p2175_p13 = pneg %p2174_p10 }
0x1301   : > { %s1999_s19 = sand.u32 1, %s3189_s12  }
0x1302   : > { %s2000_s17 = scalar_lea.sflag [#allocation9], %s1999_s19 }
0x1303   : > { %2460 = dma.done.wait (%p2175_p13), %s2000_s17, 128  }
0x1304   : > { %2462 = vsyncadd (%p2175_p13), %s2000_s17, 4294967168  ;;  %s3191_s20 = sld [smem:[#allocation14_spill]]  ;;  %p2177_p11 = pnand %p2180_p9, %p2639_p12 }
0x1306   : > { %p2178_p0 = pneg %p2177_p11 }
0x130a   : > { %s2009_s27 = sand.u32 1, %s3191_s20  }
0x130b   : > { %s2010_s24 = scalar_lea.sflag [#allocation11], %s2009_s27 }
0x130c   : > { %2464 = dma.done.wait (%p2178_p0), %s2010_s24, 128  }
0x130d   : > { %2466 = vsyncadd (%p2178_p0), %s2010_s24, 4294967168  ;;  %s3193_s15 = sld [smem:[#allocation18_spill]]  ;;  %s3198_s30 = smov %s2473_s10 }
0x130e   : > { %s3194_s25 = sld [smem:[#allocation15_spill]]  ;;  %s3200_s12 = smov %s2485_s13 }
0x130f   : > { %s3195_s11 = sld [smem:[#allocation21_spill]] }
0x1310   : > { %s3196_s21 = sld [smem:[#allocation17_spill]] }
0x1311   : > { %s3197_s14 = sld [smem:[#allocation19_spill]] }
0x1313   : > { %p23_p6 = scmp.ge.s32.totalorder %s3193_s15, 4  }
0x1314   : > { %s3199_s10 = smov %s3194_s25 }
0x1315   :  { %25 = sbr.rel (!%p23_p6) target bundleno = 7 (0x7), region = 153 }
0x1316   : > { %s3201_s13 = smov %s3196_s21 }
0x131a   :  { %2016 = vsyncpa [#allocation9], 1 }
0x131b   :  { %2018 = vsyncpa [#allocation9 + $0x1], 1 }
0x131c   :  { %2019 = vsyncpa [#allocation11], 1 }
0x131d   :  { %2021 = vsyncpa [#allocation11 + $0x1], 1 }

</bundles_post_ra>
